<compile_context>
chip_gen: v5e
topology: v5e:2x2
jax: 0.10.0
libtpu: 0.0.40
codegen_flags: <defaults>
</compile_context>

<pallas_src>
from math import ceil, pi

import jax
import jax.numpy as jnp
from jax.experimental import pallas as pl
from jax.experimental.pallas import tpu as pltpu

N_QUBITS = 4
N_LAYERS = 1
KERNEL_SIZE = 4          # quantum patch size
STRIDE = 2
IMG = 14                 # image_x_y_dim
N_CLASS = 3
LEAKY_SLOPE = 0.1        # nn.LeakyReLU(0.1) in the reference
INV_SQRT2 = 0.7071067811865476

N_INPUTS = KERNEL_SIZE * KERNEL_SIZE           # 16
VAR_PER_QUBIT = N_INPUTS // N_QUBITS + 1       # 5
ENC_GATES = (['RZ', 'RY'] * ceil(VAR_PER_QUBIT / 2))[:VAR_PER_QUBIT]

QUANV_OUT = (IMG - KERNEL_SIZE) // STRIDE + 1  # 6
N_PATCHES = QUANV_OUT * QUANV_OUT              # 36
CONV_OUT = QUANV_OUT - 3 + 1                   # 4
N_POS = CONV_OUT * CONV_OUT                    # 16
FC1_IN = 16 * N_POS                            # 256

SUB_ROWS = 8             # one (8,128) sub-tile = 1024 patches
MAX_SUBTILES = 8         # up to 8 sub-tiles (8192 patches) per grid step

# CRZ ring fused into one diagonal phase per basis state:
#   phase(st) = sum_i ctrl_i(st) * (theta_i/2) * (+1 if target bit set else -1)
_CRZ_COEF = [[0.5 * ((s >> i) & 1) *
              (2 * ((s >> ((i + 1) % N_QUBITS)) & 1) - 1)
              for i in range(N_QUBITS)] for s in range(16)]
_TAB_PER_LAYER = 16 + N_QUBITS   # 16 CRZ-diag entries + 4 RY half-angles


def _round_up(x, m):
    return ((x + m - 1) // m) * m


def _cdiv(a, b):
    return (a + b - 1) // b


# ------------------------------------------------------------------------
# trace-time constant-folding helpers (skip mul/add on Python 0.0 / 1.0)
# ------------------------------------------------------------------------
def _isf(x):
    return isinstance(x, (int, float))


def _mul(x, y):
    if _isf(x):
        if x == 0.0:
            return 0.0
        if x == 1.0:
            return y
    if _isf(y):
        if y == 0.0:
            return 0.0
        if y == 1.0:
            return x
    return x * y


def _add(x, y):
    if _isf(x) and x == 0.0:
        return y
    if _isf(y) and y == 0.0:
        return x
    return x + y


def _sub(x, y):
    if _isf(y) and y == 0.0:
        return x
    if _isf(x) and x == 0.0:
        return -y
    return x - y


def _cmul(ar, ai, br, bi):
    """(ar + i*ai) * (br + i*bi)."""
    return (_sub(_mul(ar, br), _mul(ai, bi)),
            _add(_mul(ar, bi), _mul(ai, br)))


def _rz_1q(a0, a1, c, s):
    """RZ on a single-qubit state: a0 *= (c - i s), a1 *= (c + i s)."""
    return _cmul(a0[0], a0[1], c, -s), _cmul(a1[0], a1[1], c, s)


def _ry_1q(a0, a1, c, s):
    """RY on a single-qubit state (real 2x2 rotation)."""
    r0 = _sub(_mul(c, a0[0]), _mul(s, a1[0]))
    i0 = _sub(_mul(c, a0[1]), _mul(s, a1[1]))
    r1 = _add(_mul(s, a0[0]), _mul(c, a1[0]))
    i1 = _add(_mul(s, a0[1]), _mul(c, a1[1]))
    return (r0, i0), (r1, i1)


# --------------------------- quantum conv kernel ---------------------------
def _make_quanv_kernel(nsub):
    """Exact 4-qubit simulation of `circuit`, nsub*1024 patches per grid step.

    wtab_ref : SMEM [2, N_LAYERS*20]   cos/sin of (fused CRZ diag, RY/2)
    cs_ref   : VMEM [32, nsub*8, 128]  cos/sin of (patch value / 2)
    out_ref  : VMEM [4,  nsub*8, 128]  <Z_q> per qubit per patch
    """

    def kernel(wtab_ref, cs_ref, out_ref):

        def sub_tile(t, carry):
            off = pl.multiple_of(t * SUB_ROWS, SUB_ROWS)
            rows = pl.ds(off, SUB_ROWS)

            def cosv(idx):
                return cs_ref[idx, rows, :]

            def sinv(idx):
                return cs_ref[N_INPUTS + idx, rows, :]

            # --- per-qubit product-state encoding: H + data rotations ---
            qstates = []
            for q in range(N_QUBITS):
                a0 = (INV_SQRT2, 0.0)        # H|0> = (1, 1)/sqrt(2)
                a1 = (INV_SQRT2, 0.0)
                for i in range(VAR_PER_QUBIT):
                    idx = q * VAR_PER_QUBIT + i
                    if idx >= N_INPUTS:
                        continue
                    c, s = cosv(idx), sinv(idx)
                    if ENC_GATES[i] == 'RZ':
                        a0, a1 = _rz_1q(a0, a1, c, s)
                    else:
                        a0, a1 = _ry_1q(a0, a1, c, s)
                qstates.append((a0, a1))

            # --- single tensor product -> 16-amplitude state (bit q = qubit q) ---
            amps = [(1.0, 0.0)]
            for q in range(N_QUBITS):
                a0, a1 = qstates[q]
                n = len(amps)
                new = [None] * (2 * n)
                for j in range(n):
                    ar, ai = amps[j]
                    new[j] = _cmul(ar, ai, a0[0], a0[1])
                    new[j + n] = _cmul(ar, ai, a1[0], a1[1])
                amps = new
            re = [a[0] for a in amps]
            im = [a[1] for a in amps]

            # --- variational layer(s) ---
            z = None
            for l in range(N_LAYERS):
                base = l * _TAB_PER_LAYER
                # fused CRZ ring: one diagonal phase per basis state
                # (state 0 has no control bits set -> provably identity)
                for st in range(1, 16):
                    c = wtab_ref[0, base + st]
                    s = wtab_ref[1, base + st]
                    re[st], im[st] = (re[st] * c - im[st] * s,
                                      im[st] * c + re[st] * s)
                # RY layer; fold |amp|^2 / <Z_q> into the very last gate so
                # amplitude pairs die as soon as they are consumed.
                for q in range(N_QUBITS):
                    c = wtab_ref[0, base + 16 + q]
                    s = wtab_ref[1, base + 16 + q]
                    b = 1 << q
                    last = (l == N_LAYERS - 1) and (q == N_QUBITS - 1)
                    if last:
                        z = [0.0] * N_QUBITS
                    for s0 in range(16):
                        if s0 & b:
                            continue
                        s1 = s0 | b
                        r0 = c * re[s0] - s * re[s1]
                        i0 = c * im[s0] - s * im[s1]
                        r1 = s * re[s0] + c * re[s1]
                        i1 = s * im[s0] + c * im[s1]
                        if last:
                            p0 = r0 * r0 + i0 * i0
                            p1 = r1 * r1 + i1 * i1
                            for qq in range(N_QUBITS):
                                bb = 1 << qq
                                z[qq] = (_sub(z[qq], p0) if (s0 & bb)
                                         else _add(z[qq], p0))
                                z[qq] = (_sub(z[qq], p1) if (s1 & bb)
                                         else _add(z[qq], p1))
                        else:
                            re[s0], im[s0] = r0, i0
                            re[s1], im[s1] = r1, i1

            for q in range(N_QUBITS):
                out_ref[q, rows, :] = z[q]
            return carry

        jax.lax.fori_loop(0, nsub, sub_tile, None, unroll=True)

    return kernel


def quanv_layer(x_img, q_weights):
    """x_img: [bs, 14, 14] -> quantum feature map [bs, 4, 6, 6]
    (same cat+view ordering as the PyTorch Quanv2d.forward)."""
    bs = x_img.shape[0]
    x_img = x_img.astype(jnp.float32)

    # channel-major patch extraction (XLA glue): ang[k, g] with
    #   k = kh*4 + kw, g = b*36 + oy*6 + ox  -- already the kernel's layout.
    hi = STRIDE * (QUANV_OUT - 1) + 1
    cols = [x_img[:, kh:kh + hi:STRIDE, kw:kw + hi:STRIDE]
            for kh in range(KERNEL_SIZE) for kw in range(KERNEL_SIZE)]
    P = bs * N_PATCHES
    ang = jnp.stack(cols, axis=0).reshape(N_INPUTS, P)          # [16, P]

    # tile / grid sizing: up to 8 sub-tiles per step, >=2 steps when possible
    tiles = _cdiv(P, SUB_ROWS * 128)
    nsub = min(MAX_SUBTILES, tiles)
    if tiles >= 2 and _cdiv(tiles, nsub) < 2:
        nsub = max(1, tiles // 2)
    steps = _cdiv(tiles, nsub)
    P_pad = steps * nsub * SUB_ROWS * 128
    nrow = P_pad // 128

    # half-angle cos/sin precomputed in the wrapper (no in-kernel trig)
    half = ang * 0.5
    cs = jnp.concatenate([jnp.cos(half), jnp.sin(half)], axis=0)  # [32, P]
    cs = jnp.pad(cs, ((0, 0), (0, P_pad - P)))
    cs = cs.reshape(2 * N_INPUTS, nrow, 128)

    # SMEM gate table: fused CRZ diagonal + RY half-angles, per layer
    w = q_weights.reshape(N_LAYERS, 2 * N_QUBITS).astype(jnp.float32)
    coef = jnp.asarray(_CRZ_COEF, jnp.float32)                    # [16, 4]
    phases = w[:, :N_QUBITS] @ coef.T                             # [L, 16]
    ry_half = w[:, N_QUBITS:] * 0.5                               # [L, 4]
    tab_ang = jnp.concatenate([phases, ry_half], axis=1).reshape(-1)
    wtab = jnp.stack([jnp.cos(tab_ang), jnp.sin(tab_ang)], axis=0)  # [2, 20L]

    flops = 900 * P_pad   # ~per-patch vector-op estimate for the circuit
    bytes_acc = (2 * N_INPUTS + N_QUBITS) * P_pad * 4 + 2 * N_LAYERS * _TAB_PER_LAYER * 4

    z = pl.pallas_call(
        _make_quanv_kernel(nsub),
        out_shape=jax.ShapeDtypeStruct((N_QUBITS, nrow, 128), jnp.float32),
        grid=(steps,),
        in_specs=[
            pl.BlockSpec(memory_space=pltpu.MemorySpace.SMEM),        # wtab
            pl.BlockSpec((2 * N_INPUTS, nsub * SUB_ROWS, 128),
                         lambda t: (0, t, 0)),                        # cos/sin
        ],
        out_specs=pl.BlockSpec((N_QUBITS, nsub * SUB_ROWS, 128),
                               lambda t: (0, t, 0)),
        compiler_params=pltpu.CompilerParams(
            dimension_semantics=("parallel",)),
        cost_estimate=pl.CostEstimate(flops=flops, transcendentals=0,
                                      bytes_accessed=bytes_acc),
    )(wtab, cs)

    # [4, nrow, 128] -> [4, P_pad] -> [P, 4] -> [bs, 144] (col = p*4 + qubit,
    # matching torch.cat) -> view(bs, 4, 6, 6)
    z = z.reshape(N_QUBITS, P_pad)[:, :P].T
    z = z.reshape(bs, N_PATCHES * N_QUBITS)
    return z.reshape(bs, N_QUBITS, QUANV_OUT, QUANV_OUT)


# ---------------- fused classical tail: conv1 + fc1 + fc2 -------------------
def _tail_kernel(col_ref, wc_ref, bc_ref, w1_ref, b1_ref, w2_ref, b2_ref,
                 out_ref):
    """Lane-dense tail: batch lives on the lane axis everywhere.

    col_ref: [16(pos), 36, TB]  im2col of the quanv feature map
    wc_ref : [16(oc), 36]       conv1 weight, k = ci*9 + kh*3 + kw
    bc_ref : [16, 1]
    w1_ref : [16(pos), 6, 16]   fc1 weight permuted to (pos, out, ch)
    b1_ref : [6, 1]
    w2_ref : [3, 6]             fc2 weight transposed
    b2_ref : [3, 1]
    out_ref: [3, TB]
    """
    wc = wc_ref[...]
    bc = bc_ref[...]
    acc = None
    for p in range(N_POS):
        hc = jnp.dot(wc, col_ref[p],
                     preferred_element_type=jnp.float32) + bc      # [16, TB]
        hc = jnp.where(hc >= 0, hc, LEAKY_SLOPE * hc)              # conv+leaky
        part = jnp.dot(w1_ref[p], hc,
                       preferred_element_type=jnp.float32)         # [6, TB]
        acc = part if acc is None else acc + part
    h1 = acc + b1_ref[...]
    h1 = jnp.where(h1 >= 0, h1, LEAKY_SLOPE * h1)                  # leaky(fc1)
    out = jnp.dot(w2_ref[...], h1,
                  preferred_element_type=jnp.float32) + b2_ref[...]
    out_ref[...] = out.astype(out_ref.dtype)


def classical_tail(q_feat, params):
    """q_feat: [bs, 4, 6, 6] -> logits [bs, 3] (conv1+leaky+fc1+leaky+fc2)."""
    bs = q_feat.shape[0]

    # im2col (XLA glue): col[pos, k, b], pos = oy*4+ox, k = ci*9 + kh*3 + kw.
    cols = [q_feat[:, :, kh:kh + CONV_OUT, kw:kw + CONV_OUT]
            for kh in range(3) for kw in range(3)]                 # [bs,4,4,4]
    col = jnp.stack(cols, axis=-1)                                 # [bs,ci,oy,ox,9]
    col = col.transpose(2, 3, 1, 4, 0).reshape(N_POS, 36, bs)
    col = col.astype(jnp.float32)

    # batch tile: lane-dense (multiple of 128), >=2 parallel steps when possible
    bs_pad = _round_up(bs, 128)
    TB = min(1024, bs_pad)
    if bs_pad // TB < 2 and bs_pad >= 256:
        TB = max(128, (bs_pad // 2) // 128 * 128)
    bs_pad = _round_up(bs_pad, TB)
    col = jnp.pad(col, ((0, 0), (0, 0), (0, bs_pad - bs)))

    wc = params["conv1_w"].reshape(16, 36).astype(jnp.float32)     # [oc, 36]
    bc = params["conv1_b"].reshape(16, 1).astype(jnp.float32)
    # fc1 row index is NCHW flatten c*16 + pos -> permute to (pos, out, ch)
    w1r = params["fc1_w"].reshape(16, N_POS, 2 * N_CLASS)          # [oc,pos,6]
    w1r = w1r.transpose(1, 2, 0).astype(jnp.float32)               # [pos,6,oc]
    b1 = params["fc1_b"].reshape(2 * N_CLASS, 1).astype(jnp.float32)
    w2t = params["fc2_w"].T.astype(jnp.float32)                    # [3, 6]
    b2 = params["fc2_b"].reshape(N_CLASS, 1).astype(jnp.float32)

    out = pl.pallas_call(
        _tail_kernel,
        out_shape=jax.ShapeDtypeStruct((N_CLASS, bs_pad), jnp.float32),
        grid=(bs_pad // TB,),
        in_specs=[
            pl.BlockSpec((N_POS, 36, TB), lambda t: (0, 0, t)),
            pl.BlockSpec((16, 36), lambda t: (0, 0)),
            pl.BlockSpec((16, 1), lambda t: (0, 0)),
            pl.BlockSpec((N_POS, 2 * N_CLASS, 16), lambda t: (0, 0, 0)),
            pl.BlockSpec((2 * N_CLASS, 1), lambda t: (0, 0)),
            pl.BlockSpec((N_CLASS, 2 * N_CLASS), lambda t: (0, 0)),
            pl.BlockSpec((N_CLASS, 1), lambda t: (0, 0)),
        ],
        out_specs=pl.BlockSpec((N_CLASS, TB), lambda t: (0, t)),
        compiler_params=pltpu.CompilerParams(
            dimension_semantics=("parallel",)),
    )(col, wc, bc, w1r, b1, w2t, b2)
    return out[:, :bs].T


# --------------------------------- Net --------------------------------------
def init_params(key):
    ks = jax.random.split(key, 7)
    return {
        "q_weights": jax.random.uniform(ks[0], (N_LAYERS, 2 * N_QUBITS),
                                        jnp.float32, 0.0, 2.0 * pi),
        "conv1_w": 0.1 * jax.random.normal(ks[1], (16, N_QUBITS, 3, 3), jnp.float32),
        "conv1_b": 0.1 * jax.random.normal(ks[2], (16,), jnp.float32),
        "fc1_w":  0.1 * jax.random.normal(ks[3], (FC1_IN, 2 * N_CLASS), jnp.float32),
        "fc1_b":  0.1 * jax.random.normal(ks[4], (2 * N_CLASS,), jnp.float32),
        "fc2_w":  0.1 * jax.random.normal(ks[5], (2 * N_CLASS, N_CLASS), jnp.float32),
        "fc2_b":  0.1 * jax.random.normal(ks[6], (N_CLASS,), jnp.float32),
    }


def net_forward(params, x):
    bs = x.shape[0]
    x_img = x.reshape(bs, IMG, IMG).astype(jnp.float32)    # X.view(bs,1,14,14)
    q = quanv_layer(x_img, params["q_weights"])            # [bs, 4, 6, 6]
    return classical_tail(q, params)                       # [bs, 3]


if __name__ == "__main__":
    key = jax.random.PRNGKey(0)
    pkey, xkey = jax.random.split(key)
    params = init_params(pkey)
    x = jax.random.normal(xkey, (2, 1, IMG, IMG), dtype=jnp.float32)
    out = jax.jit(net_forward)(params, x)
    jax.block_until_ready(out)
    assert out.shape == (2, N_CLASS) and out.dtype == jnp.float32
    print("KERNEL_OK")
</pallas_src>

<mosaic_0001>
module attributes {stable_mosaic.version = 11 : i64} {
  func.func @kernel(%arg0: i32, %arg1: memref<2x20xf32, #tpu.memory_space<smem>>, %arg2: memref<32x8x128xf32, #tpu.memory_space<vmem>>, %arg3: memref<4x8x128xf32, #tpu.memory_space<vmem>>) attributes {dimension_semantics = [#tpu.dimension_semantics<parallel>], iteration_bounds = array<i64: 1>, scalar_prefetch = 0 : i64, scratch_operands = 0 : i64, tpu.core_type = #tpu.core_type<tc>, window_params = [{transform_indices = @transform_0, window_bounds = array<i64: 2, 20>}, {transform_indices = @transform_1, window_bounds = array<i64: 32, 8, 128>}, {transform_indices = @transform_2, window_bounds = array<i64: 4, 8, 128>}]} {
    %c0_i32 = arith.constant 0 : i32
    %c8_i32 = arith.constant 8 : i32
    %0 = arith.muli %c0_i32, %c8_i32 : i32
    %1 = tpu.assume_multiple %0, 8 : i32
    %c0 = arith.constant 0 : index
    %2 = arith.index_cast %1 : i32 to index
    %c0_0 = arith.constant 0 : index
    %3 = vector.load %arg2[%c0, %2, %c0_0] : memref<32x8x128xf32, #tpu.memory_space<vmem>>, vector<1x8x128xf32>
    %4 = vector.shape_cast %3 : vector<1x8x128xf32> to vector<8x128xf32>
    %c16 = arith.constant 16 : index
    %5 = arith.index_cast %1 : i32 to index
    %c0_1 = arith.constant 0 : index
    %6 = vector.load %arg2[%c16, %5, %c0_1] : memref<32x8x128xf32, #tpu.memory_space<vmem>>, vector<1x8x128xf32>
    %7 = vector.shape_cast %6 : vector<1x8x128xf32> to vector<8x128xf32>
    %cst = arith.constant 0.000000e+00 : f32
    %8 = vector.broadcast %cst : f32 to vector<8x128xf32>
    %9 = arith.subf %8, %7 : vector<8x128xf32>
    %cst_2 = arith.constant 0.707106769 : f32
    %10 = vector.broadcast %cst_2 : f32 to vector<8x128xf32>
    %11 = arith.mulf %10, %4 : vector<8x128xf32>
    %cst_3 = arith.constant 0.707106769 : f32
    %12 = vector.broadcast %cst_3 : f32 to vector<8x128xf32>
    %13 = arith.mulf %12, %9 : vector<8x128xf32>
    %cst_4 = arith.constant 0.707106769 : f32
    %14 = vector.broadcast %cst_4 : f32 to vector<8x128xf32>
    %15 = arith.mulf %14, %4 : vector<8x128xf32>
    %cst_5 = arith.constant 0.707106769 : f32
    %16 = vector.broadcast %cst_5 : f32 to vector<8x128xf32>
    %17 = arith.mulf %16, %7 : vector<8x128xf32>
    %c1 = arith.constant 1 : index
    %18 = arith.index_cast %1 : i32 to index
    %c0_6 = arith.constant 0 : index
    %19 = vector.load %arg2[%c1, %18, %c0_6] : memref<32x8x128xf32, #tpu.memory_space<vmem>>, vector<1x8x128xf32>
    %20 = vector.shape_cast %19 : vector<1x8x128xf32> to vector<8x128xf32>
    %c17 = arith.constant 17 : index
    %21 = arith.index_cast %1 : i32 to index
    %c0_7 = arith.constant 0 : index
    %22 = vector.load %arg2[%c17, %21, %c0_7] : memref<32x8x128xf32, #tpu.memory_space<vmem>>, vector<1x8x128xf32>
    %23 = vector.shape_cast %22 : vector<1x8x128xf32> to vector<8x128xf32>
    %24 = arith.mulf %20, %11 : vector<8x128xf32>
    %25 = arith.mulf %23, %15 : vector<8x128xf32>
    %26 = arith.subf %24, %25 : vector<8x128xf32>
    %27 = arith.mulf %20, %13 : vector<8x128xf32>
    %28 = arith.mulf %23, %17 : vector<8x128xf32>
    %29 = arith.subf %27, %28 : vector<8x128xf32>
    %30 = arith.mulf %23, %11 : vector<8x128xf32>
    %31 = arith.mulf %20, %15 : vector<8x128xf32>
    %32 = arith.addf %30, %31 : vector<8x128xf32>
    %33 = arith.mulf %23, %13 : vector<8x128xf32>
    %34 = arith.mulf %20, %17 : vector<8x128xf32>
    %35 = arith.addf %33, %34 : vector<8x128xf32>
    %c2 = arith.constant 2 : index
    %36 = arith.index_cast %1 : i32 to index
    %c0_8 = arith.constant 0 : index
    %37 = vector.load %arg2[%c2, %36, %c0_8] : memref<32x8x128xf32, #tpu.memory_space<vmem>>, vector<1x8x128xf32>
    %38 = vector.shape_cast %37 : vector<1x8x128xf32> to vector<8x128xf32>
    %c18 = arith.constant 18 : index
    %39 = arith.index_cast %1 : i32 to index
    %c0_9 = arith.constant 0 : index
    %40 = vector.load %arg2[%c18, %39, %c0_9] : memref<32x8x128xf32, #tpu.memory_space<vmem>>, vector<1x8x128xf32>
    %41 = vector.shape_cast %40 : vector<1x8x128xf32> to vector<8x128xf32>
    %cst_10 = arith.constant 0.000000e+00 : f32
    %42 = vector.broadcast %cst_10 : f32 to vector<8x128xf32>
    %43 = arith.subf %42, %41 : vector<8x128xf32>
    %44 = arith.mulf %26, %38 : vector<8x128xf32>
    %45 = arith.mulf %29, %43 : vector<8x128xf32>
    %46 = arith.subf %44, %45 : vector<8x128xf32>
    %47 = arith.mulf %26, %43 : vector<8x128xf32>
    %48 = arith.mulf %29, %38 : vector<8x128xf32>
    %49 = arith.addf %47, %48 : vector<8x128xf32>
    %50 = arith.mulf %32, %38 : vector<8x128xf32>
    %51 = arith.mulf %35, %41 : vector<8x128xf32>
    %52 = arith.subf %50, %51 : vector<8x128xf32>
    %53 = arith.mulf %32, %41 : vector<8x128xf32>
    %54 = arith.mulf %35, %38 : vector<8x128xf32>
    %55 = arith.addf %53, %54 : vector<8x128xf32>
    %c3 = arith.constant 3 : index
    %56 = arith.index_cast %1 : i32 to index
    %c0_11 = arith.constant 0 : index
    %57 = vector.load %arg2[%c3, %56, %c0_11] : memref<32x8x128xf32, #tpu.memory_space<vmem>>, vector<1x8x128xf32>
    %58 = vector.shape_cast %57 : vector<1x8x128xf32> to vector<8x128xf32>
    %c19 = arith.constant 19 : index
    %59 = arith.index_cast %1 : i32 to index
    %c0_12 = arith.constant 0 : index
    %60 = vector.load %arg2[%c19, %59, %c0_12] : memref<32x8x128xf32, #tpu.memory_space<vmem>>, vector<1x8x128xf32>
    %61 = vector.shape_cast %60 : vector<1x8x128xf32> to vector<8x128xf32>
    %62 = arith.mulf %58, %46 : vector<8x128xf32>
    %63 = arith.mulf %61, %52 : vector<8x128xf32>
    %64 = arith.subf %62, %63 : vector<8x128xf32>
    %65 = arith.mulf %58, %49 : vector<8x128xf32>
    %66 = arith.mulf %61, %55 : vector<8x128xf32>
    %67 = arith.subf %65, %66 : vector<8x128xf32>
    %68 = arith.mulf %61, %46 : vector<8x128xf32>
    %69 = arith.mulf %58, %52 : vector<8x128xf32>
    %70 = arith.addf %68, %69 : vector<8x128xf32>
    %71 = arith.mulf %61, %49 : vector<8x128xf32>
    %72 = arith.mulf %58, %55 : vector<8x128xf32>
    %73 = arith.addf %71, %72 : vector<8x128xf32>
    %c4 = arith.constant 4 : index
    %74 = arith.index_cast %1 : i32 to index
    %c0_13 = arith.constant 0 : index
    %75 = vector.load %arg2[%c4, %74, %c0_13] : memref<32x8x128xf32, #tpu.memory_space<vmem>>, vector<1x8x128xf32>
    %76 = vector.shape_cast %75 : vector<1x8x128xf32> to vector<8x128xf32>
    %c20 = arith.constant 20 : index
    %77 = arith.index_cast %1 : i32 to index
    %c0_14 = arith.constant 0 : index
    %78 = vector.load %arg2[%c20, %77, %c0_14] : memref<32x8x128xf32, #tpu.memory_space<vmem>>, vector<1x8x128xf32>
    %79 = vector.shape_cast %78 : vector<1x8x128xf32> to vector<8x128xf32>
    %cst_15 = arith.constant 0.000000e+00 : f32
    %80 = vector.broadcast %cst_15 : f32 to vector<8x128xf32>
    %81 = arith.subf %80, %79 : vector<8x128xf32>
    %82 = arith.mulf %64, %76 : vector<8x128xf32>
    %83 = arith.mulf %67, %81 : vector<8x128xf32>
    %84 = arith.subf %82, %83 : vector<8x128xf32>
    %85 = arith.mulf %64, %81 : vector<8x128xf32>
    %86 = arith.mulf %67, %76 : vector<8x128xf32>
    %87 = arith.addf %85, %86 : vector<8x128xf32>
    %88 = arith.mulf %70, %76 : vector<8x128xf32>
    %89 = arith.mulf %73, %79 : vector<8x128xf32>
    %90 = arith.subf %88, %89 : vector<8x128xf32>
    %91 = arith.mulf %70, %79 : vector<8x128xf32>
    %92 = arith.mulf %73, %76 : vector<8x128xf32>
    %93 = arith.addf %91, %92 : vector<8x128xf32>
    %c5 = arith.constant 5 : index
    %94 = arith.index_cast %1 : i32 to index
    %c0_16 = arith.constant 0 : index
    %95 = vector.load %arg2[%c5, %94, %c0_16] : memref<32x8x128xf32, #tpu.memory_space<vmem>>, vector<1x8x128xf32>
    %96 = vector.shape_cast %95 : vector<1x8x128xf32> to vector<8x128xf32>
    %c21 = arith.constant 21 : index
    %97 = arith.index_cast %1 : i32 to index
    %c0_17 = arith.constant 0 : index
    %98 = vector.load %arg2[%c21, %97, %c0_17] : memref<32x8x128xf32, #tpu.memory_space<vmem>>, vector<1x8x128xf32>
    %99 = vector.shape_cast %98 : vector<1x8x128xf32> to vector<8x128xf32>
    %cst_18 = arith.constant 0.000000e+00 : f32
    %100 = vector.broadcast %cst_18 : f32 to vector<8x128xf32>
    %101 = arith.subf %100, %99 : vector<8x128xf32>
    %cst_19 = arith.constant 0.707106769 : f32
    %102 = vector.broadcast %cst_19 : f32 to vector<8x128xf32>
    %103 = arith.mulf %102, %96 : vector<8x128xf32>
    %cst_20 = arith.constant 0.707106769 : f32
    %104 = vector.broadcast %cst_20 : f32 to vector<8x128xf32>
    %105 = arith.mulf %104, %101 : vector<8x128xf32>
    %cst_21 = arith.constant 0.707106769 : f32
    %106 = vector.broadcast %cst_21 : f32 to vector<8x128xf32>
    %107 = arith.mulf %106, %96 : vector<8x128xf32>
    %cst_22 = arith.constant 0.707106769 : f32
    %108 = vector.broadcast %cst_22 : f32 to vector<8x128xf32>
    %109 = arith.mulf %108, %99 : vector<8x128xf32>
    %c6 = arith.constant 6 : index
    %110 = arith.index_cast %1 : i32 to index
    %c0_23 = arith.constant 0 : index
    %111 = vector.load %arg2[%c6, %110, %c0_23] : memref<32x8x128xf32, #tpu.memory_space<vmem>>, vector<1x8x128xf32>
    %112 = vector.shape_cast %111 : vector<1x8x128xf32> to vector<8x128xf32>
    %c22 = arith.constant 22 : index
    %113 = arith.index_cast %1 : i32 to index
    %c0_24 = arith.constant 0 : index
    %114 = vector.load %arg2[%c22, %113, %c0_24] : memref<32x8x128xf32, #tpu.memory_space<vmem>>, vector<1x8x128xf32>
    %115 = vector.shape_cast %114 : vector<1x8x128xf32> to vector<8x128xf32>
    %116 = arith.mulf %112, %103 : vector<8x128xf32>
    %117 = arith.mulf %115, %107 : vector<8x128xf32>
    %118 = arith.subf %116, %117 : vector<8x128xf32>
    %119 = arith.mulf %112, %105 : vector<8x128xf32>
    %120 = arith.mulf %115, %109 : vector<8x128xf32>
    %121 = arith.subf %119, %120 : vector<8x128xf32>
    %122 = arith.mulf %115, %103 : vector<8x128xf32>
    %123 = arith.mulf %112, %107 : vector<8x128xf32>
    %124 = arith.addf %122, %123 : vector<8x128xf32>
    %125 = arith.mulf %115, %105 : vector<8x128xf32>
    %126 = arith.mulf %112, %109 : vector<8x128xf32>
    %127 = arith.addf %125, %126 : vector<8x128xf32>
    %c7 = arith.constant 7 : index
    %128 = arith.index_cast %1 : i32 to index
    %c0_25 = arith.constant 0 : index
    %129 = vector.load %arg2[%c7, %128, %c0_25] : memref<32x8x128xf32, #tpu.memory_space<vmem>>, vector<1x8x128xf32>
    %130 = vector.shape_cast %129 : vector<1x8x128xf32> to vector<8x128xf32>
    %c23 = arith.constant 23 : index
    %131 = arith.index_cast %1 : i32 to index
    %c0_26 = arith.constant 0 : index
    %132 = vector.load %arg2[%c23, %131, %c0_26] : memref<32x8x128xf32, #tpu.memory_space<vmem>>, vector<1x8x128xf32>
    %133 = vector.shape_cast %132 : vector<1x8x128xf32> to vector<8x128xf32>
    %cst_27 = arith.constant 0.000000e+00 : f32
    %134 = vector.broadcast %cst_27 : f32 to vector<8x128xf32>
    %135 = arith.subf %134, %133 : vector<8x128xf32>
    %136 = arith.mulf %118, %130 : vector<8x128xf32>
    %137 = arith.mulf %121, %135 : vector<8x128xf32>
    %138 = arith.subf %136, %137 : vector<8x128xf32>
    %139 = arith.mulf %118, %135 : vector<8x128xf32>
    %140 = arith.mulf %121, %130 : vector<8x128xf32>
    %141 = arith.addf %139, %140 : vector<8x128xf32>
    %142 = arith.mulf %124, %130 : vector<8x128xf32>
    %143 = arith.mulf %127, %133 : vector<8x128xf32>
    %144 = arith.subf %142, %143 : vector<8x128xf32>
    %145 = arith.mulf %124, %133 : vector<8x128xf32>
    %146 = arith.mulf %127, %130 : vector<8x128xf32>
    %147 = arith.addf %145, %146 : vector<8x128xf32>
    %c8 = arith.constant 8 : index
    %148 = arith.index_cast %1 : i32 to index
    %c0_28 = arith.constant 0 : index
    %149 = vector.load %arg2[%c8, %148, %c0_28] : memref<32x8x128xf32, #tpu.memory_space<vmem>>, vector<1x8x128xf32>
    %150 = vector.shape_cast %149 : vector<1x8x128xf32> to vector<8x128xf32>
    %c24 = arith.constant 24 : index
    %151 = arith.index_cast %1 : i32 to index
    %c0_29 = arith.constant 0 : index
    %152 = vector.load %arg2[%c24, %151, %c0_29] : memref<32x8x128xf32, #tpu.memory_space<vmem>>, vector<1x8x128xf32>
    %153 = vector.shape_cast %152 : vector<1x8x128xf32> to vector<8x128xf32>
    %154 = arith.mulf %150, %138 : vector<8x128xf32>
    %155 = arith.mulf %153, %144 : vector<8x128xf32>
    %156 = arith.subf %154, %155 : vector<8x128xf32>
    %157 = arith.mulf %150, %141 : vector<8x128xf32>
    %158 = arith.mulf %153, %147 : vector<8x128xf32>
    %159 = arith.subf %157, %158 : vector<8x128xf32>
    %160 = arith.mulf %153, %138 : vector<8x128xf32>
    %161 = arith.mulf %150, %144 : vector<8x128xf32>
    %162 = arith.addf %160, %161 : vector<8x128xf32>
    %163 = arith.mulf %153, %141 : vector<8x128xf32>
    %164 = arith.mulf %150, %147 : vector<8x128xf32>
    %165 = arith.addf %163, %164 : vector<8x128xf32>
    %c9 = arith.constant 9 : index
    %166 = arith.index_cast %1 : i32 to index
    %c0_30 = arith.constant 0 : index
    %167 = vector.load %arg2[%c9, %166, %c0_30] : memref<32x8x128xf32, #tpu.memory_space<vmem>>, vector<1x8x128xf32>
    %168 = vector.shape_cast %167 : vector<1x8x128xf32> to vector<8x128xf32>
    %c25 = arith.constant 25 : index
    %169 = arith.index_cast %1 : i32 to index
    %c0_31 = arith.constant 0 : index
    %170 = vector.load %arg2[%c25, %169, %c0_31] : memref<32x8x128xf32, #tpu.memory_space<vmem>>, vector<1x8x128xf32>
    %171 = vector.shape_cast %170 : vector<1x8x128xf32> to vector<8x128xf32>
    %cst_32 = arith.constant 0.000000e+00 : f32
    %172 = vector.broadcast %cst_32 : f32 to vector<8x128xf32>
    %173 = arith.subf %172, %171 : vector<8x128xf32>
    %174 = arith.mulf %156, %168 : vector<8x128xf32>
    %175 = arith.mulf %159, %173 : vector<8x128xf32>
    %176 = arith.subf %174, %175 : vector<8x128xf32>
    %177 = arith.mulf %156, %173 : vector<8x128xf32>
    %178 = arith.mulf %159, %168 : vector<8x128xf32>
    %179 = arith.addf %177, %178 : vector<8x128xf32>
    %180 = arith.mulf %162, %168 : vector<8x128xf32>
    %181 = arith.mulf %165, %171 : vector<8x128xf32>
    %182 = arith.subf %180, %181 : vector<8x128xf32>
    %183 = arith.mulf %162, %171 : vector<8x128xf32>
    %184 = arith.mulf %165, %168 : vector<8x128xf32>
    %185 = arith.addf %183, %184 : vector<8x128xf32>
    %c10 = arith.constant 10 : index
    %186 = arith.index_cast %1 : i32 to index
    %c0_33 = arith.constant 0 : index
    %187 = vector.load %arg2[%c10, %186, %c0_33] : memref<32x8x128xf32, #tpu.memory_space<vmem>>, vector<1x8x128xf32>
    %188 = vector.shape_cast %187 : vector<1x8x128xf32> to vector<8x128xf32>
    %c26 = arith.constant 26 : index
    %189 = arith.index_cast %1 : i32 to index
    %c0_34 = arith.constant 0 : index
    %190 = vector.load %arg2[%c26, %189, %c0_34] : memref<32x8x128xf32, #tpu.memory_space<vmem>>, vector<1x8x128xf32>
    %191 = vector.shape_cast %190 : vector<1x8x128xf32> to vector<8x128xf32>
    %cst_35 = arith.constant 0.000000e+00 : f32
    %192 = vector.broadcast %cst_35 : f32 to vector<8x128xf32>
    %193 = arith.subf %192, %191 : vector<8x128xf32>
    %cst_36 = arith.constant 0.707106769 : f32
    %194 = vector.broadcast %cst_36 : f32 to vector<8x128xf32>
    %195 = arith.mulf %194, %188 : vector<8x128xf32>
    %cst_37 = arith.constant 0.707106769 : f32
    %196 = vector.broadcast %cst_37 : f32 to vector<8x128xf32>
    %197 = arith.mulf %196, %193 : vector<8x128xf32>
    %cst_38 = arith.constant 0.707106769 : f32
    %198 = vector.broadcast %cst_38 : f32 to vector<8x128xf32>
    %199 = arith.mulf %198, %188 : vector<8x128xf32>
    %cst_39 = arith.constant 0.707106769 : f32
    %200 = vector.broadcast %cst_39 : f32 to vector<8x128xf32>
    %201 = arith.mulf %200, %191 : vector<8x128xf32>
    %c11 = arith.constant 11 : index
    %202 = arith.index_cast %1 : i32 to index
    %c0_40 = arith.constant 0 : index
    %203 = vector.load %arg2[%c11, %202, %c0_40] : memref<32x8x128xf32, #tpu.memory_space<vmem>>, vector<1x8x128xf32>
    %204 = vector.shape_cast %203 : vector<1x8x128xf32> to vector<8x128xf32>
    %c27 = arith.constant 27 : index
    %205 = arith.index_cast %1 : i32 to index
    %c0_41 = arith.constant 0 : index
    %206 = vector.load %arg2[%c27, %205, %c0_41] : memref<32x8x128xf32, #tpu.memory_space<vmem>>, vector<1x8x128xf32>
    %207 = vector.shape_cast %206 : vector<1x8x128xf32> to vector<8x128xf32>
    %208 = arith.mulf %204, %195 : vector<8x128xf32>
    %209 = arith.mulf %207, %199 : vector<8x128xf32>
    %210 = arith.subf %208, %209 : vector<8x128xf32>
    %211 = arith.mulf %204, %197 : vector<8x128xf32>
    %212 = arith.mulf %207, %201 : vector<8x128xf32>
    %213 = arith.subf %211, %212 : vector<8x128xf32>
    %214 = arith.mulf %207, %195 : vector<8x128xf32>
    %215 = arith.mulf %204, %199 : vector<8x128xf32>
    %216 = arith.addf %214, %215 : vector<8x128xf32>
    %217 = arith.mulf %207, %197 : vector<8x128xf32>
    %218 = arith.mulf %204, %201 : vector<8x128xf32>
    %219 = arith.addf %217, %218 : vector<8x128xf32>
    %c12 = arith.constant 12 : index
    %220 = arith.index_cast %1 : i32 to index
    %c0_42 = arith.constant 0 : index
    %221 = vector.load %arg2[%c12, %220, %c0_42] : memref<32x8x128xf32, #tpu.memory_space<vmem>>, vector<1x8x128xf32>
    %222 = vector.shape_cast %221 : vector<1x8x128xf32> to vector<8x128xf32>
    %c28 = arith.constant 28 : index
    %223 = arith.index_cast %1 : i32 to index
    %c0_43 = arith.constant 0 : index
    %224 = vector.load %arg2[%c28, %223, %c0_43] : memref<32x8x128xf32, #tpu.memory_space<vmem>>, vector<1x8x128xf32>
    %225 = vector.shape_cast %224 : vector<1x8x128xf32> to vector<8x128xf32>
    %cst_44 = arith.constant 0.000000e+00 : f32
    %226 = vector.broadcast %cst_44 : f32 to vector<8x128xf32>
    %227 = arith.subf %226, %225 : vector<8x128xf32>
    %228 = arith.mulf %210, %222 : vector<8x128xf32>
    %229 = arith.mulf %213, %227 : vector<8x128xf32>
    %230 = arith.subf %228, %229 : vector<8x128xf32>
    %231 = arith.mulf %210, %227 : vector<8x128xf32>
    %232 = arith.mulf %213, %222 : vector<8x128xf32>
    %233 = arith.addf %231, %232 : vector<8x128xf32>
    %234 = arith.mulf %216, %222 : vector<8x128xf32>
    %235 = arith.mulf %219, %225 : vector<8x128xf32>
    %236 = arith.subf %234, %235 : vector<8x128xf32>
    %237 = arith.mulf %216, %225 : vector<8x128xf32>
    %238 = arith.mulf %219, %222 : vector<8x128xf32>
    %239 = arith.addf %237, %238 : vector<8x128xf32>
    %c13 = arith.constant 13 : index
    %240 = arith.index_cast %1 : i32 to index
    %c0_45 = arith.constant 0 : index
    %241 = vector.load %arg2[%c13, %240, %c0_45] : memref<32x8x128xf32, #tpu.memory_space<vmem>>, vector<1x8x128xf32>
    %242 = vector.shape_cast %241 : vector<1x8x128xf32> to vector<8x128xf32>
    %c29 = arith.constant 29 : index
    %243 = arith.index_cast %1 : i32 to index
    %c0_46 = arith.constant 0 : index
    %244 = vector.load %arg2[%c29, %243, %c0_46] : memref<32x8x128xf32, #tpu.memory_space<vmem>>, vector<1x8x128xf32>
    %245 = vector.shape_cast %244 : vector<1x8x128xf32> to vector<8x128xf32>
    %246 = arith.mulf %242, %230 : vector<8x128xf32>
    %247 = arith.mulf %245, %236 : vector<8x128xf32>
    %248 = arith.subf %246, %247 : vector<8x128xf32>
    %249 = arith.mulf %242, %233 : vector<8x128xf32>
    %250 = arith.mulf %245, %239 : vector<8x128xf32>
    %251 = arith.subf %249, %250 : vector<8x128xf32>
    %252 = arith.mulf %245, %230 : vector<8x128xf32>
    %253 = arith.mulf %242, %236 : vector<8x128xf32>
    %254 = arith.addf %252, %253 : vector<8x128xf32>
    %255 = arith.mulf %245, %233 : vector<8x128xf32>
    %256 = arith.mulf %242, %239 : vector<8x128xf32>
    %257 = arith.addf %255, %256 : vector<8x128xf32>
    %c14 = arith.constant 14 : index
    %258 = arith.index_cast %1 : i32 to index
    %c0_47 = arith.constant 0 : index
    %259 = vector.load %arg2[%c14, %258, %c0_47] : memref<32x8x128xf32, #tpu.memory_space<vmem>>, vector<1x8x128xf32>
    %260 = vector.shape_cast %259 : vector<1x8x128xf32> to vector<8x128xf32>
    %c30 = arith.constant 30 : index
    %261 = arith.index_cast %1 : i32 to index
    %c0_48 = arith.constant 0 : index
    %262 = vector.load %arg2[%c30, %261, %c0_48] : memref<32x8x128xf32, #tpu.memory_space<vmem>>, vector<1x8x128xf32>
    %263 = vector.shape_cast %262 : vector<1x8x128xf32> to vector<8x128xf32>
    %cst_49 = arith.constant 0.000000e+00 : f32
    %264 = vector.broadcast %cst_49 : f32 to vector<8x128xf32>
    %265 = arith.subf %264, %263 : vector<8x128xf32>
    %266 = arith.mulf %248, %260 : vector<8x128xf32>
    %267 = arith.mulf %251, %265 : vector<8x128xf32>
    %268 = arith.subf %266, %267 : vector<8x128xf32>
    %269 = arith.mulf %248, %265 : vector<8x128xf32>
    %270 = arith.mulf %251, %260 : vector<8x128xf32>
    %271 = arith.addf %269, %270 : vector<8x128xf32>
    %272 = arith.mulf %254, %260 : vector<8x128xf32>
    %273 = arith.mulf %257, %263 : vector<8x128xf32>
    %274 = arith.subf %272, %273 : vector<8x128xf32>
    %275 = arith.mulf %254, %263 : vector<8x128xf32>
    %276 = arith.mulf %257, %260 : vector<8x128xf32>
    %277 = arith.addf %275, %276 : vector<8x128xf32>
    %c15 = arith.constant 15 : index
    %278 = arith.index_cast %1 : i32 to index
    %c0_50 = arith.constant 0 : index
    %279 = vector.load %arg2[%c15, %278, %c0_50] : memref<32x8x128xf32, #tpu.memory_space<vmem>>, vector<1x8x128xf32>
    %280 = vector.shape_cast %279 : vector<1x8x128xf32> to vector<8x128xf32>
    %c31 = arith.constant 31 : index
    %281 = arith.index_cast %1 : i32 to index
    %c0_51 = arith.constant 0 : index
    %282 = vector.load %arg2[%c31, %281, %c0_51] : memref<32x8x128xf32, #tpu.memory_space<vmem>>, vector<1x8x128xf32>
    %283 = vector.shape_cast %282 : vector<1x8x128xf32> to vector<8x128xf32>
    %cst_52 = arith.constant 0.000000e+00 : f32
    %284 = vector.broadcast %cst_52 : f32 to vector<8x128xf32>
    %285 = arith.subf %284, %283 : vector<8x128xf32>
    %cst_53 = arith.constant 0.707106769 : f32
    %286 = vector.broadcast %cst_53 : f32 to vector<8x128xf32>
    %287 = arith.mulf %286, %280 : vector<8x128xf32>
    %cst_54 = arith.constant 0.707106769 : f32
    %288 = vector.broadcast %cst_54 : f32 to vector<8x128xf32>
    %289 = arith.mulf %288, %285 : vector<8x128xf32>
    %cst_55 = arith.constant 0.707106769 : f32
    %290 = vector.broadcast %cst_55 : f32 to vector<8x128xf32>
    %291 = arith.mulf %290, %280 : vector<8x128xf32>
    %cst_56 = arith.constant 0.707106769 : f32
    %292 = vector.broadcast %cst_56 : f32 to vector<8x128xf32>
    %293 = arith.mulf %292, %283 : vector<8x128xf32>
    %294 = arith.mulf %84, %176 : vector<8x128xf32>
    %295 = arith.mulf %87, %179 : vector<8x128xf32>
    %296 = arith.subf %294, %295 : vector<8x128xf32>
    %297 = arith.mulf %84, %179 : vector<8x128xf32>
    %298 = arith.mulf %87, %176 : vector<8x128xf32>
    %299 = arith.addf %297, %298 : vector<8x128xf32>
    %300 = arith.mulf %84, %182 : vector<8x128xf32>
    %301 = arith.mulf %87, %185 : vector<8x128xf32>
    %302 = arith.subf %300, %301 : vector<8x128xf32>
    %303 = arith.mulf %84, %185 : vector<8x128xf32>
    %304 = arith.mulf %87, %182 : vector<8x128xf32>
    %305 = arith.addf %303, %304 : vector<8x128xf32>
    %306 = arith.mulf %90, %176 : vector<8x128xf32>
    %307 = arith.mulf %93, %179 : vector<8x128xf32>
    %308 = arith.subf %306, %307 : vector<8x128xf32>
    %309 = arith.mulf %90, %179 : vector<8x128xf32>
    %310 = arith.mulf %93, %176 : vector<8x128xf32>
    %311 = arith.addf %309, %310 : vector<8x128xf32>
    %312 = arith.mulf %90, %182 : vector<8x128xf32>
    %313 = arith.mulf %93, %185 : vector<8x128xf32>
    %314 = arith.subf %312, %313 : vector<8x128xf32>
    %315 = arith.mulf %90, %185 : vector<8x128xf32>
    %316 = arith.mulf %93, %182 : vector<8x128xf32>
    %317 = arith.addf %315, %316 : vector<8x128xf32>
    %318 = arith.mulf %296, %268 : vector<8x128xf32>
    %319 = arith.mulf %299, %271 : vector<8x128xf32>
    %320 = arith.subf %318, %319 : vector<8x128xf32>
    %321 = arith.mulf %296, %271 : vector<8x128xf32>
    %322 = arith.mulf %299, %268 : vector<8x128xf32>
    %323 = arith.addf %321, %322 : vector<8x128xf32>
    %324 = arith.mulf %296, %274 : vector<8x128xf32>
    %325 = arith.mulf %299, %277 : vector<8x128xf32>
    %326 = arith.subf %324, %325 : vector<8x128xf32>
    %327 = arith.mulf %296, %277 : vector<8x128xf32>
    %328 = arith.mulf %299, %274 : vector<8x128xf32>
    %329 = arith.addf %327, %328 : vector<8x128xf32>
    %330 = arith.mulf %308, %268 : vector<8x128xf32>
    %331 = arith.mulf %311, %271 : vector<8x128xf32>
    %332 = arith.subf %330, %331 : vector<8x128xf32>
    %333 = arith.mulf %308, %271 : vector<8x128xf32>
    %334 = arith.mulf %311, %268 : vector<8x128xf32>
    %335 = arith.addf %333, %334 : vector<8x128xf32>
    %336 = arith.mulf %308, %274 : vector<8x128xf32>
    %337 = arith.mulf %311, %277 : vector<8x128xf32>
    %338 = arith.subf %336, %337 : vector<8x128xf32>
    %339 = arith.mulf %308, %277 : vector<8x128xf32>
    %340 = arith.mulf %311, %274 : vector<8x128xf32>
    %341 = arith.addf %339, %340 : vector<8x128xf32>
    %342 = arith.mulf %302, %268 : vector<8x128xf32>
    %343 = arith.mulf %305, %271 : vector<8x128xf32>
    %344 = arith.subf %342, %343 : vector<8x128xf32>
    %345 = arith.mulf %302, %271 : vector<8x128xf32>
    %346 = arith.mulf %305, %268 : vector<8x128xf32>
    %347 = arith.addf %345, %346 : vector<8x128xf32>
    %348 = arith.mulf %302, %274 : vector<8x128xf32>
    %349 = arith.mulf %305, %277 : vector<8x128xf32>
    %350 = arith.subf %348, %349 : vector<8x128xf32>
    %351 = arith.mulf %302, %277 : vector<8x128xf32>
    %352 = arith.mulf %305, %274 : vector<8x128xf32>
    %353 = arith.addf %351, %352 : vector<8x128xf32>
    %354 = arith.mulf %314, %268 : vector<8x128xf32>
    %355 = arith.mulf %317, %271 : vector<8x128xf32>
    %356 = arith.subf %354, %355 : vector<8x128xf32>
    %357 = arith.mulf %314, %271 : vector<8x128xf32>
    %358 = arith.mulf %317, %268 : vector<8x128xf32>
    %359 = arith.addf %357, %358 : vector<8x128xf32>
    %360 = arith.mulf %314, %274 : vector<8x128xf32>
    %361 = arith.mulf %317, %277 : vector<8x128xf32>
    %362 = arith.subf %360, %361 : vector<8x128xf32>
    %363 = arith.mulf %314, %277 : vector<8x128xf32>
    %364 = arith.mulf %317, %274 : vector<8x128xf32>
    %365 = arith.addf %363, %364 : vector<8x128xf32>
    %366 = arith.mulf %320, %287 : vector<8x128xf32>
    %367 = arith.mulf %323, %289 : vector<8x128xf32>
    %368 = arith.subf %366, %367 : vector<8x128xf32>
    %369 = arith.mulf %320, %289 : vector<8x128xf32>
    %370 = arith.mulf %323, %287 : vector<8x128xf32>
    %371 = arith.addf %369, %370 : vector<8x128xf32>
    %372 = arith.mulf %320, %291 : vector<8x128xf32>
    %373 = arith.mulf %323, %293 : vector<8x128xf32>
    %374 = arith.subf %372, %373 : vector<8x128xf32>
    %375 = arith.mulf %320, %293 : vector<8x128xf32>
    %376 = arith.mulf %323, %291 : vector<8x128xf32>
    %377 = arith.addf %375, %376 : vector<8x128xf32>
    %378 = arith.mulf %332, %287 : vector<8x128xf32>
    %379 = arith.mulf %335, %289 : vector<8x128xf32>
    %380 = arith.subf %378, %379 : vector<8x128xf32>
    %381 = arith.mulf %332, %289 : vector<8x128xf32>
    %382 = arith.mulf %335, %287 : vector<8x128xf32>
    %383 = arith.addf %381, %382 : vector<8x128xf32>
    %384 = arith.mulf %332, %291 : vector<8x128xf32>
    %385 = arith.mulf %335, %293 : vector<8x128xf32>
    %386 = arith.subf %384, %385 : vector<8x128xf32>
    %387 = arith.mulf %332, %293 : vector<8x128xf32>
    %388 = arith.mulf %335, %291 : vector<8x128xf32>
    %389 = arith.addf %387, %388 : vector<8x128xf32>
    %390 = arith.mulf %344, %287 : vector<8x128xf32>
    %391 = arith.mulf %347, %289 : vector<8x128xf32>
    %392 = arith.subf %390, %391 : vector<8x128xf32>
    %393 = arith.mulf %344, %289 : vector<8x128xf32>
    %394 = arith.mulf %347, %287 : vector<8x128xf32>
    %395 = arith.addf %393, %394 : vector<8x128xf32>
    %396 = arith.mulf %344, %291 : vector<8x128xf32>
    %397 = arith.mulf %347, %293 : vector<8x128xf32>
    %398 = arith.subf %396, %397 : vector<8x128xf32>
    %399 = arith.mulf %344, %293 : vector<8x128xf32>
    %400 = arith.mulf %347, %291 : vector<8x128xf32>
    %401 = arith.addf %399, %400 : vector<8x128xf32>
    %402 = arith.mulf %356, %287 : vector<8x128xf32>
    %403 = arith.mulf %359, %289 : vector<8x128xf32>
    %404 = arith.subf %402, %403 : vector<8x128xf32>
    %405 = arith.mulf %356, %289 : vector<8x128xf32>
    %406 = arith.mulf %359, %287 : vector<8x128xf32>
    %407 = arith.addf %405, %406 : vector<8x128xf32>
    %408 = arith.mulf %356, %291 : vector<8x128xf32>
    %409 = arith.mulf %359, %293 : vector<8x128xf32>
    %410 = arith.subf %408, %409 : vector<8x128xf32>
    %411 = arith.mulf %356, %293 : vector<8x128xf32>
    %412 = arith.mulf %359, %291 : vector<8x128xf32>
    %413 = arith.addf %411, %412 : vector<8x128xf32>
    %414 = arith.mulf %326, %287 : vector<8x128xf32>
    %415 = arith.mulf %329, %289 : vector<8x128xf32>
    %416 = arith.subf %414, %415 : vector<8x128xf32>
    %417 = arith.mulf %326, %289 : vector<8x128xf32>
    %418 = arith.mulf %329, %287 : vector<8x128xf32>
    %419 = arith.addf %417, %418 : vector<8x128xf32>
    %420 = arith.mulf %326, %291 : vector<8x128xf32>
    %421 = arith.mulf %329, %293 : vector<8x128xf32>
    %422 = arith.subf %420, %421 : vector<8x128xf32>
    %423 = arith.mulf %326, %293 : vector<8x128xf32>
    %424 = arith.mulf %329, %291 : vector<8x128xf32>
    %425 = arith.addf %423, %424 : vector<8x128xf32>
    %426 = arith.mulf %338, %287 : vector<8x128xf32>
    %427 = arith.mulf %341, %289 : vector<8x128xf32>
    %428 = arith.subf %426, %427 : vector<8x128xf32>
    %429 = arith.mulf %338, %289 : vector<8x128xf32>
    %430 = arith.mulf %341, %287 : vector<8x128xf32>
    %431 = arith.addf %429, %430 : vector<8x128xf32>
    %432 = arith.mulf %338, %291 : vector<8x128xf32>
    %433 = arith.mulf %341, %293 : vector<8x128xf32>
    %434 = arith.subf %432, %433 : vector<8x128xf32>
    %435 = arith.mulf %338, %293 : vector<8x128xf32>
    %436 = arith.mulf %341, %291 : vector<8x128xf32>
    %437 = arith.addf %435, %436 : vector<8x128xf32>
    %438 = arith.mulf %350, %287 : vector<8x128xf32>
    %439 = arith.mulf %353, %289 : vector<8x128xf32>
    %440 = arith.subf %438, %439 : vector<8x128xf32>
    %441 = arith.mulf %350, %289 : vector<8x128xf32>
    %442 = arith.mulf %353, %287 : vector<8x128xf32>
    %443 = arith.addf %441, %442 : vector<8x128xf32>
    %444 = arith.mulf %350, %291 : vector<8x128xf32>
    %445 = arith.mulf %353, %293 : vector<8x128xf32>
    %446 = arith.subf %444, %445 : vector<8x128xf32>
    %447 = arith.mulf %350, %293 : vector<8x128xf32>
    %448 = arith.mulf %353, %291 : vector<8x128xf32>
    %449 = arith.addf %447, %448 : vector<8x128xf32>
    %450 = arith.mulf %362, %287 : vector<8x128xf32>
    %451 = arith.mulf %365, %289 : vector<8x128xf32>
    %452 = arith.subf %450, %451 : vector<8x128xf32>
    %453 = arith.mulf %362, %289 : vector<8x128xf32>
    %454 = arith.mulf %365, %287 : vector<8x128xf32>
    %455 = arith.addf %453, %454 : vector<8x128xf32>
    %456 = arith.mulf %362, %291 : vector<8x128xf32>
    %457 = arith.mulf %365, %293 : vector<8x128xf32>
    %458 = arith.subf %456, %457 : vector<8x128xf32>
    %459 = arith.mulf %362, %293 : vector<8x128xf32>
    %460 = arith.mulf %365, %291 : vector<8x128xf32>
    %461 = arith.addf %459, %460 : vector<8x128xf32>
    %c0_57 = arith.constant 0 : index
    %c1_58 = arith.constant 1 : index
    %462 = memref.load %arg1[%c0_57, %c1_58] : memref<2x20xf32, #tpu.memory_space<smem>>
    %c1_59 = arith.constant 1 : index
    %c1_60 = arith.constant 1 : index
    %463 = memref.load %arg1[%c1_59, %c1_60] : memref<2x20xf32, #tpu.memory_space<smem>>
    %464 = vector.broadcast %462 : f32 to vector<8x128xf32>
    %465 = arith.mulf %380, %464 : vector<8x128xf32>
    %466 = vector.broadcast %463 : f32 to vector<8x128xf32>
    %467 = arith.mulf %383, %466 : vector<8x128xf32>
    %468 = arith.subf %465, %467 : vector<8x128xf32>
    %469 = vector.broadcast %462 : f32 to vector<8x128xf32>
    %470 = arith.mulf %383, %469 : vector<8x128xf32>
    %471 = vector.broadcast %463 : f32 to vector<8x128xf32>
    %472 = arith.mulf %380, %471 : vector<8x128xf32>
    %473 = arith.addf %470, %472 : vector<8x128xf32>
    %c0_61 = arith.constant 0 : index
    %c2_62 = arith.constant 2 : index
    %474 = memref.load %arg1[%c0_61, %c2_62] : memref<2x20xf32, #tpu.memory_space<smem>>
    %c1_63 = arith.constant 1 : index
    %c2_64 = arith.constant 2 : index
    %475 = memref.load %arg1[%c1_63, %c2_64] : memref<2x20xf32, #tpu.memory_space<smem>>
    %476 = vector.broadcast %474 : f32 to vector<8x128xf32>
    %477 = arith.mulf %392, %476 : vector<8x128xf32>
    %478 = vector.broadcast %475 : f32 to vector<8x128xf32>
    %479 = arith.mulf %395, %478 : vector<8x128xf32>
    %480 = arith.subf %477, %479 : vector<8x128xf32>
    %481 = vector.broadcast %474 : f32 to vector<8x128xf32>
    %482 = arith.mulf %395, %481 : vector<8x128xf32>
    %483 = vector.broadcast %475 : f32 to vector<8x128xf32>
    %484 = arith.mulf %392, %483 : vector<8x128xf32>
    %485 = arith.addf %482, %484 : vector<8x128xf32>
    %c0_65 = arith.constant 0 : index
    %c3_66 = arith.constant 3 : index
    %486 = memref.load %arg1[%c0_65, %c3_66] : memref<2x20xf32, #tpu.memory_space<smem>>
    %c1_67 = arith.constant 1 : index
    %c3_68 = arith.constant 3 : index
    %487 = memref.load %arg1[%c1_67, %c3_68] : memref<2x20xf32, #tpu.memory_space<smem>>
    %488 = vector.broadcast %486 : f32 to vector<8x128xf32>
    %489 = arith.mulf %404, %488 : vector<8x128xf32>
    %490 = vector.broadcast %487 : f32 to vector<8x128xf32>
    %491 = arith.mulf %407, %490 : vector<8x128xf32>
    %492 = arith.subf %489, %491 : vector<8x128xf32>
    %493 = vector.broadcast %486 : f32 to vector<8x128xf32>
    %494 = arith.mulf %407, %493 : vector<8x128xf32>
    %495 = vector.broadcast %487 : f32 to vector<8x128xf32>
    %496 = arith.mulf %404, %495 : vector<8x128xf32>
    %497 = arith.addf %494, %496 : vector<8x128xf32>
    %c0_69 = arith.constant 0 : index
    %c4_70 = arith.constant 4 : index
    %498 = memref.load %arg1[%c0_69, %c4_70] : memref<2x20xf32, #tpu.memory_space<smem>>
    %c1_71 = arith.constant 1 : index
    %c4_72 = arith.constant 4 : index
    %499 = memref.load %arg1[%c1_71, %c4_72] : memref<2x20xf32, #tpu.memory_space<smem>>
    %500 = vector.broadcast %498 : f32 to vector<8x128xf32>
    %501 = arith.mulf %416, %500 : vector<8x128xf32>
    %502 = vector.broadcast %499 : f32 to vector<8x128xf32>
    %503 = arith.mulf %419, %502 : vector<8x128xf32>
    %504 = arith.subf %501, %503 : vector<8x128xf32>
    %505 = vector.broadcast %498 : f32 to vector<8x128xf32>
    %506 = arith.mulf %419, %505 : vector<8x128xf32>
    %507 = vector.broadcast %499 : f32 to vector<8x128xf32>
    %508 = arith.mulf %416, %507 : vector<8x128xf32>
    %509 = arith.addf %506, %508 : vector<8x128xf32>
    %c0_73 = arith.constant 0 : index
    %c5_74 = arith.constant 5 : index
    %510 = memref.load %arg1[%c0_73, %c5_74] : memref<2x20xf32, #tpu.memory_space<smem>>
    %c1_75 = arith.constant 1 : index
    %c5_76 = arith.constant 5 : index
    %511 = memref.load %arg1[%c1_75, %c5_76] : memref<2x20xf32, #tpu.memory_space<smem>>
    %512 = vector.broadcast %510 : f32 to vector<8x128xf32>
    %513 = arith.mulf %428, %512 : vector<8x128xf32>
    %514 = vector.broadcast %511 : f32 to vector<8x128xf32>
    %515 = arith.mulf %431, %514 : vector<8x128xf32>
    %516 = arith.subf %513, %515 : vector<8x128xf32>
    %517 = vector.broadcast %510 : f32 to vector<8x128xf32>
    %518 = arith.mulf %431, %517 : vector<8x128xf32>
    %519 = vector.broadcast %511 : f32 to vector<8x128xf32>
    %520 = arith.mulf %428, %519 : vector<8x128xf32>
    %521 = arith.addf %518, %520 : vector<8x128xf32>
    %c0_77 = arith.constant 0 : index
    %c6_78 = arith.constant 6 : index
    %522 = memref.load %arg1[%c0_77, %c6_78] : memref<2x20xf32, #tpu.memory_space<smem>>
    %c1_79 = arith.constant 1 : index
    %c6_80 = arith.constant 6 : index
    %523 = memref.load %arg1[%c1_79, %c6_80] : memref<2x20xf32, #tpu.memory_space<smem>>
    %524 = vector.broadcast %522 : f32 to vector<8x128xf32>
    %525 = arith.mulf %440, %524 : vector<8x128xf32>
    %526 = vector.broadcast %523 : f32 to vector<8x128xf32>
    %527 = arith.mulf %443, %526 : vector<8x128xf32>
    %528 = arith.subf %525, %527 : vector<8x128xf32>
    %529 = vector.broadcast %522 : f32 to vector<8x128xf32>
    %530 = arith.mulf %443, %529 : vector<8x128xf32>
    %531 = vector.broadcast %523 : f32 to vector<8x128xf32>
    %532 = arith.mulf %440, %531 : vector<8x128xf32>
    %533 = arith.addf %530, %532 : vector<8x128xf32>
    %c0_81 = arith.constant 0 : index
    %c7_82 = arith.constant 7 : index
    %534 = memref.load %arg1[%c0_81, %c7_82] : memref<2x20xf32, #tpu.memory_space<smem>>
    %c1_83 = arith.constant 1 : index
    %c7_84 = arith.constant 7 : index
    %535 = memref.load %arg1[%c1_83, %c7_84] : memref<2x20xf32, #tpu.memory_space<smem>>
    %536 = vector.broadcast %534 : f32 to vector<8x128xf32>
    %537 = arith.mulf %452, %536 : vector<8x128xf32>
    %538 = vector.broadcast %535 : f32 to vector<8x128xf32>
    %539 = arith.mulf %455, %538 : vector<8x128xf32>
    %540 = arith.subf %537, %539 : vector<8x128xf32>
    %541 = vector.broadcast %534 : f32 to vector<8x128xf32>
    %542 = arith.mulf %455, %541 : vector<8x128xf32>
    %543 = vector.broadcast %535 : f32 to vector<8x128xf32>
    %544 = arith.mulf %452, %543 : vector<8x128xf32>
    %545 = arith.addf %542, %544 : vector<8x128xf32>
    %c0_85 = arith.constant 0 : index
    %c8_86 = arith.constant 8 : index
    %546 = memref.load %arg1[%c0_85, %c8_86] : memref<2x20xf32, #tpu.memory_space<smem>>
    %c1_87 = arith.constant 1 : index
    %c8_88 = arith.constant 8 : index
    %547 = memref.load %arg1[%c1_87, %c8_88] : memref<2x20xf32, #tpu.memory_space<smem>>
    %548 = vector.broadcast %546 : f32 to vector<8x128xf32>
    %549 = arith.mulf %374, %548 : vector<8x128xf32>
    %550 = vector.broadcast %547 : f32 to vector<8x128xf32>
    %551 = arith.mulf %377, %550 : vector<8x128xf32>
    %552 = arith.subf %549, %551 : vector<8x128xf32>
    %553 = vector.broadcast %546 : f32 to vector<8x128xf32>
    %554 = arith.mulf %377, %553 : vector<8x128xf32>
    %555 = vector.broadcast %547 : f32 to vector<8x128xf32>
    %556 = arith.mulf %374, %555 : vector<8x128xf32>
    %557 = arith.addf %554, %556 : vector<8x128xf32>
    %c0_89 = arith.constant 0 : index
    %c9_90 = arith.constant 9 : index
    %558 = memref.load %arg1[%c0_89, %c9_90] : memref<2x20xf32, #tpu.memory_space<smem>>
    %c1_91 = arith.constant 1 : index
    %c9_92 = arith.constant 9 : index
    %559 = memref.load %arg1[%c1_91, %c9_92] : memref<2x20xf32, #tpu.memory_space<smem>>
    %560 = vector.broadcast %558 : f32 to vector<8x128xf32>
    %561 = arith.mulf %386, %560 : vector<8x128xf32>
    %562 = vector.broadcast %559 : f32 to vector<8x128xf32>
    %563 = arith.mulf %389, %562 : vector<8x128xf32>
    %564 = arith.subf %561, %563 : vector<8x128xf32>
    %565 = vector.broadcast %558 : f32 to vector<8x128xf32>
    %566 = arith.mulf %389, %565 : vector<8x128xf32>
    %567 = vector.broadcast %559 : f32 to vector<8x128xf32>
    %568 = arith.mulf %386, %567 : vector<8x128xf32>
    %569 = arith.addf %566, %568 : vector<8x128xf32>
    %c0_93 = arith.constant 0 : index
    %c10_94 = arith.constant 10 : index
    %570 = memref.load %arg1[%c0_93, %c10_94] : memref<2x20xf32, #tpu.memory_space<smem>>
    %c1_95 = arith.constant 1 : index
    %c10_96 = arith.constant 10 : index
    %571 = memref.load %arg1[%c1_95, %c10_96] : memref<2x20xf32, #tpu.memory_space<smem>>
    %572 = vector.broadcast %570 : f32 to vector<8x128xf32>
    %573 = arith.mulf %398, %572 : vector<8x128xf32>
    %574 = vector.broadcast %571 : f32 to vector<8x128xf32>
    %575 = arith.mulf %401, %574 : vector<8x128xf32>
    %576 = arith.subf %573, %575 : vector<8x128xf32>
    %577 = vector.broadcast %570 : f32 to vector<8x128xf32>
    %578 = arith.mulf %401, %577 : vector<8x128xf32>
    %579 = vector.broadcast %571 : f32 to vector<8x128xf32>
    %580 = arith.mulf %398, %579 : vector<8x128xf32>
    %581 = arith.addf %578, %580 : vector<8x128xf32>
    %c0_97 = arith.constant 0 : index
    %c11_98 = arith.constant 11 : index
    %582 = memref.load %arg1[%c0_97, %c11_98] : memref<2x20xf32, #tpu.memory_space<smem>>
    %c1_99 = arith.constant 1 : index
    %c11_100 = arith.constant 11 : index
    %583 = memref.load %arg1[%c1_99, %c11_100] : memref<2x20xf32, #tpu.memory_space<smem>>
    %584 = vector.broadcast %582 : f32 to vector<8x128xf32>
    %585 = arith.mulf %410, %584 : vector<8x128xf32>
    %586 = vector.broadcast %583 : f32 to vector<8x128xf32>
    %587 = arith.mulf %413, %586 : vector<8x128xf32>
    %588 = arith.subf %585, %587 : vector<8x128xf32>
    %589 = vector.broadcast %582 : f32 to vector<8x128xf32>
    %590 = arith.mulf %413, %589 : vector<8x128xf32>
    %591 = vector.broadcast %583 : f32 to vector<8x128xf32>
    %592 = arith.mulf %410, %591 : vector<8x128xf32>
    %593 = arith.addf %590, %592 : vector<8x128xf32>
    %c0_101 = arith.constant 0 : index
    %c12_102 = arith.constant 12 : index
    %594 = memref.load %arg1[%c0_101, %c12_102] : memref<2x20xf32, #tpu.memory_space<smem>>
    %c1_103 = arith.constant 1 : index
    %c12_104 = arith.constant 12 : index
    %595 = memref.load %arg1[%c1_103, %c12_104] : memref<2x20xf32, #tpu.memory_space<smem>>
    %596 = vector.broadcast %594 : f32 to vector<8x128xf32>
    %597 = arith.mulf %422, %596 : vector<8x128xf32>
    %598 = vector.broadcast %595 : f32 to vector<8x128xf32>
    %599 = arith.mulf %425, %598 : vector<8x128xf32>
    %600 = arith.subf %597, %599 : vector<8x128xf32>
    %601 = vector.broadcast %594 : f32 to vector<8x128xf32>
    %602 = arith.mulf %425, %601 : vector<8x128xf32>
    %603 = vector.broadcast %595 : f32 to vector<8x128xf32>
    %604 = arith.mulf %422, %603 : vector<8x128xf32>
    %605 = arith.addf %602, %604 : vector<8x128xf32>
    %c0_105 = arith.constant 0 : index
    %c13_106 = arith.constant 13 : index
    %606 = memref.load %arg1[%c0_105, %c13_106] : memref<2x20xf32, #tpu.memory_space<smem>>
    %c1_107 = arith.constant 1 : index
    %c13_108 = arith.constant 13 : index
    %607 = memref.load %arg1[%c1_107, %c13_108] : memref<2x20xf32, #tpu.memory_space<smem>>
    %608 = vector.broadcast %606 : f32 to vector<8x128xf32>
    %609 = arith.mulf %434, %608 : vector<8x128xf32>
    %610 = vector.broadcast %607 : f32 to vector<8x128xf32>
    %611 = arith.mulf %437, %610 : vector<8x128xf32>
    %612 = arith.subf %609, %611 : vector<8x128xf32>
    %613 = vector.broadcast %606 : f32 to vector<8x128xf32>
    %614 = arith.mulf %437, %613 : vector<8x128xf32>
    %615 = vector.broadcast %607 : f32 to vector<8x128xf32>
    %616 = arith.mulf %434, %615 : vector<8x128xf32>
    %617 = arith.addf %614, %616 : vector<8x128xf32>
    %c0_109 = arith.constant 0 : index
    %c14_110 = arith.constant 14 : index
    %618 = memref.load %arg1[%c0_109, %c14_110] : memref<2x20xf32, #tpu.memory_space<smem>>
    %c1_111 = arith.constant 1 : index
    %c14_112 = arith.constant 14 : index
    %619 = memref.load %arg1[%c1_111, %c14_112] : memref<2x20xf32, #tpu.memory_space<smem>>
    %620 = vector.broadcast %618 : f32 to vector<8x128xf32>
    %621 = arith.mulf %446, %620 : vector<8x128xf32>
    %622 = vector.broadcast %619 : f32 to vector<8x128xf32>
    %623 = arith.mulf %449, %622 : vector<8x128xf32>
    %624 = arith.subf %621, %623 : vector<8x128xf32>
    %625 = vector.broadcast %618 : f32 to vector<8x128xf32>
    %626 = arith.mulf %449, %625 : vector<8x128xf32>
    %627 = vector.broadcast %619 : f32 to vector<8x128xf32>
    %628 = arith.mulf %446, %627 : vector<8x128xf32>
    %629 = arith.addf %626, %628 : vector<8x128xf32>
    %c0_113 = arith.constant 0 : index
    %c15_114 = arith.constant 15 : index
    %630 = memref.load %arg1[%c0_113, %c15_114] : memref<2x20xf32, #tpu.memory_space<smem>>
    %c1_115 = arith.constant 1 : index
    %c15_116 = arith.constant 15 : index
    %631 = memref.load %arg1[%c1_115, %c15_116] : memref<2x20xf32, #tpu.memory_space<smem>>
    %632 = vector.broadcast %630 : f32 to vector<8x128xf32>
    %633 = arith.mulf %458, %632 : vector<8x128xf32>
    %634 = vector.broadcast %631 : f32 to vector<8x128xf32>
    %635 = arith.mulf %461, %634 : vector<8x128xf32>
    %636 = arith.subf %633, %635 : vector<8x128xf32>
    %637 = vector.broadcast %630 : f32 to vector<8x128xf32>
    %638 = arith.mulf %461, %637 : vector<8x128xf32>
    %639 = vector.broadcast %631 : f32 to vector<8x128xf32>
    %640 = arith.mulf %458, %639 : vector<8x128xf32>
    %641 = arith.addf %638, %640 : vector<8x128xf32>
    %c0_117 = arith.constant 0 : index
    %c16_118 = arith.constant 16 : index
    %642 = memref.load %arg1[%c0_117, %c16_118] : memref<2x20xf32, #tpu.memory_space<smem>>
    %c1_119 = arith.constant 1 : index
    %c16_120 = arith.constant 16 : index
    %643 = memref.load %arg1[%c1_119, %c16_120] : memref<2x20xf32, #tpu.memory_space<smem>>
    %644 = vector.broadcast %642 : f32 to vector<8x128xf32>
    %645 = arith.mulf %644, %368 : vector<8x128xf32>
    %646 = vector.broadcast %643 : f32 to vector<8x128xf32>
    %647 = arith.mulf %646, %468 : vector<8x128xf32>
    %648 = arith.subf %645, %647 : vector<8x128xf32>
    %649 = vector.broadcast %642 : f32 to vector<8x128xf32>
    %650 = arith.mulf %649, %371 : vector<8x128xf32>
    %651 = vector.broadcast %643 : f32 to vector<8x128xf32>
    %652 = arith.mulf %651, %473 : vector<8x128xf32>
    %653 = arith.subf %650, %652 : vector<8x128xf32>
    %654 = vector.broadcast %643 : f32 to vector<8x128xf32>
    %655 = arith.mulf %654, %368 : vector<8x128xf32>
    %656 = vector.broadcast %642 : f32 to vector<8x128xf32>
    %657 = arith.mulf %656, %468 : vector<8x128xf32>
    %658 = arith.addf %655, %657 : vector<8x128xf32>
    %659 = vector.broadcast %643 : f32 to vector<8x128xf32>
    %660 = arith.mulf %659, %371 : vector<8x128xf32>
    %661 = vector.broadcast %642 : f32 to vector<8x128xf32>
    %662 = arith.mulf %661, %473 : vector<8x128xf32>
    %663 = arith.addf %660, %662 : vector<8x128xf32>
    %664 = vector.broadcast %642 : f32 to vector<8x128xf32>
    %665 = arith.mulf %664, %480 : vector<8x128xf32>
    %666 = vector.broadcast %643 : f32 to vector<8x128xf32>
    %667 = arith.mulf %666, %492 : vector<8x128xf32>
    %668 = arith.subf %665, %667 : vector<8x128xf32>
    %669 = vector.broadcast %642 : f32 to vector<8x128xf32>
    %670 = arith.mulf %669, %485 : vector<8x128xf32>
    %671 = vector.broadcast %643 : f32 to vector<8x128xf32>
    %672 = arith.mulf %671, %497 : vector<8x128xf32>
    %673 = arith.subf %670, %672 : vector<8x128xf32>
    %674 = vector.broadcast %643 : f32 to vector<8x128xf32>
    %675 = arith.mulf %674, %480 : vector<8x128xf32>
    %676 = vector.broadcast %642 : f32 to vector<8x128xf32>
    %677 = arith.mulf %676, %492 : vector<8x128xf32>
    %678 = arith.addf %675, %677 : vector<8x128xf32>
    %679 = vector.broadcast %643 : f32 to vector<8x128xf32>
    %680 = arith.mulf %679, %485 : vector<8x128xf32>
    %681 = vector.broadcast %642 : f32 to vector<8x128xf32>
    %682 = arith.mulf %681, %497 : vector<8x128xf32>
    %683 = arith.addf %680, %682 : vector<8x128xf32>
    %684 = vector.broadcast %642 : f32 to vector<8x128xf32>
    %685 = arith.mulf %684, %504 : vector<8x128xf32>
    %686 = vector.broadcast %643 : f32 to vector<8x128xf32>
    %687 = arith.mulf %686, %516 : vector<8x128xf32>
    %688 = arith.subf %685, %687 : vector<8x128xf32>
    %689 = vector.broadcast %642 : f32 to vector<8x128xf32>
    %690 = arith.mulf %689, %509 : vector<8x128xf32>
    %691 = vector.broadcast %643 : f32 to vector<8x128xf32>
    %692 = arith.mulf %691, %521 : vector<8x128xf32>
    %693 = arith.subf %690, %692 : vector<8x128xf32>
    %694 = vector.broadcast %643 : f32 to vector<8x128xf32>
    %695 = arith.mulf %694, %504 : vector<8x128xf32>
    %696 = vector.broadcast %642 : f32 to vector<8x128xf32>
    %697 = arith.mulf %696, %516 : vector<8x128xf32>
    %698 = arith.addf %695, %697 : vector<8x128xf32>
    %699 = vector.broadcast %643 : f32 to vector<8x128xf32>
    %700 = arith.mulf %699, %509 : vector<8x128xf32>
    %701 = vector.broadcast %642 : f32 to vector<8x128xf32>
    %702 = arith.mulf %701, %521 : vector<8x128xf32>
    %703 = arith.addf %700, %702 : vector<8x128xf32>
    %704 = vector.broadcast %642 : f32 to vector<8x128xf32>
    %705 = arith.mulf %704, %528 : vector<8x128xf32>
    %706 = vector.broadcast %643 : f32 to vector<8x128xf32>
    %707 = arith.mulf %706, %540 : vector<8x128xf32>
    %708 = arith.subf %705, %707 : vector<8x128xf32>
    %709 = vector.broadcast %642 : f32 to vector<8x128xf32>
    %710 = arith.mulf %709, %533 : vector<8x128xf32>
    %711 = vector.broadcast %643 : f32 to vector<8x128xf32>
    %712 = arith.mulf %711, %545 : vector<8x128xf32>
    %713 = arith.subf %710, %712 : vector<8x128xf32>
    %714 = vector.broadcast %643 : f32 to vector<8x128xf32>
    %715 = arith.mulf %714, %528 : vector<8x128xf32>
    %716 = vector.broadcast %642 : f32 to vector<8x128xf32>
    %717 = arith.mulf %716, %540 : vector<8x128xf32>
    %718 = arith.addf %715, %717 : vector<8x128xf32>
    %719 = vector.broadcast %643 : f32 to vector<8x128xf32>
    %720 = arith.mulf %719, %533 : vector<8x128xf32>
    %721 = vector.broadcast %642 : f32 to vector<8x128xf32>
    %722 = arith.mulf %721, %545 : vector<8x128xf32>
    %723 = arith.addf %720, %722 : vector<8x128xf32>
    %724 = vector.broadcast %642 : f32 to vector<8x128xf32>
    %725 = arith.mulf %724, %552 : vector<8x128xf32>
    %726 = vector.broadcast %643 : f32 to vector<8x128xf32>
    %727 = arith.mulf %726, %564 : vector<8x128xf32>
    %728 = arith.subf %725, %727 : vector<8x128xf32>
    %729 = vector.broadcast %642 : f32 to vector<8x128xf32>
    %730 = arith.mulf %729, %557 : vector<8x128xf32>
    %731 = vector.broadcast %643 : f32 to vector<8x128xf32>
    %732 = arith.mulf %731, %569 : vector<8x128xf32>
    %733 = arith.subf %730, %732 : vector<8x128xf32>
    %734 = vector.broadcast %643 : f32 to vector<8x128xf32>
    %735 = arith.mulf %734, %552 : vector<8x128xf32>
    %736 = vector.broadcast %642 : f32 to vector<8x128xf32>
    %737 = arith.mulf %736, %564 : vector<8x128xf32>
    %738 = arith.addf %735, %737 : vector<8x128xf32>
    %739 = vector.broadcast %643 : f32 to vector<8x128xf32>
    %740 = arith.mulf %739, %557 : vector<8x128xf32>
    %741 = vector.broadcast %642 : f32 to vector<8x128xf32>
    %742 = arith.mulf %741, %569 : vector<8x128xf32>
    %743 = arith.addf %740, %742 : vector<8x128xf32>
    %744 = vector.broadcast %642 : f32 to vector<8x128xf32>
    %745 = arith.mulf %744, %576 : vector<8x128xf32>
    %746 = vector.broadcast %643 : f32 to vector<8x128xf32>
    %747 = arith.mulf %746, %588 : vector<8x128xf32>
    %748 = arith.subf %745, %747 : vector<8x128xf32>
    %749 = vector.broadcast %642 : f32 to vector<8x128xf32>
    %750 = arith.mulf %749, %581 : vector<8x128xf32>
    %751 = vector.broadcast %643 : f32 to vector<8x128xf32>
    %752 = arith.mulf %751, %593 : vector<8x128xf32>
    %753 = arith.subf %750, %752 : vector<8x128xf32>
    %754 = vector.broadcast %643 : f32 to vector<8x128xf32>
    %755 = arith.mulf %754, %576 : vector<8x128xf32>
    %756 = vector.broadcast %642 : f32 to vector<8x128xf32>
    %757 = arith.mulf %756, %588 : vector<8x128xf32>
    %758 = arith.addf %755, %757 : vector<8x128xf32>
    %759 = vector.broadcast %643 : f32 to vector<8x128xf32>
    %760 = arith.mulf %759, %581 : vector<8x128xf32>
    %761 = vector.broadcast %642 : f32 to vector<8x128xf32>
    %762 = arith.mulf %761, %593 : vector<8x128xf32>
    %763 = arith.addf %760, %762 : vector<8x128xf32>
    %764 = vector.broadcast %642 : f32 to vector<8x128xf32>
    %765 = arith.mulf %764, %600 : vector<8x128xf32>
    %766 = vector.broadcast %643 : f32 to vector<8x128xf32>
    %767 = arith.mulf %766, %612 : vector<8x128xf32>
    %768 = arith.subf %765, %767 : vector<8x128xf32>
    %769 = vector.broadcast %642 : f32 to vector<8x128xf32>
    %770 = arith.mulf %769, %605 : vector<8x128xf32>
    %771 = vector.broadcast %643 : f32 to vector<8x128xf32>
    %772 = arith.mulf %771, %617 : vector<8x128xf32>
    %773 = arith.subf %770, %772 : vector<8x128xf32>
    %774 = vector.broadcast %643 : f32 to vector<8x128xf32>
    %775 = arith.mulf %774, %600 : vector<8x128xf32>
    %776 = vector.broadcast %642 : f32 to vector<8x128xf32>
    %777 = arith.mulf %776, %612 : vector<8x128xf32>
    %778 = arith.addf %775, %777 : vector<8x128xf32>
    %779 = vector.broadcast %643 : f32 to vector<8x128xf32>
    %780 = arith.mulf %779, %605 : vector<8x128xf32>
    %781 = vector.broadcast %642 : f32 to vector<8x128xf32>
    %782 = arith.mulf %781, %617 : vector<8x128xf32>
    %783 = arith.addf %780, %782 : vector<8x128xf32>
    %784 = vector.broadcast %642 : f32 to vector<8x128xf32>
    %785 = arith.mulf %784, %624 : vector<8x128xf32>
    %786 = vector.broadcast %643 : f32 to vector<8x128xf32>
    %787 = arith.mulf %786, %636 : vector<8x128xf32>
    %788 = arith.subf %785, %787 : vector<8x128xf32>
    %789 = vector.broadcast %642 : f32 to vector<8x128xf32>
    %790 = arith.mulf %789, %629 : vector<8x128xf32>
    %791 = vector.broadcast %643 : f32 to vector<8x128xf32>
    %792 = arith.mulf %791, %641 : vector<8x128xf32>
    %793 = arith.subf %790, %792 : vector<8x128xf32>
    %794 = vector.broadcast %643 : f32 to vector<8x128xf32>
    %795 = arith.mulf %794, %624 : vector<8x128xf32>
    %796 = vector.broadcast %642 : f32 to vector<8x128xf32>
    %797 = arith.mulf %796, %636 : vector<8x128xf32>
    %798 = arith.addf %795, %797 : vector<8x128xf32>
    %799 = vector.broadcast %643 : f32 to vector<8x128xf32>
    %800 = arith.mulf %799, %629 : vector<8x128xf32>
    %801 = vector.broadcast %642 : f32 to vector<8x128xf32>
    %802 = arith.mulf %801, %641 : vector<8x128xf32>
    %803 = arith.addf %800, %802 : vector<8x128xf32>
    %c0_121 = arith.constant 0 : index
    %c17_122 = arith.constant 17 : index
    %804 = memref.load %arg1[%c0_121, %c17_122] : memref<2x20xf32, #tpu.memory_space<smem>>
    %c1_123 = arith.constant 1 : index
    %c17_124 = arith.constant 17 : index
    %805 = memref.load %arg1[%c1_123, %c17_124] : memref<2x20xf32, #tpu.memory_space<smem>>
    %806 = vector.broadcast %804 : f32 to vector<8x128xf32>
    %807 = arith.mulf %806, %648 : vector<8x128xf32>
    %808 = vector.broadcast %805 : f32 to vector<8x128xf32>
    %809 = arith.mulf %808, %668 : vector<8x128xf32>
    %810 = arith.subf %807, %809 : vector<8x128xf32>
    %811 = vector.broadcast %804 : f32 to vector<8x128xf32>
    %812 = arith.mulf %811, %653 : vector<8x128xf32>
    %813 = vector.broadcast %805 : f32 to vector<8x128xf32>
    %814 = arith.mulf %813, %673 : vector<8x128xf32>
    %815 = arith.subf %812, %814 : vector<8x128xf32>
    %816 = vector.broadcast %805 : f32 to vector<8x128xf32>
    %817 = arith.mulf %816, %648 : vector<8x128xf32>
    %818 = vector.broadcast %804 : f32 to vector<8x128xf32>
    %819 = arith.mulf %818, %668 : vector<8x128xf32>
    %820 = arith.addf %817, %819 : vector<8x128xf32>
    %821 = vector.broadcast %805 : f32 to vector<8x128xf32>
    %822 = arith.mulf %821, %653 : vector<8x128xf32>
    %823 = vector.broadcast %804 : f32 to vector<8x128xf32>
    %824 = arith.mulf %823, %673 : vector<8x128xf32>
    %825 = arith.addf %822, %824 : vector<8x128xf32>
    %826 = vector.broadcast %804 : f32 to vector<8x128xf32>
    %827 = arith.mulf %826, %658 : vector<8x128xf32>
    %828 = vector.broadcast %805 : f32 to vector<8x128xf32>
    %829 = arith.mulf %828, %678 : vector<8x128xf32>
    %830 = arith.subf %827, %829 : vector<8x128xf32>
    %831 = vector.broadcast %804 : f32 to vector<8x128xf32>
    %832 = arith.mulf %831, %663 : vector<8x128xf32>
    %833 = vector.broadcast %805 : f32 to vector<8x128xf32>
    %834 = arith.mulf %833, %683 : vector<8x128xf32>
    %835 = arith.subf %832, %834 : vector<8x128xf32>
    %836 = vector.broadcast %805 : f32 to vector<8x128xf32>
    %837 = arith.mulf %836, %658 : vector<8x128xf32>
    %838 = vector.broadcast %804 : f32 to vector<8x128xf32>
    %839 = arith.mulf %838, %678 : vector<8x128xf32>
    %840 = arith.addf %837, %839 : vector<8x128xf32>
    %841 = vector.broadcast %805 : f32 to vector<8x128xf32>
    %842 = arith.mulf %841, %663 : vector<8x128xf32>
    %843 = vector.broadcast %804 : f32 to vector<8x128xf32>
    %844 = arith.mulf %843, %683 : vector<8x128xf32>
    %845 = arith.addf %842, %844 : vector<8x128xf32>
    %846 = vector.broadcast %804 : f32 to vector<8x128xf32>
    %847 = arith.mulf %846, %688 : vector<8x128xf32>
    %848 = vector.broadcast %805 : f32 to vector<8x128xf32>
    %849 = arith.mulf %848, %708 : vector<8x128xf32>
    %850 = arith.subf %847, %849 : vector<8x128xf32>
    %851 = vector.broadcast %804 : f32 to vector<8x128xf32>
    %852 = arith.mulf %851, %693 : vector<8x128xf32>
    %853 = vector.broadcast %805 : f32 to vector<8x128xf32>
    %854 = arith.mulf %853, %713 : vector<8x128xf32>
    %855 = arith.subf %852, %854 : vector<8x128xf32>
    %856 = vector.broadcast %805 : f32 to vector<8x128xf32>
    %857 = arith.mulf %856, %688 : vector<8x128xf32>
    %858 = vector.broadcast %804 : f32 to vector<8x128xf32>
    %859 = arith.mulf %858, %708 : vector<8x128xf32>
    %860 = arith.addf %857, %859 : vector<8x128xf32>
    %861 = vector.broadcast %805 : f32 to vector<8x128xf32>
    %862 = arith.mulf %861, %693 : vector<8x128xf32>
    %863 = vector.broadcast %804 : f32 to vector<8x128xf32>
    %864 = arith.mulf %863, %713 : vector<8x128xf32>
    %865 = arith.addf %862, %864 : vector<8x128xf32>
    %866 = vector.broadcast %804 : f32 to vector<8x128xf32>
    %867 = arith.mulf %866, %698 : vector<8x128xf32>
    %868 = vector.broadcast %805 : f32 to vector<8x128xf32>
    %869 = arith.mulf %868, %718 : vector<8x128xf32>
    %870 = arith.subf %867, %869 : vector<8x128xf32>
    %871 = vector.broadcast %804 : f32 to vector<8x128xf32>
    %872 = arith.mulf %871, %703 : vector<8x128xf32>
    %873 = vector.broadcast %805 : f32 to vector<8x128xf32>
    %874 = arith.mulf %873, %723 : vector<8x128xf32>
    %875 = arith.subf %872, %874 : vector<8x128xf32>
    %876 = vector.broadcast %805 : f32 to vector<8x128xf32>
    %877 = arith.mulf %876, %698 : vector<8x128xf32>
    %878 = vector.broadcast %804 : f32 to vector<8x128xf32>
    %879 = arith.mulf %878, %718 : vector<8x128xf32>
    %880 = arith.addf %877, %879 : vector<8x128xf32>
    %881 = vector.broadcast %805 : f32 to vector<8x128xf32>
    %882 = arith.mulf %881, %703 : vector<8x128xf32>
    %883 = vector.broadcast %804 : f32 to vector<8x128xf32>
    %884 = arith.mulf %883, %723 : vector<8x128xf32>
    %885 = arith.addf %882, %884 : vector<8x128xf32>
    %886 = vector.broadcast %804 : f32 to vector<8x128xf32>
    %887 = arith.mulf %886, %728 : vector<8x128xf32>
    %888 = vector.broadcast %805 : f32 to vector<8x128xf32>
    %889 = arith.mulf %888, %748 : vector<8x128xf32>
    %890 = arith.subf %887, %889 : vector<8x128xf32>
    %891 = vector.broadcast %804 : f32 to vector<8x128xf32>
    %892 = arith.mulf %891, %733 : vector<8x128xf32>
    %893 = vector.broadcast %805 : f32 to vector<8x128xf32>
    %894 = arith.mulf %893, %753 : vector<8x128xf32>
    %895 = arith.subf %892, %894 : vector<8x128xf32>
    %896 = vector.broadcast %805 : f32 to vector<8x128xf32>
    %897 = arith.mulf %896, %728 : vector<8x128xf32>
    %898 = vector.broadcast %804 : f32 to vector<8x128xf32>
    %899 = arith.mulf %898, %748 : vector<8x128xf32>
    %900 = arith.addf %897, %899 : vector<8x128xf32>
    %901 = vector.broadcast %805 : f32 to vector<8x128xf32>
    %902 = arith.mulf %901, %733 : vector<8x128xf32>
    %903 = vector.broadcast %804 : f32 to vector<8x128xf32>
    %904 = arith.mulf %903, %753 : vector<8x128xf32>
    %905 = arith.addf %902, %904 : vector<8x128xf32>
    %906 = vector.broadcast %804 : f32 to vector<8x128xf32>
    %907 = arith.mulf %906, %738 : vector<8x128xf32>
    %908 = vector.broadcast %805 : f32 to vector<8x128xf32>
    %909 = arith.mulf %908, %758 : vector<8x128xf32>
    %910 = arith.subf %907, %909 : vector<8x128xf32>
    %911 = vector.broadcast %804 : f32 to vector<8x128xf32>
    %912 = arith.mulf %911, %743 : vector<8x128xf32>
    %913 = vector.broadcast %805 : f32 to vector<8x128xf32>
    %914 = arith.mulf %913, %763 : vector<8x128xf32>
    %915 = arith.subf %912, %914 : vector<8x128xf32>
    %916 = vector.broadcast %805 : f32 to vector<8x128xf32>
    %917 = arith.mulf %916, %738 : vector<8x128xf32>
    %918 = vector.broadcast %804 : f32 to vector<8x128xf32>
    %919 = arith.mulf %918, %758 : vector<8x128xf32>
    %920 = arith.addf %917, %919 : vector<8x128xf32>
    %921 = vector.broadcast %805 : f32 to vector<8x128xf32>
    %922 = arith.mulf %921, %743 : vector<8x128xf32>
    %923 = vector.broadcast %804 : f32 to vector<8x128xf32>
    %924 = arith.mulf %923, %763 : vector<8x128xf32>
    %925 = arith.addf %922, %924 : vector<8x128xf32>
    %926 = vector.broadcast %804 : f32 to vector<8x128xf32>
    %927 = arith.mulf %926, %768 : vector<8x128xf32>
    %928 = vector.broadcast %805 : f32 to vector<8x128xf32>
    %929 = arith.mulf %928, %788 : vector<8x128xf32>
    %930 = arith.subf %927, %929 : vector<8x128xf32>
    %931 = vector.broadcast %804 : f32 to vector<8x128xf32>
    %932 = arith.mulf %931, %773 : vector<8x128xf32>
    %933 = vector.broadcast %805 : f32 to vector<8x128xf32>
    %934 = arith.mulf %933, %793 : vector<8x128xf32>
    %935 = arith.subf %932, %934 : vector<8x128xf32>
    %936 = vector.broadcast %805 : f32 to vector<8x128xf32>
    %937 = arith.mulf %936, %768 : vector<8x128xf32>
    %938 = vector.broadcast %804 : f32 to vector<8x128xf32>
    %939 = arith.mulf %938, %788 : vector<8x128xf32>
    %940 = arith.addf %937, %939 : vector<8x128xf32>
    %941 = vector.broadcast %805 : f32 to vector<8x128xf32>
    %942 = arith.mulf %941, %773 : vector<8x128xf32>
    %943 = vector.broadcast %804 : f32 to vector<8x128xf32>
    %944 = arith.mulf %943, %793 : vector<8x128xf32>
    %945 = arith.addf %942, %944 : vector<8x128xf32>
    %946 = vector.broadcast %804 : f32 to vector<8x128xf32>
    %947 = arith.mulf %946, %778 : vector<8x128xf32>
    %948 = vector.broadcast %805 : f32 to vector<8x128xf32>
    %949 = arith.mulf %948, %798 : vector<8x128xf32>
    %950 = arith.subf %947, %949 : vector<8x128xf32>
    %951 = vector.broadcast %804 : f32 to vector<8x128xf32>
    %952 = arith.mulf %951, %783 : vector<8x128xf32>
    %953 = vector.broadcast %805 : f32 to vector<8x128xf32>
    %954 = arith.mulf %953, %803 : vector<8x128xf32>
    %955 = arith.subf %952, %954 : vector<8x128xf32>
    %956 = vector.broadcast %805 : f32 to vector<8x128xf32>
    %957 = arith.mulf %956, %778 : vector<8x128xf32>
    %958 = vector.broadcast %804 : f32 to vector<8x128xf32>
    %959 = arith.mulf %958, %798 : vector<8x128xf32>
    %960 = arith.addf %957, %959 : vector<8x128xf32>
    %961 = vector.broadcast %805 : f32 to vector<8x128xf32>
    %962 = arith.mulf %961, %783 : vector<8x128xf32>
    %963 = vector.broadcast %804 : f32 to vector<8x128xf32>
    %964 = arith.mulf %963, %803 : vector<8x128xf32>
    %965 = arith.addf %962, %964 : vector<8x128xf32>
    %c0_125 = arith.constant 0 : index
    %c18_126 = arith.constant 18 : index
    %966 = memref.load %arg1[%c0_125, %c18_126] : memref<2x20xf32, #tpu.memory_space<smem>>
    %c1_127 = arith.constant 1 : index
    %c18_128 = arith.constant 18 : index
    %967 = memref.load %arg1[%c1_127, %c18_128] : memref<2x20xf32, #tpu.memory_space<smem>>
    %968 = vector.broadcast %966 : f32 to vector<8x128xf32>
    %969 = arith.mulf %968, %810 : vector<8x128xf32>
    %970 = vector.broadcast %967 : f32 to vector<8x128xf32>
    %971 = arith.mulf %970, %850 : vector<8x128xf32>
    %972 = arith.subf %969, %971 : vector<8x128xf32>
    %973 = vector.broadcast %966 : f32 to vector<8x128xf32>
    %974 = arith.mulf %973, %815 : vector<8x128xf32>
    %975 = vector.broadcast %967 : f32 to vector<8x128xf32>
    %976 = arith.mulf %975, %855 : vector<8x128xf32>
    %977 = arith.subf %974, %976 : vector<8x128xf32>
    %978 = vector.broadcast %967 : f32 to vector<8x128xf32>
    %979 = arith.mulf %978, %810 : vector<8x128xf32>
    %980 = vector.broadcast %966 : f32 to vector<8x128xf32>
    %981 = arith.mulf %980, %850 : vector<8x128xf32>
    %982 = arith.addf %979, %981 : vector<8x128xf32>
    %983 = vector.broadcast %967 : f32 to vector<8x128xf32>
    %984 = arith.mulf %983, %815 : vector<8x128xf32>
    %985 = vector.broadcast %966 : f32 to vector<8x128xf32>
    %986 = arith.mulf %985, %855 : vector<8x128xf32>
    %987 = arith.addf %984, %986 : vector<8x128xf32>
    %988 = vector.broadcast %966 : f32 to vector<8x128xf32>
    %989 = arith.mulf %988, %830 : vector<8x128xf32>
    %990 = vector.broadcast %967 : f32 to vector<8x128xf32>
    %991 = arith.mulf %990, %870 : vector<8x128xf32>
    %992 = arith.subf %989, %991 : vector<8x128xf32>
    %993 = vector.broadcast %966 : f32 to vector<8x128xf32>
    %994 = arith.mulf %993, %835 : vector<8x128xf32>
    %995 = vector.broadcast %967 : f32 to vector<8x128xf32>
    %996 = arith.mulf %995, %875 : vector<8x128xf32>
    %997 = arith.subf %994, %996 : vector<8x128xf32>
    %998 = vector.broadcast %967 : f32 to vector<8x128xf32>
    %999 = arith.mulf %998, %830 : vector<8x128xf32>
    %1000 = vector.broadcast %966 : f32 to vector<8x128xf32>
    %1001 = arith.mulf %1000, %870 : vector<8x128xf32>
    %1002 = arith.addf %999, %1001 : vector<8x128xf32>
    %1003 = vector.broadcast %967 : f32 to vector<8x128xf32>
    %1004 = arith.mulf %1003, %835 : vector<8x128xf32>
    %1005 = vector.broadcast %966 : f32 to vector<8x128xf32>
    %1006 = arith.mulf %1005, %875 : vector<8x128xf32>
    %1007 = arith.addf %1004, %1006 : vector<8x128xf32>
    %1008 = vector.broadcast %966 : f32 to vector<8x128xf32>
    %1009 = arith.mulf %1008, %820 : vector<8x128xf32>
    %1010 = vector.broadcast %967 : f32 to vector<8x128xf32>
    %1011 = arith.mulf %1010, %860 : vector<8x128xf32>
    %1012 = arith.subf %1009, %1011 : vector<8x128xf32>
    %1013 = vector.broadcast %966 : f32 to vector<8x128xf32>
    %1014 = arith.mulf %1013, %825 : vector<8x128xf32>
    %1015 = vector.broadcast %967 : f32 to vector<8x128xf32>
    %1016 = arith.mulf %1015, %865 : vector<8x128xf32>
    %1017 = arith.subf %1014, %1016 : vector<8x128xf32>
    %1018 = vector.broadcast %967 : f32 to vector<8x128xf32>
    %1019 = arith.mulf %1018, %820 : vector<8x128xf32>
    %1020 = vector.broadcast %966 : f32 to vector<8x128xf32>
    %1021 = arith.mulf %1020, %860 : vector<8x128xf32>
    %1022 = arith.addf %1019, %1021 : vector<8x128xf32>
    %1023 = vector.broadcast %967 : f32 to vector<8x128xf32>
    %1024 = arith.mulf %1023, %825 : vector<8x128xf32>
    %1025 = vector.broadcast %966 : f32 to vector<8x128xf32>
    %1026 = arith.mulf %1025, %865 : vector<8x128xf32>
    %1027 = arith.addf %1024, %1026 : vector<8x128xf32>
    %1028 = vector.broadcast %966 : f32 to vector<8x128xf32>
    %1029 = arith.mulf %1028, %840 : vector<8x128xf32>
    %1030 = vector.broadcast %967 : f32 to vector<8x128xf32>
    %1031 = arith.mulf %1030, %880 : vector<8x128xf32>
    %1032 = arith.subf %1029, %1031 : vector<8x128xf32>
    %1033 = vector.broadcast %966 : f32 to vector<8x128xf32>
    %1034 = arith.mulf %1033, %845 : vector<8x128xf32>
    %1035 = vector.broadcast %967 : f32 to vector<8x128xf32>
    %1036 = arith.mulf %1035, %885 : vector<8x128xf32>
    %1037 = arith.subf %1034, %1036 : vector<8x128xf32>
    %1038 = vector.broadcast %967 : f32 to vector<8x128xf32>
    %1039 = arith.mulf %1038, %840 : vector<8x128xf32>
    %1040 = vector.broadcast %966 : f32 to vector<8x128xf32>
    %1041 = arith.mulf %1040, %880 : vector<8x128xf32>
    %1042 = arith.addf %1039, %1041 : vector<8x128xf32>
    %1043 = vector.broadcast %967 : f32 to vector<8x128xf32>
    %1044 = arith.mulf %1043, %845 : vector<8x128xf32>
    %1045 = vector.broadcast %966 : f32 to vector<8x128xf32>
    %1046 = arith.mulf %1045, %885 : vector<8x128xf32>
    %1047 = arith.addf %1044, %1046 : vector<8x128xf32>
    %1048 = vector.broadcast %966 : f32 to vector<8x128xf32>
    %1049 = arith.mulf %1048, %890 : vector<8x128xf32>
    %1050 = vector.broadcast %967 : f32 to vector<8x128xf32>
    %1051 = arith.mulf %1050, %930 : vector<8x128xf32>
    %1052 = arith.subf %1049, %1051 : vector<8x128xf32>
    %1053 = vector.broadcast %966 : f32 to vector<8x128xf32>
    %1054 = arith.mulf %1053, %895 : vector<8x128xf32>
    %1055 = vector.broadcast %967 : f32 to vector<8x128xf32>
    %1056 = arith.mulf %1055, %935 : vector<8x128xf32>
    %1057 = arith.subf %1054, %1056 : vector<8x128xf32>
    %1058 = vector.broadcast %967 : f32 to vector<8x128xf32>
    %1059 = arith.mulf %1058, %890 : vector<8x128xf32>
    %1060 = vector.broadcast %966 : f32 to vector<8x128xf32>
    %1061 = arith.mulf %1060, %930 : vector<8x128xf32>
    %1062 = arith.addf %1059, %1061 : vector<8x128xf32>
    %1063 = vector.broadcast %967 : f32 to vector<8x128xf32>
    %1064 = arith.mulf %1063, %895 : vector<8x128xf32>
    %1065 = vector.broadcast %966 : f32 to vector<8x128xf32>
    %1066 = arith.mulf %1065, %935 : vector<8x128xf32>
    %1067 = arith.addf %1064, %1066 : vector<8x128xf32>
    %1068 = vector.broadcast %966 : f32 to vector<8x128xf32>
    %1069 = arith.mulf %1068, %910 : vector<8x128xf32>
    %1070 = vector.broadcast %967 : f32 to vector<8x128xf32>
    %1071 = arith.mulf %1070, %950 : vector<8x128xf32>
    %1072 = arith.subf %1069, %1071 : vector<8x128xf32>
    %1073 = vector.broadcast %966 : f32 to vector<8x128xf32>
    %1074 = arith.mulf %1073, %915 : vector<8x128xf32>
    %1075 = vector.broadcast %967 : f32 to vector<8x128xf32>
    %1076 = arith.mulf %1075, %955 : vector<8x128xf32>
    %1077 = arith.subf %1074, %1076 : vector<8x128xf32>
    %1078 = vector.broadcast %967 : f32 to vector<8x128xf32>
    %1079 = arith.mulf %1078, %910 : vector<8x128xf32>
    %1080 = vector.broadcast %966 : f32 to vector<8x128xf32>
    %1081 = arith.mulf %1080, %950 : vector<8x128xf32>
    %1082 = arith.addf %1079, %1081 : vector<8x128xf32>
    %1083 = vector.broadcast %967 : f32 to vector<8x128xf32>
    %1084 = arith.mulf %1083, %915 : vector<8x128xf32>
    %1085 = vector.broadcast %966 : f32 to vector<8x128xf32>
    %1086 = arith.mulf %1085, %955 : vector<8x128xf32>
    %1087 = arith.addf %1084, %1086 : vector<8x128xf32>
    %1088 = vector.broadcast %966 : f32 to vector<8x128xf32>
    %1089 = arith.mulf %1088, %900 : vector<8x128xf32>
    %1090 = vector.broadcast %967 : f32 to vector<8x128xf32>
    %1091 = arith.mulf %1090, %940 : vector<8x128xf32>
    %1092 = arith.subf %1089, %1091 : vector<8x128xf32>
    %1093 = vector.broadcast %966 : f32 to vector<8x128xf32>
    %1094 = arith.mulf %1093, %905 : vector<8x128xf32>
    %1095 = vector.broadcast %967 : f32 to vector<8x128xf32>
    %1096 = arith.mulf %1095, %945 : vector<8x128xf32>
    %1097 = arith.subf %1094, %1096 : vector<8x128xf32>
    %1098 = vector.broadcast %967 : f32 to vector<8x128xf32>
    %1099 = arith.mulf %1098, %900 : vector<8x128xf32>
    %1100 = vector.broadcast %966 : f32 to vector<8x128xf32>
    %1101 = arith.mulf %1100, %940 : vector<8x128xf32>
    %1102 = arith.addf %1099, %1101 : vector<8x128xf32>
    %1103 = vector.broadcast %967 : f32 to vector<8x128xf32>
    %1104 = arith.mulf %1103, %905 : vector<8x128xf32>
    %1105 = vector.broadcast %966 : f32 to vector<8x128xf32>
    %1106 = arith.mulf %1105, %945 : vector<8x128xf32>
    %1107 = arith.addf %1104, %1106 : vector<8x128xf32>
    %1108 = vector.broadcast %966 : f32 to vector<8x128xf32>
    %1109 = arith.mulf %1108, %920 : vector<8x128xf32>
    %1110 = vector.broadcast %967 : f32 to vector<8x128xf32>
    %1111 = arith.mulf %1110, %960 : vector<8x128xf32>
    %1112 = arith.subf %1109, %1111 : vector<8x128xf32>
    %1113 = vector.broadcast %966 : f32 to vector<8x128xf32>
    %1114 = arith.mulf %1113, %925 : vector<8x128xf32>
    %1115 = vector.broadcast %967 : f32 to vector<8x128xf32>
    %1116 = arith.mulf %1115, %965 : vector<8x128xf32>
    %1117 = arith.subf %1114, %1116 : vector<8x128xf32>
    %1118 = vector.broadcast %967 : f32 to vector<8x128xf32>
    %1119 = arith.mulf %1118, %920 : vector<8x128xf32>
    %1120 = vector.broadcast %966 : f32 to vector<8x128xf32>
    %1121 = arith.mulf %1120, %960 : vector<8x128xf32>
    %1122 = arith.addf %1119, %1121 : vector<8x128xf32>
    %1123 = vector.broadcast %967 : f32 to vector<8x128xf32>
    %1124 = arith.mulf %1123, %925 : vector<8x128xf32>
    %1125 = vector.broadcast %966 : f32 to vector<8x128xf32>
    %1126 = arith.mulf %1125, %965 : vector<8x128xf32>
    %1127 = arith.addf %1124, %1126 : vector<8x128xf32>
    %c0_129 = arith.constant 0 : index
    %c19_130 = arith.constant 19 : index
    %1128 = memref.load %arg1[%c0_129, %c19_130] : memref<2x20xf32, #tpu.memory_space<smem>>
    %c1_131 = arith.constant 1 : index
    %c19_132 = arith.constant 19 : index
    %1129 = memref.load %arg1[%c1_131, %c19_132] : memref<2x20xf32, #tpu.memory_space<smem>>
    %1130 = vector.broadcast %1128 : f32 to vector<8x128xf32>
    %1131 = arith.mulf %1130, %972 : vector<8x128xf32>
    %1132 = vector.broadcast %1129 : f32 to vector<8x128xf32>
    %1133 = arith.mulf %1132, %1052 : vector<8x128xf32>
    %1134 = arith.subf %1131, %1133 : vector<8x128xf32>
    %1135 = vector.broadcast %1128 : f32 to vector<8x128xf32>
    %1136 = arith.mulf %1135, %977 : vector<8x128xf32>
    %1137 = vector.broadcast %1129 : f32 to vector<8x128xf32>
    %1138 = arith.mulf %1137, %1057 : vector<8x128xf32>
    %1139 = arith.subf %1136, %1138 : vector<8x128xf32>
    %1140 = vector.broadcast %1129 : f32 to vector<8x128xf32>
    %1141 = arith.mulf %1140, %972 : vector<8x128xf32>
    %1142 = vector.broadcast %1128 : f32 to vector<8x128xf32>
    %1143 = arith.mulf %1142, %1052 : vector<8x128xf32>
    %1144 = arith.addf %1141, %1143 : vector<8x128xf32>
    %1145 = vector.broadcast %1129 : f32 to vector<8x128xf32>
    %1146 = arith.mulf %1145, %977 : vector<8x128xf32>
    %1147 = vector.broadcast %1128 : f32 to vector<8x128xf32>
    %1148 = arith.mulf %1147, %1057 : vector<8x128xf32>
    %1149 = arith.addf %1146, %1148 : vector<8x128xf32>
    %1150 = arith.mulf %1134, %1134 : vector<8x128xf32>
    %1151 = arith.mulf %1139, %1139 : vector<8x128xf32>
    %1152 = arith.addf %1150, %1151 : vector<8x128xf32>
    %1153 = arith.mulf %1144, %1144 : vector<8x128xf32>
    %1154 = arith.mulf %1149, %1149 : vector<8x128xf32>
    %1155 = arith.addf %1153, %1154 : vector<8x128xf32>
    %1156 = arith.addf %1152, %1155 : vector<8x128xf32>
    %1157 = arith.addf %1152, %1155 : vector<8x128xf32>
    %1158 = arith.addf %1152, %1155 : vector<8x128xf32>
    %1159 = arith.subf %1152, %1155 : vector<8x128xf32>
    %1160 = vector.broadcast %1128 : f32 to vector<8x128xf32>
    %1161 = arith.mulf %1160, %992 : vector<8x128xf32>
    %1162 = vector.broadcast %1129 : f32 to vector<8x128xf32>
    %1163 = arith.mulf %1162, %1072 : vector<8x128xf32>
    %1164 = arith.subf %1161, %1163 : vector<8x128xf32>
    %1165 = vector.broadcast %1128 : f32 to vector<8x128xf32>
    %1166 = arith.mulf %1165, %997 : vector<8x128xf32>
    %1167 = vector.broadcast %1129 : f32 to vector<8x128xf32>
    %1168 = arith.mulf %1167, %1077 : vector<8x128xf32>
    %1169 = arith.subf %1166, %1168 : vector<8x128xf32>
    %1170 = vector.broadcast %1129 : f32 to vector<8x128xf32>
    %1171 = arith.mulf %1170, %992 : vector<8x128xf32>
    %1172 = vector.broadcast %1128 : f32 to vector<8x128xf32>
    %1173 = arith.mulf %1172, %1072 : vector<8x128xf32>
    %1174 = arith.addf %1171, %1173 : vector<8x128xf32>
    %1175 = vector.broadcast %1129 : f32 to vector<8x128xf32>
    %1176 = arith.mulf %1175, %997 : vector<8x128xf32>
    %1177 = vector.broadcast %1128 : f32 to vector<8x128xf32>
    %1178 = arith.mulf %1177, %1077 : vector<8x128xf32>
    %1179 = arith.addf %1176, %1178 : vector<8x128xf32>
    %1180 = arith.mulf %1164, %1164 : vector<8x128xf32>
    %1181 = arith.mulf %1169, %1169 : vector<8x128xf32>
    %1182 = arith.addf %1180, %1181 : vector<8x128xf32>
    %1183 = arith.mulf %1174, %1174 : vector<8x128xf32>
    %1184 = arith.mulf %1179, %1179 : vector<8x128xf32>
    %1185 = arith.addf %1183, %1184 : vector<8x128xf32>
    %1186 = arith.subf %1156, %1182 : vector<8x128xf32>
    %1187 = arith.subf %1186, %1185 : vector<8x128xf32>
    %1188 = arith.addf %1157, %1182 : vector<8x128xf32>
    %1189 = arith.addf %1188, %1185 : vector<8x128xf32>
    %1190 = arith.addf %1158, %1182 : vector<8x128xf32>
    %1191 = arith.addf %1190, %1185 : vector<8x128xf32>
    %1192 = arith.addf %1159, %1182 : vector<8x128xf32>
    %1193 = arith.subf %1192, %1185 : vector<8x128xf32>
    %1194 = vector.broadcast %1128 : f32 to vector<8x128xf32>
    %1195 = arith.mulf %1194, %1012 : vector<8x128xf32>
    %1196 = vector.broadcast %1129 : f32 to vector<8x128xf32>
    %1197 = arith.mulf %1196, %1092 : vector<8x128xf32>
    %1198 = arith.subf %1195, %1197 : vector<8x128xf32>
    %1199 = vector.broadcast %1128 : f32 to vector<8x128xf32>
    %1200 = arith.mulf %1199, %1017 : vector<8x128xf32>
    %1201 = vector.broadcast %1129 : f32 to vector<8x128xf32>
    %1202 = arith.mulf %1201, %1097 : vector<8x128xf32>
    %1203 = arith.subf %1200, %1202 : vector<8x128xf32>
    %1204 = vector.broadcast %1129 : f32 to vector<8x128xf32>
    %1205 = arith.mulf %1204, %1012 : vector<8x128xf32>
    %1206 = vector.broadcast %1128 : f32 to vector<8x128xf32>
    %1207 = arith.mulf %1206, %1092 : vector<8x128xf32>
    %1208 = arith.addf %1205, %1207 : vector<8x128xf32>
    %1209 = vector.broadcast %1129 : f32 to vector<8x128xf32>
    %1210 = arith.mulf %1209, %1017 : vector<8x128xf32>
    %1211 = vector.broadcast %1128 : f32 to vector<8x128xf32>
    %1212 = arith.mulf %1211, %1097 : vector<8x128xf32>
    %1213 = arith.addf %1210, %1212 : vector<8x128xf32>
    %1214 = arith.mulf %1198, %1198 : vector<8x128xf32>
    %1215 = arith.mulf %1203, %1203 : vector<8x128xf32>
    %1216 = arith.addf %1214, %1215 : vector<8x128xf32>
    %1217 = arith.mulf %1208, %1208 : vector<8x128xf32>
    %1218 = arith.mulf %1213, %1213 : vector<8x128xf32>
    %1219 = arith.addf %1217, %1218 : vector<8x128xf32>
    %1220 = arith.addf %1187, %1216 : vector<8x128xf32>
    %1221 = arith.addf %1220, %1219 : vector<8x128xf32>
    %1222 = arith.subf %1189, %1216 : vector<8x128xf32>
    %1223 = arith.subf %1222, %1219 : vector<8x128xf32>
    %1224 = arith.addf %1191, %1216 : vector<8x128xf32>
    %1225 = arith.addf %1224, %1219 : vector<8x128xf32>
    %1226 = arith.addf %1193, %1216 : vector<8x128xf32>
    %1227 = arith.subf %1226, %1219 : vector<8x128xf32>
    %1228 = vector.broadcast %1128 : f32 to vector<8x128xf32>
    %1229 = arith.mulf %1228, %1032 : vector<8x128xf32>
    %1230 = vector.broadcast %1129 : f32 to vector<8x128xf32>
    %1231 = arith.mulf %1230, %1112 : vector<8x128xf32>
    %1232 = arith.subf %1229, %1231 : vector<8x128xf32>
    %1233 = vector.broadcast %1128 : f32 to vector<8x128xf32>
    %1234 = arith.mulf %1233, %1037 : vector<8x128xf32>
    %1235 = vector.broadcast %1129 : f32 to vector<8x128xf32>
    %1236 = arith.mulf %1235, %1117 : vector<8x128xf32>
    %1237 = arith.subf %1234, %1236 : vector<8x128xf32>
    %1238 = vector.broadcast %1129 : f32 to vector<8x128xf32>
    %1239 = arith.mulf %1238, %1032 : vector<8x128xf32>
    %1240 = vector.broadcast %1128 : f32 to vector<8x128xf32>
    %1241 = arith.mulf %1240, %1112 : vector<8x128xf32>
    %1242 = arith.addf %1239, %1241 : vector<8x128xf32>
    %1243 = vector.broadcast %1129 : f32 to vector<8x128xf32>
    %1244 = arith.mulf %1243, %1037 : vector<8x128xf32>
    %1245 = vector.broadcast %1128 : f32 to vector<8x128xf32>
    %1246 = arith.mulf %1245, %1117 : vector<8x128xf32>
    %1247 = arith.addf %1244, %1246 : vector<8x128xf32>
    %1248 = arith.mulf %1232, %1232 : vector<8x128xf32>
    %1249 = arith.mulf %1237, %1237 : vector<8x128xf32>
    %1250 = arith.addf %1248, %1249 : vector<8x128xf32>
    %1251 = arith.mulf %1242, %1242 : vector<8x128xf32>
    %1252 = arith.mulf %1247, %1247 : vector<8x128xf32>
    %1253 = arith.addf %1251, %1252 : vector<8x128xf32>
    %1254 = arith.subf %1221, %1250 : vector<8x128xf32>
    %1255 = arith.subf %1254, %1253 : vector<8x128xf32>
    %1256 = arith.subf %1223, %1250 : vector<8x128xf32>
    %1257 = arith.subf %1256, %1253 : vector<8x128xf32>
    %1258 = arith.addf %1225, %1250 : vector<8x128xf32>
    %1259 = arith.addf %1258, %1253 : vector<8x128xf32>
    %1260 = arith.addf %1227, %1250 : vector<8x128xf32>
    %1261 = arith.subf %1260, %1253 : vector<8x128xf32>
    %1262 = vector.broadcast %1128 : f32 to vector<8x128xf32>
    %1263 = arith.mulf %1262, %982 : vector<8x128xf32>
    %1264 = vector.broadcast %1129 : f32 to vector<8x128xf32>
    %1265 = arith.mulf %1264, %1062 : vector<8x128xf32>
    %1266 = arith.subf %1263, %1265 : vector<8x128xf32>
    %1267 = vector.broadcast %1128 : f32 to vector<8x128xf32>
    %1268 = arith.mulf %1267, %987 : vector<8x128xf32>
    %1269 = vector.broadcast %1129 : f32 to vector<8x128xf32>
    %1270 = arith.mulf %1269, %1067 : vector<8x128xf32>
    %1271 = arith.subf %1268, %1270 : vector<8x128xf32>
    %1272 = vector.broadcast %1129 : f32 to vector<8x128xf32>
    %1273 = arith.mulf %1272, %982 : vector<8x128xf32>
    %1274 = vector.broadcast %1128 : f32 to vector<8x128xf32>
    %1275 = arith.mulf %1274, %1062 : vector<8x128xf32>
    %1276 = arith.addf %1273, %1275 : vector<8x128xf32>
    %1277 = vector.broadcast %1129 : f32 to vector<8x128xf32>
    %1278 = arith.mulf %1277, %987 : vector<8x128xf32>
    %1279 = vector.broadcast %1128 : f32 to vector<8x128xf32>
    %1280 = arith.mulf %1279, %1067 : vector<8x128xf32>
    %1281 = arith.addf %1278, %1280 : vector<8x128xf32>
    %1282 = arith.mulf %1266, %1266 : vector<8x128xf32>
    %1283 = arith.mulf %1271, %1271 : vector<8x128xf32>
    %1284 = arith.addf %1282, %1283 : vector<8x128xf32>
    %1285 = arith.mulf %1276, %1276 : vector<8x128xf32>
    %1286 = arith.mulf %1281, %1281 : vector<8x128xf32>
    %1287 = arith.addf %1285, %1286 : vector<8x128xf32>
    %1288 = arith.addf %1255, %1284 : vector<8x128xf32>
    %1289 = arith.addf %1288, %1287 : vector<8x128xf32>
    %1290 = arith.addf %1257, %1284 : vector<8x128xf32>
    %1291 = arith.addf %1290, %1287 : vector<8x128xf32>
    %1292 = arith.subf %1259, %1284 : vector<8x128xf32>
    %1293 = arith.subf %1292, %1287 : vector<8x128xf32>
    %1294 = arith.addf %1261, %1284 : vector<8x128xf32>
    %1295 = arith.subf %1294, %1287 : vector<8x128xf32>
    %1296 = vector.broadcast %1128 : f32 to vector<8x128xf32>
    %1297 = arith.mulf %1296, %1002 : vector<8x128xf32>
    %1298 = vector.broadcast %1129 : f32 to vector<8x128xf32>
    %1299 = arith.mulf %1298, %1082 : vector<8x128xf32>
    %1300 = arith.subf %1297, %1299 : vector<8x128xf32>
    %1301 = vector.broadcast %1128 : f32 to vector<8x128xf32>
    %1302 = arith.mulf %1301, %1007 : vector<8x128xf32>
    %1303 = vector.broadcast %1129 : f32 to vector<8x128xf32>
    %1304 = arith.mulf %1303, %1087 : vector<8x128xf32>
    %1305 = arith.subf %1302, %1304 : vector<8x128xf32>
    %1306 = vector.broadcast %1129 : f32 to vector<8x128xf32>
    %1307 = arith.mulf %1306, %1002 : vector<8x128xf32>
    %1308 = vector.broadcast %1128 : f32 to vector<8x128xf32>
    %1309 = arith.mulf %1308, %1082 : vector<8x128xf32>
    %1310 = arith.addf %1307, %1309 : vector<8x128xf32>
    %1311 = vector.broadcast %1129 : f32 to vector<8x128xf32>
    %1312 = arith.mulf %1311, %1007 : vector<8x128xf32>
    %1313 = vector.broadcast %1128 : f32 to vector<8x128xf32>
    %1314 = arith.mulf %1313, %1087 : vector<8x128xf32>
    %1315 = arith.addf %1312, %1314 : vector<8x128xf32>
    %1316 = arith.mulf %1300, %1300 : vector<8x128xf32>
    %1317 = arith.mulf %1305, %1305 : vector<8x128xf32>
    %1318 = arith.addf %1316, %1317 : vector<8x128xf32>
    %1319 = arith.mulf %1310, %1310 : vector<8x128xf32>
    %1320 = arith.mulf %1315, %1315 : vector<8x128xf32>
    %1321 = arith.addf %1319, %1320 : vector<8x128xf32>
    %1322 = arith.subf %1289, %1318 : vector<8x128xf32>
    %1323 = arith.subf %1322, %1321 : vector<8x128xf32>
    %1324 = arith.addf %1291, %1318 : vector<8x128xf32>
    %1325 = arith.addf %1324, %1321 : vector<8x128xf32>
    %1326 = arith.subf %1293, %1318 : vector<8x128xf32>
    %1327 = arith.subf %1326, %1321 : vector<8x128xf32>
    %1328 = arith.addf %1295, %1318 : vector<8x128xf32>
    %1329 = arith.subf %1328, %1321 : vector<8x128xf32>
    %1330 = vector.broadcast %1128 : f32 to vector<8x128xf32>
    %1331 = arith.mulf %1330, %1022 : vector<8x128xf32>
    %1332 = vector.broadcast %1129 : f32 to vector<8x128xf32>
    %1333 = arith.mulf %1332, %1102 : vector<8x128xf32>
    %1334 = arith.subf %1331, %1333 : vector<8x128xf32>
    %1335 = vector.broadcast %1128 : f32 to vector<8x128xf32>
    %1336 = arith.mulf %1335, %1027 : vector<8x128xf32>
    %1337 = vector.broadcast %1129 : f32 to vector<8x128xf32>
    %1338 = arith.mulf %1337, %1107 : vector<8x128xf32>
    %1339 = arith.subf %1336, %1338 : vector<8x128xf32>
    %1340 = vector.broadcast %1129 : f32 to vector<8x128xf32>
    %1341 = arith.mulf %1340, %1022 : vector<8x128xf32>
    %1342 = vector.broadcast %1128 : f32 to vector<8x128xf32>
    %1343 = arith.mulf %1342, %1102 : vector<8x128xf32>
    %1344 = arith.addf %1341, %1343 : vector<8x128xf32>
    %1345 = vector.broadcast %1129 : f32 to vector<8x128xf32>
    %1346 = arith.mulf %1345, %1027 : vector<8x128xf32>
    %1347 = vector.broadcast %1128 : f32 to vector<8x128xf32>
    %1348 = arith.mulf %1347, %1107 : vector<8x128xf32>
    %1349 = arith.addf %1346, %1348 : vector<8x128xf32>
    %1350 = arith.mulf %1334, %1334 : vector<8x128xf32>
    %1351 = arith.mulf %1339, %1339 : vector<8x128xf32>
    %1352 = arith.addf %1350, %1351 : vector<8x128xf32>
    %1353 = arith.mulf %1344, %1344 : vector<8x128xf32>
    %1354 = arith.mulf %1349, %1349 : vector<8x128xf32>
    %1355 = arith.addf %1353, %1354 : vector<8x128xf32>
    %1356 = arith.addf %1323, %1352 : vector<8x128xf32>
    %1357 = arith.addf %1356, %1355 : vector<8x128xf32>
    %1358 = arith.subf %1325, %1352 : vector<8x128xf32>
    %1359 = arith.subf %1358, %1355 : vector<8x128xf32>
    %1360 = arith.subf %1327, %1352 : vector<8x128xf32>
    %1361 = arith.subf %1360, %1355 : vector<8x128xf32>
    %1362 = arith.addf %1329, %1352 : vector<8x128xf32>
    %1363 = arith.subf %1362, %1355 : vector<8x128xf32>
    %1364 = vector.broadcast %1128 : f32 to vector<8x128xf32>
    %1365 = arith.mulf %1364, %1042 : vector<8x128xf32>
    %1366 = vector.broadcast %1129 : f32 to vector<8x128xf32>
    %1367 = arith.mulf %1366, %1122 : vector<8x128xf32>
    %1368 = arith.subf %1365, %1367 : vector<8x128xf32>
    %1369 = vector.broadcast %1128 : f32 to vector<8x128xf32>
    %1370 = arith.mulf %1369, %1047 : vector<8x128xf32>
    %1371 = vector.broadcast %1129 : f32 to vector<8x128xf32>
    %1372 = arith.mulf %1371, %1127 : vector<8x128xf32>
    %1373 = arith.subf %1370, %1372 : vector<8x128xf32>
    %1374 = vector.broadcast %1129 : f32 to vector<8x128xf32>
    %1375 = arith.mulf %1374, %1042 : vector<8x128xf32>
    %1376 = vector.broadcast %1128 : f32 to vector<8x128xf32>
    %1377 = arith.mulf %1376, %1122 : vector<8x128xf32>
    %1378 = arith.addf %1375, %1377 : vector<8x128xf32>
    %1379 = vector.broadcast %1129 : f32 to vector<8x128xf32>
    %1380 = arith.mulf %1379, %1047 : vector<8x128xf32>
    %1381 = vector.broadcast %1128 : f32 to vector<8x128xf32>
    %1382 = arith.mulf %1381, %1127 : vector<8x128xf32>
    %1383 = arith.addf %1380, %1382 : vector<8x128xf32>
    %1384 = arith.mulf %1368, %1368 : vector<8x128xf32>
    %1385 = arith.mulf %1373, %1373 : vector<8x128xf32>
    %1386 = arith.addf %1384, %1385 : vector<8x128xf32>
    %1387 = arith.mulf %1378, %1378 : vector<8x128xf32>
    %1388 = arith.mulf %1383, %1383 : vector<8x128xf32>
    %1389 = arith.addf %1387, %1388 : vector<8x128xf32>
    %1390 = arith.subf %1357, %1386 : vector<8x128xf32>
    %1391 = arith.subf %1390, %1389 : vector<8x128xf32>
    %1392 = arith.subf %1359, %1386 : vector<8x128xf32>
    %1393 = arith.subf %1392, %1389 : vector<8x128xf32>
    %1394 = arith.subf %1361, %1386 : vector<8x128xf32>
    %1395 = arith.subf %1394, %1389 : vector<8x128xf32>
    %1396 = arith.addf %1363, %1386 : vector<8x128xf32>
    %1397 = arith.subf %1396, %1389 : vector<8x128xf32>
    %c0_133 = arith.constant 0 : index
    %1398 = arith.index_cast %1 : i32 to index
    %c0_134 = arith.constant 0 : index
    %1399 = vector.load %arg3[%c0_133, %1398, %c0_134] : memref<4x8x128xf32, #tpu.memory_space<vmem>>, vector<1x8x128xf32>
    %1400 = vector.shape_cast %1399 : vector<1x8x128xf32> to vector<8x128xf32>
    %1401 = vector.shape_cast %1391 : vector<8x128xf32> to vector<1x8x128xf32>
    tpu.vector_store %arg3[%c0_133, %1398, %c0_134], %1401 {strides = array<i32>} : memref<4x8x128xf32, #tpu.memory_space<vmem>>, vector<1x8x128xf32>,
    %c1_135 = arith.constant 1 : index
    %1402 = arith.index_cast %1 : i32 to index
    %c0_136 = arith.constant 0 : index
    %1403 = vector.load %arg3[%c1_135, %1402, %c0_136] : memref<4x8x128xf32, #tpu.memory_space<vmem>>, vector<1x8x128xf32>
    %1404 = vector.shape_cast %1403 : vector<1x8x128xf32> to vector<8x128xf32>
    %1405 = vector.shape_cast %1393 : vector<8x128xf32> to vector<1x8x128xf32>
    tpu.vector_store %arg3[%c1_135, %1402, %c0_136], %1405 {strides = array<i32>} : memref<4x8x128xf32, #tpu.memory_space<vmem>>, vector<1x8x128xf32>,
    %c2_137 = arith.constant 2 : index
    %1406 = arith.index_cast %1 : i32 to index
    %c0_138 = arith.constant 0 : index
    %1407 = vector.load %arg3[%c2_137, %1406, %c0_138] : memref<4x8x128xf32, #tpu.memory_space<vmem>>, vector<1x8x128xf32>
    %1408 = vector.shape_cast %1407 : vector<1x8x128xf32> to vector<8x128xf32>
    %1409 = vector.shape_cast %1395 : vector<8x128xf32> to vector<1x8x128xf32>
    tpu.vector_store %arg3[%c2_137, %1406, %c0_138], %1409 {strides = array<i32>} : memref<4x8x128xf32, #tpu.memory_space<vmem>>, vector<1x8x128xf32>,
    %c3_139 = arith.constant 3 : index
    %1410 = arith.index_cast %1 : i32 to index
    %c0_140 = arith.constant 0 : index
    %1411 = vector.load %arg3[%c3_139, %1410, %c0_140] : memref<4x8x128xf32, #tpu.memory_space<vmem>>, vector<1x8x128xf32>
    %1412 = vector.shape_cast %1411 : vector<1x8x128xf32> to vector<8x128xf32>
    %1413 = vector.shape_cast %1397 : vector<8x128xf32> to vector<1x8x128xf32>
    tpu.vector_store %arg3[%c3_139, %1410, %c0_140], %1413 {strides = array<i32>} : memref<4x8x128xf32, #tpu.memory_space<vmem>>, vector<1x8x128xf32>,
    %c1_i32 = arith.constant 1 : i32
    return
  }
  func.func @transform_0(%arg0: i32) -> (i32, i32) {
    %c0_i32 = arith.constant 0 : i32
    %c0_i32_0 = arith.constant 0 : i32
    %c0_i32_1 = arith.constant 0 : i32
    return %c0_i32, %c0_i32_0 : i32, i32
  }
  func.func @transform_1(%arg0: i32) -> (i32, i32, i32) {
    %c0_i32 = arith.constant 0 : i32
    %c0_i32_0 = arith.constant 0 : i32
    %c0_i32_1 = arith.constant 0 : i32
    return %c0_i32, %arg0, %c0_i32_0 : i32, i32, i32
  }
  func.func @transform_2(%arg0: i32) -> (i32, i32, i32) {
    %c0_i32 = arith.constant 0 : i32
    %c0_i32_0 = arith.constant 0 : i32
    %c0_i32_1 = arith.constant 0 : i32
    return %c0_i32, %arg0, %c0_i32_0 : i32, i32, i32
  }
}

module attributes {stable_mosaic.version = 11 : i64} {
  func.func @_tail_kernel(%arg0: i32, %arg1: memref<16x36x128xf32, #tpu.memory_space<vmem>>, %arg2: memref<16x36xf32, #tpu.memory_space<vmem>>, %arg3: memref<16x1xf32, #tpu.memory_space<vmem>>, %arg4: memref<16x6x16xf32, #tpu.memory_space<vmem>>, %arg5: memref<6x1xf32, #tpu.memory_space<vmem>>, %arg6: memref<3x6xf32, #tpu.memory_space<vmem>>, %arg7: memref<3x1xf32, #tpu.memory_space<vmem>>, %arg8: memref<3x128xf32, #tpu.memory_space<vmem>>) attributes {dimension_semantics = [#tpu.dimension_semantics<parallel>], iteration_bounds = array<i64: 1>, scalar_prefetch = 0 : i64, scratch_operands = 0 : i64, tpu.core_type = #tpu.core_type<tc>, window_params = [{transform_indices = @transform_0, window_bounds = array<i64: 16, 36, 128>}, {pipeline_mode = #tpu.pipeline_mode<synchronous>, transform_indices = @transform_1, window_bounds = array<i64: 16, 36>}, {pipeline_mode = #tpu.pipeline_mode<synchronous>, transform_indices = @transform_2, window_bounds = array<i64: 16, 1>}, {pipeline_mode = #tpu.pipeline_mode<synchronous>, transform_indices = @transform_3, window_bounds = array<i64: 16, 6, 16>}, {pipeline_mode = #tpu.pipeline_mode<synchronous>, transform_indices = @transform_4, window_bounds = array<i64: 6, 1>}, {pipeline_mode = #tpu.pipeline_mode<synchronous>, transform_indices = @transform_5, window_bounds = array<i64: 3, 6>}, {pipeline_mode = #tpu.pipeline_mode<synchronous>, transform_indices = @transform_6, window_bounds = array<i64: 3, 1>}, {transform_indices = @transform_7, window_bounds = array<i64: 3, 128>}]} {
    %c0 = arith.constant 0 : index
    %c0_0 = arith.constant 0 : index
    %0 = vector.load %arg2[%c0, %c0_0] : memref<16x36xf32, #tpu.memory_space<vmem>>, vector<16x36xf32>
    %c0_1 = arith.constant 0 : index
    %c0_2 = arith.constant 0 : index
    %1 = vector.load %arg3[%c0_1, %c0_2] : memref<16x1xf32, #tpu.memory_space<vmem>>, vector<16x1xf32>
    %c0_3 = arith.constant 0 : index
    %c0_4 = arith.constant 0 : index
    %c0_5 = arith.constant 0 : index
    %2 = vector.load %arg1[%c0_3, %c0_4, %c0_5] : memref<16x36x128xf32, #tpu.memory_space<vmem>>, vector<1x36x128xf32>
    %3 = vector.shape_cast %2 : vector<1x36x128xf32> to vector<36x128xf32>
    %cst = arith.constant dense<0.000000e+00> : vector<16x128xf32>
    %4 = tpu.matmul %0, %3, %cst {dimension_numbers = #tpu.dot_dimension_numbers<[1], [0], [0], [1], [0, 0, 1, 1], [], []>} : vector<16x36xf32>, vector<36x128xf32>, vector<16x128xf32> -> vector<16x128xf32>
    %5 = vector.broadcast %1 : vector<16x1xf32> to vector<16x128xf32>
    %6 = arith.addf %4, %5 : vector<16x128xf32>
    %cst_6 = arith.constant 0.000000e+00 : f32
    %7 = vector.broadcast %cst_6 : f32 to vector<16x128xf32>
    %8 = arith.cmpf oge, %6, %7 : vector<16x128xf32>
    %cst_7 = arith.constant 1.000000e-01 : f32
    %9 = vector.broadcast %cst_7 : f32 to vector<16x128xf32>
    %10 = arith.mulf %9, %6 : vector<16x128xf32>
    %11 = arith.select %8, %6, %10 : vector<16x128xi1>, vector<16x128xf32>
    %c0_8 = arith.constant 0 : index
    %c0_9 = arith.constant 0 : index
    %c0_10 = arith.constant 0 : index
    %12 = vector.load %arg4[%c0_8, %c0_9, %c0_10] : memref<16x6x16xf32, #tpu.memory_space<vmem>>, vector<1x6x16xf32>
    %13 = vector.shape_cast %12 : vector<1x6x16xf32> to vector<6x16xf32>
    %cst_11 = arith.constant dense<0.000000e+00> : vector<6x128xf32>
    %14 = tpu.matmul %13, %11, %cst_11 {dimension_numbers = #tpu.dot_dimension_numbers<[1], [0], [0], [1], [0, 0, 1, 1], [], []>} : vector<6x16xf32>, vector<16x128xf32>, vector<6x128xf32> -> vector<6x128xf32>
    %c1 = arith.constant 1 : index
    %c0_12 = arith.constant 0 : index
    %c0_13 = arith.constant 0 : index
    %15 = vector.load %arg1[%c1, %c0_12, %c0_13] : memref<16x36x128xf32, #tpu.memory_space<vmem>>, vector<1x36x128xf32>
    %16 = vector.shape_cast %15 : vector<1x36x128xf32> to vector<36x128xf32>
    %cst_14 = arith.constant dense<0.000000e+00> : vector<16x128xf32>
    %17 = tpu.matmul %0, %16, %cst_14 {dimension_numbers = #tpu.dot_dimension_numbers<[1], [0], [0], [1], [0, 0, 1, 1], [], []>} : vector<16x36xf32>, vector<36x128xf32>, vector<16x128xf32> -> vector<16x128xf32>
    %18 = vector.broadcast %1 : vector<16x1xf32> to vector<16x128xf32>
    %19 = arith.addf %17, %18 : vector<16x128xf32>
    %cst_15 = arith.constant 0.000000e+00 : f32
    %20 = vector.broadcast %cst_15 : f32 to vector<16x128xf32>
    %21 = arith.cmpf oge, %19, %20 : vector<16x128xf32>
    %cst_16 = arith.constant 1.000000e-01 : f32
    %22 = vector.broadcast %cst_16 : f32 to vector<16x128xf32>
    %23 = arith.mulf %22, %19 : vector<16x128xf32>
    %24 = arith.select %21, %19, %23 : vector<16x128xi1>, vector<16x128xf32>
    %c1_17 = arith.constant 1 : index
    %c0_18 = arith.constant 0 : index
    %c0_19 = arith.constant 0 : index
    %25 = vector.load %arg4[%c1_17, %c0_18, %c0_19] : memref<16x6x16xf32, #tpu.memory_space<vmem>>, vector<1x6x16xf32>
    %26 = vector.shape_cast %25 : vector<1x6x16xf32> to vector<6x16xf32>
    %cst_20 = arith.constant dense<0.000000e+00> : vector<6x128xf32>
    %27 = tpu.matmul %26, %24, %cst_20 {dimension_numbers = #tpu.dot_dimension_numbers<[1], [0], [0], [1], [0, 0, 1, 1], [], []>} : vector<6x16xf32>, vector<16x128xf32>, vector<6x128xf32> -> vector<6x128xf32>
    %28 = arith.addf %14, %27 : vector<6x128xf32>
    %c2 = arith.constant 2 : index
    %c0_21 = arith.constant 0 : index
    %c0_22 = arith.constant 0 : index
    %29 = vector.load %arg1[%c2, %c0_21, %c0_22] : memref<16x36x128xf32, #tpu.memory_space<vmem>>, vector<1x36x128xf32>
    %30 = vector.shape_cast %29 : vector<1x36x128xf32> to vector<36x128xf32>
    %cst_23 = arith.constant dense<0.000000e+00> : vector<16x128xf32>
    %31 = tpu.matmul %0, %30, %cst_23 {dimension_numbers = #tpu.dot_dimension_numbers<[1], [0], [0], [1], [0, 0, 1, 1], [], []>} : vector<16x36xf32>, vector<36x128xf32>, vector<16x128xf32> -> vector<16x128xf32>
    %32 = vector.broadcast %1 : vector<16x1xf32> to vector<16x128xf32>
    %33 = arith.addf %31, %32 : vector<16x128xf32>
    %cst_24 = arith.constant 0.000000e+00 : f32
    %34 = vector.broadcast %cst_24 : f32 to vector<16x128xf32>
    %35 = arith.cmpf oge, %33, %34 : vector<16x128xf32>
    %cst_25 = arith.constant 1.000000e-01 : f32
    %36 = vector.broadcast %cst_25 : f32 to vector<16x128xf32>
    %37 = arith.mulf %36, %33 : vector<16x128xf32>
    %38 = arith.select %35, %33, %37 : vector<16x128xi1>, vector<16x128xf32>
    %c2_26 = arith.constant 2 : index
    %c0_27 = arith.constant 0 : index
    %c0_28 = arith.constant 0 : index
    %39 = vector.load %arg4[%c2_26, %c0_27, %c0_28] : memref<16x6x16xf32, #tpu.memory_space<vmem>>, vector<1x6x16xf32>
    %40 = vector.shape_cast %39 : vector<1x6x16xf32> to vector<6x16xf32>
    %cst_29 = arith.constant dense<0.000000e+00> : vector<6x128xf32>
    %41 = tpu.matmul %40, %38, %cst_29 {dimension_numbers = #tpu.dot_dimension_numbers<[1], [0], [0], [1], [0, 0, 1, 1], [], []>} : vector<6x16xf32>, vector<16x128xf32>, vector<6x128xf32> -> vector<6x128xf32>
    %42 = arith.addf %28, %41 : vector<6x128xf32>
    %c3 = arith.constant 3 : index
    %c0_30 = arith.constant 0 : index
    %c0_31 = arith.constant 0 : index
    %43 = vector.load %arg1[%c3, %c0_30, %c0_31] : memref<16x36x128xf32, #tpu.memory_space<vmem>>, vector<1x36x128xf32>
    %44 = vector.shape_cast %43 : vector<1x36x128xf32> to vector<36x128xf32>
    %cst_32 = arith.constant dense<0.000000e+00> : vector<16x128xf32>
    %45 = tpu.matmul %0, %44, %cst_32 {dimension_numbers = #tpu.dot_dimension_numbers<[1], [0], [0], [1], [0, 0, 1, 1], [], []>} : vector<16x36xf32>, vector<36x128xf32>, vector<16x128xf32> -> vector<16x128xf32>
    %46 = vector.broadcast %1 : vector<16x1xf32> to vector<16x128xf32>
    %47 = arith.addf %45, %46 : vector<16x128xf32>
    %cst_33 = arith.constant 0.000000e+00 : f32
    %48 = vector.broadcast %cst_33 : f32 to vector<16x128xf32>
    %49 = arith.cmpf oge, %47, %48 : vector<16x128xf32>
    %cst_34 = arith.constant 1.000000e-01 : f32
    %50 = vector.broadcast %cst_34 : f32 to vector<16x128xf32>
    %51 = arith.mulf %50, %47 : vector<16x128xf32>
    %52 = arith.select %49, %47, %51 : vector<16x128xi1>, vector<16x128xf32>
    %c3_35 = arith.constant 3 : index
    %c0_36 = arith.constant 0 : index
    %c0_37 = arith.constant 0 : index
    %53 = vector.load %arg4[%c3_35, %c0_36, %c0_37] : memref<16x6x16xf32, #tpu.memory_space<vmem>>, vector<1x6x16xf32>
    %54 = vector.shape_cast %53 : vector<1x6x16xf32> to vector<6x16xf32>
    %cst_38 = arith.constant dense<0.000000e+00> : vector<6x128xf32>
    %55 = tpu.matmul %54, %52, %cst_38 {dimension_numbers = #tpu.dot_dimension_numbers<[1], [0], [0], [1], [0, 0, 1, 1], [], []>} : vector<6x16xf32>, vector<16x128xf32>, vector<6x128xf32> -> vector<6x128xf32>
    %56 = arith.addf %42, %55 : vector<6x128xf32>
    %c4 = arith.constant 4 : index
    %c0_39 = arith.constant 0 : index
    %c0_40 = arith.constant 0 : index
    %57 = vector.load %arg1[%c4, %c0_39, %c0_40] : memref<16x36x128xf32, #tpu.memory_space<vmem>>, vector<1x36x128xf32>
    %58 = vector.shape_cast %57 : vector<1x36x128xf32> to vector<36x128xf32>
    %cst_41 = arith.constant dense<0.000000e+00> : vector<16x128xf32>
    %59 = tpu.matmul %0, %58, %cst_41 {dimension_numbers = #tpu.dot_dimension_numbers<[1], [0], [0], [1], [0, 0, 1, 1], [], []>} : vector<16x36xf32>, vector<36x128xf32>, vector<16x128xf32> -> vector<16x128xf32>
    %60 = vector.broadcast %1 : vector<16x1xf32> to vector<16x128xf32>
    %61 = arith.addf %59, %60 : vector<16x128xf32>
    %cst_42 = arith.constant 0.000000e+00 : f32
    %62 = vector.broadcast %cst_42 : f32 to vector<16x128xf32>
    %63 = arith.cmpf oge, %61, %62 : vector<16x128xf32>
    %cst_43 = arith.constant 1.000000e-01 : f32
    %64 = vector.broadcast %cst_43 : f32 to vector<16x128xf32>
    %65 = arith.mulf %64, %61 : vector<16x128xf32>
    %66 = arith.select %63, %61, %65 : vector<16x128xi1>, vector<16x128xf32>
    %c4_44 = arith.constant 4 : index
    %c0_45 = arith.constant 0 : index
    %c0_46 = arith.constant 0 : index
    %67 = vector.load %arg4[%c4_44, %c0_45, %c0_46] : memref<16x6x16xf32, #tpu.memory_space<vmem>>, vector<1x6x16xf32>
    %68 = vector.shape_cast %67 : vector<1x6x16xf32> to vector<6x16xf32>
    %cst_47 = arith.constant dense<0.000000e+00> : vector<6x128xf32>
    %69 = tpu.matmul %68, %66, %cst_47 {dimension_numbers = #tpu.dot_dimension_numbers<[1], [0], [0], [1], [0, 0, 1, 1], [], []>} : vector<6x16xf32>, vector<16x128xf32>, vector<6x128xf32> -> vector<6x128xf32>
    %70 = arith.addf %56, %69 : vector<6x128xf32>
    %c5 = arith.constant 5 : index
    %c0_48 = arith.constant 0 : index
    %c0_49 = arith.constant 0 : index
    %71 = vector.load %arg1[%c5, %c0_48, %c0_49] : memref<16x36x128xf32, #tpu.memory_space<vmem>>, vector<1x36x128xf32>
    %72 = vector.shape_cast %71 : vector<1x36x128xf32> to vector<36x128xf32>
    %cst_50 = arith.constant dense<0.000000e+00> : vector<16x128xf32>
    %73 = tpu.matmul %0, %72, %cst_50 {dimension_numbers = #tpu.dot_dimension_numbers<[1], [0], [0], [1], [0, 0, 1, 1], [], []>} : vector<16x36xf32>, vector<36x128xf32>, vector<16x128xf32> -> vector<16x128xf32>
    %74 = vector.broadcast %1 : vector<16x1xf32> to vector<16x128xf32>
    %75 = arith.addf %73, %74 : vector<16x128xf32>
    %cst_51 = arith.constant 0.000000e+00 : f32
    %76 = vector.broadcast %cst_51 : f32 to vector<16x128xf32>
    %77 = arith.cmpf oge, %75, %76 : vector<16x128xf32>
    %cst_52 = arith.constant 1.000000e-01 : f32
    %78 = vector.broadcast %cst_52 : f32 to vector<16x128xf32>
    %79 = arith.mulf %78, %75 : vector<16x128xf32>
    %80 = arith.select %77, %75, %79 : vector<16x128xi1>, vector<16x128xf32>
    %c5_53 = arith.constant 5 : index
    %c0_54 = arith.constant 0 : index
    %c0_55 = arith.constant 0 : index
    %81 = vector.load %arg4[%c5_53, %c0_54, %c0_55] : memref<16x6x16xf32, #tpu.memory_space<vmem>>, vector<1x6x16xf32>
    %82 = vector.shape_cast %81 : vector<1x6x16xf32> to vector<6x16xf32>
    %cst_56 = arith.constant dense<0.000000e+00> : vector<6x128xf32>
    %83 = tpu.matmul %82, %80, %cst_56 {dimension_numbers = #tpu.dot_dimension_numbers<[1], [0], [0], [1], [0, 0, 1, 1], [], []>} : vector<6x16xf32>, vector<16x128xf32>, vector<6x128xf32> -> vector<6x128xf32>
    %84 = arith.addf %70, %83 : vector<6x128xf32>
    %c6 = arith.constant 6 : index
    %c0_57 = arith.constant 0 : index
    %c0_58 = arith.constant 0 : index
    %85 = vector.load %arg1[%c6, %c0_57, %c0_58] : memref<16x36x128xf32, #tpu.memory_space<vmem>>, vector<1x36x128xf32>
    %86 = vector.shape_cast %85 : vector<1x36x128xf32> to vector<36x128xf32>
    %cst_59 = arith.constant dense<0.000000e+00> : vector<16x128xf32>
    %87 = tpu.matmul %0, %86, %cst_59 {dimension_numbers = #tpu.dot_dimension_numbers<[1], [0], [0], [1], [0, 0, 1, 1], [], []>} : vector<16x36xf32>, vector<36x128xf32>, vector<16x128xf32> -> vector<16x128xf32>
    %88 = vector.broadcast %1 : vector<16x1xf32> to vector<16x128xf32>
    %89 = arith.addf %87, %88 : vector<16x128xf32>
    %cst_60 = arith.constant 0.000000e+00 : f32
    %90 = vector.broadcast %cst_60 : f32 to vector<16x128xf32>
    %91 = arith.cmpf oge, %89, %90 : vector<16x128xf32>
    %cst_61 = arith.constant 1.000000e-01 : f32
    %92 = vector.broadcast %cst_61 : f32 to vector<16x128xf32>
    %93 = arith.mulf %92, %89 : vector<16x128xf32>
    %94 = arith.select %91, %89, %93 : vector<16x128xi1>, vector<16x128xf32>
    %c6_62 = arith.constant 6 : index
    %c0_63 = arith.constant 0 : index
    %c0_64 = arith.constant 0 : index
    %95 = vector.load %arg4[%c6_62, %c0_63, %c0_64] : memref<16x6x16xf32, #tpu.memory_space<vmem>>, vector<1x6x16xf32>
    %96 = vector.shape_cast %95 : vector<1x6x16xf32> to vector<6x16xf32>
    %cst_65 = arith.constant dense<0.000000e+00> : vector<6x128xf32>
    %97 = tpu.matmul %96, %94, %cst_65 {dimension_numbers = #tpu.dot_dimension_numbers<[1], [0], [0], [1], [0, 0, 1, 1], [], []>} : vector<6x16xf32>, vector<16x128xf32>, vector<6x128xf32> -> vector<6x128xf32>
    %98 = arith.addf %84, %97 : vector<6x128xf32>
    %c7 = arith.constant 7 : index
    %c0_66 = arith.constant 0 : index
    %c0_67 = arith.constant 0 : index
    %99 = vector.load %arg1[%c7, %c0_66, %c0_67] : memref<16x36x128xf32, #tpu.memory_space<vmem>>, vector<1x36x128xf32>
    %100 = vector.shape_cast %99 : vector<1x36x128xf32> to vector<36x128xf32>
    %cst_68 = arith.constant dense<0.000000e+00> : vector<16x128xf32>
    %101 = tpu.matmul %0, %100, %cst_68 {dimension_numbers = #tpu.dot_dimension_numbers<[1], [0], [0], [1], [0, 0, 1, 1], [], []>} : vector<16x36xf32>, vector<36x128xf32>, vector<16x128xf32> -> vector<16x128xf32>
    %102 = vector.broadcast %1 : vector<16x1xf32> to vector<16x128xf32>
    %103 = arith.addf %101, %102 : vector<16x128xf32>
    %cst_69 = arith.constant 0.000000e+00 : f32
    %104 = vector.broadcast %cst_69 : f32 to vector<16x128xf32>
    %105 = arith.cmpf oge, %103, %104 : vector<16x128xf32>
    %cst_70 = arith.constant 1.000000e-01 : f32
    %106 = vector.broadcast %cst_70 : f32 to vector<16x128xf32>
    %107 = arith.mulf %106, %103 : vector<16x128xf32>
    %108 = arith.select %105, %103, %107 : vector<16x128xi1>, vector<16x128xf32>
    %c7_71 = arith.constant 7 : index
    %c0_72 = arith.constant 0 : index
    %c0_73 = arith.constant 0 : index
    %109 = vector.load %arg4[%c7_71, %c0_72, %c0_73] : memref<16x6x16xf32, #tpu.memory_space<vmem>>, vector<1x6x16xf32>
    %110 = vector.shape_cast %109 : vector<1x6x16xf32> to vector<6x16xf32>
    %cst_74 = arith.constant dense<0.000000e+00> : vector<6x128xf32>
    %111 = tpu.matmul %110, %108, %cst_74 {dimension_numbers = #tpu.dot_dimension_numbers<[1], [0], [0], [1], [0, 0, 1, 1], [], []>} : vector<6x16xf32>, vector<16x128xf32>, vector<6x128xf32> -> vector<6x128xf32>
    %112 = arith.addf %98, %111 : vector<6x128xf32>
    %c8 = arith.constant 8 : index
    %c0_75 = arith.constant 0 : index
    %c0_76 = arith.constant 0 : index
    %113 = vector.load %arg1[%c8, %c0_75, %c0_76] : memref<16x36x128xf32, #tpu.memory_space<vmem>>, vector<1x36x128xf32>
    %114 = vector.shape_cast %113 : vector<1x36x128xf32> to vector<36x128xf32>
    %cst_77 = arith.constant dense<0.000000e+00> : vector<16x128xf32>
    %115 = tpu.matmul %0, %114, %cst_77 {dimension_numbers = #tpu.dot_dimension_numbers<[1], [0], [0], [1], [0, 0, 1, 1], [], []>} : vector<16x36xf32>, vector<36x128xf32>, vector<16x128xf32> -> vector<16x128xf32>
    %116 = vector.broadcast %1 : vector<16x1xf32> to vector<16x128xf32>
    %117 = arith.addf %115, %116 : vector<16x128xf32>
    %cst_78 = arith.constant 0.000000e+00 : f32
    %118 = vector.broadcast %cst_78 : f32 to vector<16x128xf32>
    %119 = arith.cmpf oge, %117, %118 : vector<16x128xf32>
    %cst_79 = arith.constant 1.000000e-01 : f32
    %120 = vector.broadcast %cst_79 : f32 to vector<16x128xf32>
    %121 = arith.mulf %120, %117 : vector<16x128xf32>
    %122 = arith.select %119, %117, %121 : vector<16x128xi1>, vector<16x128xf32>
    %c8_80 = arith.constant 8 : index
    %c0_81 = arith.constant 0 : index
    %c0_82 = arith.constant 0 : index
    %123 = vector.load %arg4[%c8_80, %c0_81, %c0_82] : memref<16x6x16xf32, #tpu.memory_space<vmem>>, vector<1x6x16xf32>
    %124 = vector.shape_cast %123 : vector<1x6x16xf32> to vector<6x16xf32>
    %cst_83 = arith.constant dense<0.000000e+00> : vector<6x128xf32>
    %125 = tpu.matmul %124, %122, %cst_83 {dimension_numbers = #tpu.dot_dimension_numbers<[1], [0], [0], [1], [0, 0, 1, 1], [], []>} : vector<6x16xf32>, vector<16x128xf32>, vector<6x128xf32> -> vector<6x128xf32>
    %126 = arith.addf %112, %125 : vector<6x128xf32>
    %c9 = arith.constant 9 : index
    %c0_84 = arith.constant 0 : index
    %c0_85 = arith.constant 0 : index
    %127 = vector.load %arg1[%c9, %c0_84, %c0_85] : memref<16x36x128xf32, #tpu.memory_space<vmem>>, vector<1x36x128xf32>
    %128 = vector.shape_cast %127 : vector<1x36x128xf32> to vector<36x128xf32>
    %cst_86 = arith.constant dense<0.000000e+00> : vector<16x128xf32>
    %129 = tpu.matmul %0, %128, %cst_86 {dimension_numbers = #tpu.dot_dimension_numbers<[1], [0], [0], [1], [0, 0, 1, 1], [], []>} : vector<16x36xf32>, vector<36x128xf32>, vector<16x128xf32> -> vector<16x128xf32>
    %130 = vector.broadcast %1 : vector<16x1xf32> to vector<16x128xf32>
    %131 = arith.addf %129, %130 : vector<16x128xf32>
    %cst_87 = arith.constant 0.000000e+00 : f32
    %132 = vector.broadcast %cst_87 : f32 to vector<16x128xf32>
    %133 = arith.cmpf oge, %131, %132 : vector<16x128xf32>
    %cst_88 = arith.constant 1.000000e-01 : f32
    %134 = vector.broadcast %cst_88 : f32 to vector<16x128xf32>
    %135 = arith.mulf %134, %131 : vector<16x128xf32>
    %136 = arith.select %133, %131, %135 : vector<16x128xi1>, vector<16x128xf32>
    %c9_89 = arith.constant 9 : index
    %c0_90 = arith.constant 0 : index
    %c0_91 = arith.constant 0 : index
    %137 = vector.load %arg4[%c9_89, %c0_90, %c0_91] : memref<16x6x16xf32, #tpu.memory_space<vmem>>, vector<1x6x16xf32>
    %138 = vector.shape_cast %137 : vector<1x6x16xf32> to vector<6x16xf32>
    %cst_92 = arith.constant dense<0.000000e+00> : vector<6x128xf32>
    %139 = tpu.matmul %138, %136, %cst_92 {dimension_numbers = #tpu.dot_dimension_numbers<[1], [0], [0], [1], [0, 0, 1, 1], [], []>} : vector<6x16xf32>, vector<16x128xf32>, vector<6x128xf32> -> vector<6x128xf32>
    %140 = arith.addf %126, %139 : vector<6x128xf32>
    %c10 = arith.constant 10 : index
    %c0_93 = arith.constant 0 : index
    %c0_94 = arith.constant 0 : index
    %141 = vector.load %arg1[%c10, %c0_93, %c0_94] : memref<16x36x128xf32, #tpu.memory_space<vmem>>, vector<1x36x128xf32>
    %142 = vector.shape_cast %141 : vector<1x36x128xf32> to vector<36x128xf32>
    %cst_95 = arith.constant dense<0.000000e+00> : vector<16x128xf32>
    %143 = tpu.matmul %0, %142, %cst_95 {dimension_numbers = #tpu.dot_dimension_numbers<[1], [0], [0], [1], [0, 0, 1, 1], [], []>} : vector<16x36xf32>, vector<36x128xf32>, vector<16x128xf32> -> vector<16x128xf32>
    %144 = vector.broadcast %1 : vector<16x1xf32> to vector<16x128xf32>
    %145 = arith.addf %143, %144 : vector<16x128xf32>
    %cst_96 = arith.constant 0.000000e+00 : f32
    %146 = vector.broadcast %cst_96 : f32 to vector<16x128xf32>
    %147 = arith.cmpf oge, %145, %146 : vector<16x128xf32>
    %cst_97 = arith.constant 1.000000e-01 : f32
    %148 = vector.broadcast %cst_97 : f32 to vector<16x128xf32>
    %149 = arith.mulf %148, %145 : vector<16x128xf32>
    %150 = arith.select %147, %145, %149 : vector<16x128xi1>, vector<16x128xf32>
    %c10_98 = arith.constant 10 : index
    %c0_99 = arith.constant 0 : index
    %c0_100 = arith.constant 0 : index
    %151 = vector.load %arg4[%c10_98, %c0_99, %c0_100] : memref<16x6x16xf32, #tpu.memory_space<vmem>>, vector<1x6x16xf32>
    %152 = vector.shape_cast %151 : vector<1x6x16xf32> to vector<6x16xf32>
    %cst_101 = arith.constant dense<0.000000e+00> : vector<6x128xf32>
    %153 = tpu.matmul %152, %150, %cst_101 {dimension_numbers = #tpu.dot_dimension_numbers<[1], [0], [0], [1], [0, 0, 1, 1], [], []>} : vector<6x16xf32>, vector<16x128xf32>, vector<6x128xf32> -> vector<6x128xf32>
    %154 = arith.addf %140, %153 : vector<6x128xf32>
    %c11 = arith.constant 11 : index
    %c0_102 = arith.constant 0 : index
    %c0_103 = arith.constant 0 : index
    %155 = vector.load %arg1[%c11, %c0_102, %c0_103] : memref<16x36x128xf32, #tpu.memory_space<vmem>>, vector<1x36x128xf32>
    %156 = vector.shape_cast %155 : vector<1x36x128xf32> to vector<36x128xf32>
    %cst_104 = arith.constant dense<0.000000e+00> : vector<16x128xf32>
    %157 = tpu.matmul %0, %156, %cst_104 {dimension_numbers = #tpu.dot_dimension_numbers<[1], [0], [0], [1], [0, 0, 1, 1], [], []>} : vector<16x36xf32>, vector<36x128xf32>, vector<16x128xf32> -> vector<16x128xf32>
    %158 = vector.broadcast %1 : vector<16x1xf32> to vector<16x128xf32>
    %159 = arith.addf %157, %158 : vector<16x128xf32>
    %cst_105 = arith.constant 0.000000e+00 : f32
    %160 = vector.broadcast %cst_105 : f32 to vector<16x128xf32>
    %161 = arith.cmpf oge, %159, %160 : vector<16x128xf32>
    %cst_106 = arith.constant 1.000000e-01 : f32
    %162 = vector.broadcast %cst_106 : f32 to vector<16x128xf32>
    %163 = arith.mulf %162, %159 : vector<16x128xf32>
    %164 = arith.select %161, %159, %163 : vector<16x128xi1>, vector<16x128xf32>
    %c11_107 = arith.constant 11 : index
    %c0_108 = arith.constant 0 : index
    %c0_109 = arith.constant 0 : index
    %165 = vector.load %arg4[%c11_107, %c0_108, %c0_109] : memref<16x6x16xf32, #tpu.memory_space<vmem>>, vector<1x6x16xf32>
    %166 = vector.shape_cast %165 : vector<1x6x16xf32> to vector<6x16xf32>
    %cst_110 = arith.constant dense<0.000000e+00> : vector<6x128xf32>
    %167 = tpu.matmul %166, %164, %cst_110 {dimension_numbers = #tpu.dot_dimension_numbers<[1], [0], [0], [1], [0, 0, 1, 1], [], []>} : vector<6x16xf32>, vector<16x128xf32>, vector<6x128xf32> -> vector<6x128xf32>
    %168 = arith.addf %154, %167 : vector<6x128xf32>
    %c12 = arith.constant 12 : index
    %c0_111 = arith.constant 0 : index
    %c0_112 = arith.constant 0 : index
    %169 = vector.load %arg1[%c12, %c0_111, %c0_112] : memref<16x36x128xf32, #tpu.memory_space<vmem>>, vector<1x36x128xf32>
    %170 = vector.shape_cast %169 : vector<1x36x128xf32> to vector<36x128xf32>
    %cst_113 = arith.constant dense<0.000000e+00> : vector<16x128xf32>
    %171 = tpu.matmul %0, %170, %cst_113 {dimension_numbers = #tpu.dot_dimension_numbers<[1], [0], [0], [1], [0, 0, 1, 1], [], []>} : vector<16x36xf32>, vector<36x128xf32>, vector<16x128xf32> -> vector<16x128xf32>
    %172 = vector.broadcast %1 : vector<16x1xf32> to vector<16x128xf32>
    %173 = arith.addf %171, %172 : vector<16x128xf32>
    %cst_114 = arith.constant 0.000000e+00 : f32
    %174 = vector.broadcast %cst_114 : f32 to vector<16x128xf32>
    %175 = arith.cmpf oge, %173, %174 : vector<16x128xf32>
    %cst_115 = arith.constant 1.000000e-01 : f32
    %176 = vector.broadcast %cst_115 : f32 to vector<16x128xf32>
    %177 = arith.mulf %176, %173 : vector<16x128xf32>
    %178 = arith.select %175, %173, %177 : vector<16x128xi1>, vector<16x128xf32>
    %c12_116 = arith.constant 12 : index
    %c0_117 = arith.constant 0 : index
    %c0_118 = arith.constant 0 : index
    %179 = vector.load %arg4[%c12_116, %c0_117, %c0_118] : memref<16x6x16xf32, #tpu.memory_space<vmem>>, vector<1x6x16xf32>
    %180 = vector.shape_cast %179 : vector<1x6x16xf32> to vector<6x16xf32>
    %cst_119 = arith.constant dense<0.000000e+00> : vector<6x128xf32>
    %181 = tpu.matmul %180, %178, %cst_119 {dimension_numbers = #tpu.dot_dimension_numbers<[1], [0], [0], [1], [0, 0, 1, 1], [], []>} : vector<6x16xf32>, vector<16x128xf32>, vector<6x128xf32> -> vector<6x128xf32>
    %182 = arith.addf %168, %181 : vector<6x128xf32>
    %c13 = arith.constant 13 : index
    %c0_120 = arith.constant 0 : index
    %c0_121 = arith.constant 0 : index
    %183 = vector.load %arg1[%c13, %c0_120, %c0_121] : memref<16x36x128xf32, #tpu.memory_space<vmem>>, vector<1x36x128xf32>
    %184 = vector.shape_cast %183 : vector<1x36x128xf32> to vector<36x128xf32>
    %cst_122 = arith.constant dense<0.000000e+00> : vector<16x128xf32>
    %185 = tpu.matmul %0, %184, %cst_122 {dimension_numbers = #tpu.dot_dimension_numbers<[1], [0], [0], [1], [0, 0, 1, 1], [], []>} : vector<16x36xf32>, vector<36x128xf32>, vector<16x128xf32> -> vector<16x128xf32>
    %186 = vector.broadcast %1 : vector<16x1xf32> to vector<16x128xf32>
    %187 = arith.addf %185, %186 : vector<16x128xf32>
    %cst_123 = arith.constant 0.000000e+00 : f32
    %188 = vector.broadcast %cst_123 : f32 to vector<16x128xf32>
    %189 = arith.cmpf oge, %187, %188 : vector<16x128xf32>
    %cst_124 = arith.constant 1.000000e-01 : f32
    %190 = vector.broadcast %cst_124 : f32 to vector<16x128xf32>
    %191 = arith.mulf %190, %187 : vector<16x128xf32>
    %192 = arith.select %189, %187, %191 : vector<16x128xi1>, vector<16x128xf32>
    %c13_125 = arith.constant 13 : index
    %c0_126 = arith.constant 0 : index
    %c0_127 = arith.constant 0 : index
    %193 = vector.load %arg4[%c13_125, %c0_126, %c0_127] : memref<16x6x16xf32, #tpu.memory_space<vmem>>, vector<1x6x16xf32>
    %194 = vector.shape_cast %193 : vector<1x6x16xf32> to vector<6x16xf32>
    %cst_128 = arith.constant dense<0.000000e+00> : vector<6x128xf32>
    %195 = tpu.matmul %194, %192, %cst_128 {dimension_numbers = #tpu.dot_dimension_numbers<[1], [0], [0], [1], [0, 0, 1, 1], [], []>} : vector<6x16xf32>, vector<16x128xf32>, vector<6x128xf32> -> vector<6x128xf32>
    %196 = arith.addf %182, %195 : vector<6x128xf32>
    %c14 = arith.constant 14 : index
    %c0_129 = arith.constant 0 : index
    %c0_130 = arith.constant 0 : index
    %197 = vector.load %arg1[%c14, %c0_129, %c0_130] : memref<16x36x128xf32, #tpu.memory_space<vmem>>, vector<1x36x128xf32>
    %198 = vector.shape_cast %197 : vector<1x36x128xf32> to vector<36x128xf32>
    %cst_131 = arith.constant dense<0.000000e+00> : vector<16x128xf32>
    %199 = tpu.matmul %0, %198, %cst_131 {dimension_numbers = #tpu.dot_dimension_numbers<[1], [0], [0], [1], [0, 0, 1, 1], [], []>} : vector<16x36xf32>, vector<36x128xf32>, vector<16x128xf32> -> vector<16x128xf32>
    %200 = vector.broadcast %1 : vector<16x1xf32> to vector<16x128xf32>
    %201 = arith.addf %199, %200 : vector<16x128xf32>
    %cst_132 = arith.constant 0.000000e+00 : f32
    %202 = vector.broadcast %cst_132 : f32 to vector<16x128xf32>
    %203 = arith.cmpf oge, %201, %202 : vector<16x128xf32>
    %cst_133 = arith.constant 1.000000e-01 : f32
    %204 = vector.broadcast %cst_133 : f32 to vector<16x128xf32>
    %205 = arith.mulf %204, %201 : vector<16x128xf32>
    %206 = arith.select %203, %201, %205 : vector<16x128xi1>, vector<16x128xf32>
    %c14_134 = arith.constant 14 : index
    %c0_135 = arith.constant 0 : index
    %c0_136 = arith.constant 0 : index
    %207 = vector.load %arg4[%c14_134, %c0_135, %c0_136] : memref<16x6x16xf32, #tpu.memory_space<vmem>>, vector<1x6x16xf32>
    %208 = vector.shape_cast %207 : vector<1x6x16xf32> to vector<6x16xf32>
    %cst_137 = arith.constant dense<0.000000e+00> : vector<6x128xf32>
    %209 = tpu.matmul %208, %206, %cst_137 {dimension_numbers = #tpu.dot_dimension_numbers<[1], [0], [0], [1], [0, 0, 1, 1], [], []>} : vector<6x16xf32>, vector<16x128xf32>, vector<6x128xf32> -> vector<6x128xf32>
    %210 = arith.addf %196, %209 : vector<6x128xf32>
    %c15 = arith.constant 15 : index
    %c0_138 = arith.constant 0 : index
    %c0_139 = arith.constant 0 : index
    %211 = vector.load %arg1[%c15, %c0_138, %c0_139] : memref<16x36x128xf32, #tpu.memory_space<vmem>>, vector<1x36x128xf32>
    %212 = vector.shape_cast %211 : vector<1x36x128xf32> to vector<36x128xf32>
    %cst_140 = arith.constant dense<0.000000e+00> : vector<16x128xf32>
    %213 = tpu.matmul %0, %212, %cst_140 {dimension_numbers = #tpu.dot_dimension_numbers<[1], [0], [0], [1], [0, 0, 1, 1], [], []>} : vector<16x36xf32>, vector<36x128xf32>, vector<16x128xf32> -> vector<16x128xf32>
    %214 = vector.broadcast %1 : vector<16x1xf32> to vector<16x128xf32>
    %215 = arith.addf %213, %214 : vector<16x128xf32>
    %cst_141 = arith.constant 0.000000e+00 : f32
    %216 = vector.broadcast %cst_141 : f32 to vector<16x128xf32>
    %217 = arith.cmpf oge, %215, %216 : vector<16x128xf32>
    %cst_142 = arith.constant 1.000000e-01 : f32
    %218 = vector.broadcast %cst_142 : f32 to vector<16x128xf32>
    %219 = arith.mulf %218, %215 : vector<16x128xf32>
    %220 = arith.select %217, %215, %219 : vector<16x128xi1>, vector<16x128xf32>
    %c15_143 = arith.constant 15 : index
    %c0_144 = arith.constant 0 : index
    %c0_145 = arith.constant 0 : index
    %221 = vector.load %arg4[%c15_143, %c0_144, %c0_145] : memref<16x6x16xf32, #tpu.memory_space<vmem>>, vector<1x6x16xf32>
    %222 = vector.shape_cast %221 : vector<1x6x16xf32> to vector<6x16xf32>
    %cst_146 = arith.constant dense<0.000000e+00> : vector<6x128xf32>
    %223 = tpu.matmul %222, %220, %cst_146 {dimension_numbers = #tpu.dot_dimension_numbers<[1], [0], [0], [1], [0, 0, 1, 1], [], []>} : vector<6x16xf32>, vector<16x128xf32>, vector<6x128xf32> -> vector<6x128xf32>
    %224 = arith.addf %210, %223 : vector<6x128xf32>
    %c0_147 = arith.constant 0 : index
    %c0_148 = arith.constant 0 : index
    %225 = vector.load %arg5[%c0_147, %c0_148] : memref<6x1xf32, #tpu.memory_space<vmem>>, vector<6x1xf32>
    %226 = vector.broadcast %225 : vector<6x1xf32> to vector<6x128xf32>
    %227 = arith.addf %224, %226 : vector<6x128xf32>
    %cst_149 = arith.constant 0.000000e+00 : f32
    %228 = vector.broadcast %cst_149 : f32 to vector<6x128xf32>
    %229 = arith.cmpf oge, %227, %228 : vector<6x128xf32>
    %cst_150 = arith.constant 1.000000e-01 : f32
    %230 = vector.broadcast %cst_150 : f32 to vector<6x128xf32>
    %231 = arith.mulf %230, %227 : vector<6x128xf32>
    %232 = arith.select %229, %227, %231 : vector<6x128xi1>, vector<6x128xf32>
    %c0_151 = arith.constant 0 : index
    %c0_152 = arith.constant 0 : index
    %233 = vector.load %arg6[%c0_151, %c0_152] : memref<3x6xf32, #tpu.memory_space<vmem>>, vector<3x6xf32>
    %cst_153 = arith.constant dense<0.000000e+00> : vector<3x128xf32>
    %234 = tpu.matmul %233, %232, %cst_153 {dimension_numbers = #tpu.dot_dimension_numbers<[1], [0], [0], [1], [0, 0, 1, 1], [], []>} : vector<3x6xf32>, vector<6x128xf32>, vector<3x128xf32> -> vector<3x128xf32>
    %c0_154 = arith.constant 0 : index
    %c0_155 = arith.constant 0 : index
    %235 = vector.load %arg7[%c0_154, %c0_155] : memref<3x1xf32, #tpu.memory_space<vmem>>, vector<3x1xf32>
    %236 = vector.broadcast %235 : vector<3x1xf32> to vector<3x128xf32>
    %237 = arith.addf %234, %236 : vector<3x128xf32>
    %c0_156 = arith.constant 0 : index
    %c0_157 = arith.constant 0 : index
    %238 = vector.load %arg8[%c0_156, %c0_157] : memref<3x128xf32, #tpu.memory_space<vmem>>, vector<3x128xf32>
    tpu.vector_store %arg8[%c0_156, %c0_157], %237 {strides = array<i32>} : memref<3x128xf32, #tpu.memory_space<vmem>>, vector<3x128xf32>,
    return
  }
  func.func @transform_0(%arg0: i32) -> (i32, i32, i32) {
    %c0_i32 = arith.constant 0 : i32
    %c0_i32_0 = arith.constant 0 : i32
    %c0_i32_1 = arith.constant 0 : i32
    return %c0_i32, %c0_i32_0, %arg0 : i32, i32, i32
  }
  func.func @transform_1(%arg0: i32) -> (i32, i32) {
    %c0_i32 = arith.constant 0 : i32
    %c0_i32_0 = arith.constant 0 : i32
    %c0_i32_1 = arith.constant 0 : i32
    return %c0_i32, %c0_i32_0 : i32, i32
  }
  func.func @transform_2(%arg0: i32) -> (i32, i32) {
    %c0_i32 = arith.constant 0 : i32
    %c0_i32_0 = arith.constant 0 : i32
    %c0_i32_1 = arith.constant 0 : i32
    return %c0_i32, %c0_i32_0 : i32, i32
  }
  func.func @transform_3(%arg0: i32) -> (i32, i32, i32) {
    %c0_i32 = arith.constant 0 : i32
    %c0_i32_0 = arith.constant 0 : i32
    %c0_i32_1 = arith.constant 0 : i32
    %c0_i32_2 = arith.constant 0 : i32
    return %c0_i32, %c0_i32_0, %c0_i32_1 : i32, i32, i32
  }
  func.func @transform_4(%arg0: i32) -> (i32, i32) {
    %c0_i32 = arith.constant 0 : i32
    %c0_i32_0 = arith.constant 0 : i32
    %c0_i32_1 = arith.constant 0 : i32
    return %c0_i32, %c0_i32_0 : i32, i32
  }
  func.func @transform_5(%arg0: i32) -> (i32, i32) {
    %c0_i32 = arith.constant 0 : i32
    %c0_i32_0 = arith.constant 0 : i32
    %c0_i32_1 = arith.constant 0 : i32
    return %c0_i32, %c0_i32_0 : i32, i32
  }
  func.func @transform_6(%arg0: i32) -> (i32, i32) {
    %c0_i32 = arith.constant 0 : i32
    %c0_i32_0 = arith.constant 0 : i32
    %c0_i32_1 = arith.constant 0 : i32
    return %c0_i32, %c0_i32_0 : i32, i32
  }
  func.func @transform_7(%arg0: i32) -> (i32, i32) {
    %c0_i32 = arith.constant 0 : i32
    %c0_i32_0 = arith.constant 0 : i32
    return %c0_i32, %arg0 : i32, i32
  }
}

</mosaic_0001>

<bundles_post_ra>
// kernel: net_forward.2
= control target key start
LH: loop header
LB: loop body
LE: loop exit
PB: predicated region body
PF: predicated region fallthrough
CT: control target
= control target key end

     0   :  { %7 = vsyncpa [#allocation3], 0  ;;  %s1217_s12 = smov [#allocation2]   ;;  %s2498_s0 = inlined_call_operand.vmem [shape: f32[2,20], index: 0, kind: input, shape index: {}]   ;;  %s2499_s1 = inlined_call_operand.vmem [shape: f32[32,8,128], index: 1, kind: input, shape index: {}]   ;;  %s2500_s2 = inlined_call_operand.vmem [shape: f32[4,8,128], index: 2, kind: output, shape index: {}]  }
   0x1   :  { %s13_s11 = sshll.u32 %s2498_s0, 4  ;;  %s14_s11 = int_to_ptr.vmem [resolvable:$true] %s13_s11 }
   0x2   :  { %16 = dma.vmem_to_smem %s14_s11, 32, %s1217_s12, [#allocation3]  }
   0x3   :  { %1215 = dma.done.wait [#allocation3], 32  }
   0x4   :  { %1216 = vsyncadd [#allocation3], 4294967264 }
   0x5   :  { %23 = sfence }
   0x6   :  { %v24_v0 = vld [vmem:[%s2499_s1] sm:$0xff]  ;;  %v1131_v2 = vld [vmem:[%s2499_s1 + $0x8] sm:$0xff]  ;;  %v1134_v7 = vld [vmem:[%s2499_s1 + $0x90] sm:$0xff]  ;;  %s1474_s0 = sld [smem:[#allocation2 + $0x81]] }
   0x7   :  { %v1130_v1 = vld [vmem:[%s2499_s1 + $0x80] sm:$0xff]  ;;  %v29_v4 = vmul.f32 0.70710677, %v24_v0  ;;  %v1132_v6 = vld [vmem:[%s2499_s1 + $0x88] sm:$0xff]  ;;  %v1133_v14 = vld [vmem:[%s2499_s1 + $0x10] sm:$0xff]  ;;  %v54_v15 = vsub.f32 0.0, %v1134_v7 }
   0x8   :  { %v28_v3 = vsub.f32 0.0, %v1130_v1  ;;  %v31_v5 = vmul.f32 0.70710677, %v1130_v1  ;;  %v1254_v12 = vld [vmem:[%s2499_s1 + $0xa0] sm:$0xff]  ;;  %v1139_v17 = vld [vmem:[%s2499_s1 + $0x28] sm:$0xff]  ;;  %v1141_v23 = vld [vmem:[%s2499_s1 + $0x30] sm:$0xff] }
   0x9   :  { %v38_v9 = vmul.f32 %v1131_v2, %v29_v4  ;;  %v39_v10 = vmul.f32 %v1132_v6, %v29_v4  ;;  %v91_v16 = vsub.f32 0.0, %v1254_v12  ;;  %v1140_v18 = vld [vmem:[%s2499_s1 + $0xa8] sm:$0xff]  ;;  %v1272_v24 = vld [vmem:[%s2499_s1 + $0xb8] sm:$0xff]  ;;  %v111_v26 = vmul.f32 0.70710677, %v1139_v17  ;;  %v1142_v33 = vld [vmem:[%s2499_s1 + $0xb0] sm:$0xff] }
   0xa   :  { %v30_v8 = vmul.f32 0.70710677, %v28_v3  ;;  %v42_v11 = vmul.f32 %v1132_v6, %v31_v5  ;;  %v46_v13 = vmul.f32 %v1131_v2, %v31_v5  ;;  %v110_v25 = vsub.f32 0.0, %v1140_v18  ;;  %v1135_v42 = vld [vmem:[%s2499_s1 + $0x18] sm:$0xff]  ;;  %v1137_v1 = vld [vmem:[%s2499_s1 + $0x20] sm:$0xff]  ;;  %s1484_s19 = sld [smem:[#allocation2 + $0x2]] }
   0xb   :  { %v40_v19 = vsub.f32 %v38_v9, %v39_v10  ;;  %v44_v21 = vadd.f32 %v39_v10, %v38_v9  ;;  %v113_v27 = vmul.f32 0.70710677, %v1140_v18  ;;  %v136_v28 = vsub.f32 0.0, %v1272_v24  ;;  %v1136_v43 = vld [vmem:[%s2499_s1 + $0x98] sm:$0xff]  ;;  %s1494_s20 = sld [smem:[#allocation2 + $0x82]] }
   0xc   :  { %v41_v20 = vmul.f32 %v1131_v2, %v30_v8  ;;  %v45_v22 = vmul.f32 %v1132_v6, %v30_v8  ;;  %v112_v36 = vmul.f32 0.70710677, %v110_v25  ;;  %v120_v37 = vmul.f32 %v1141_v23, %v111_v26  ;;  %v1143_v56 = vld [vmem:[%s2499_s1 + $0x38] sm:$0xff]  ;;  %s1504_s21 = sld [smem:[#allocation2 + $0x3]] }
   0xd   :  { %v55_v31 = vmul.f32 %v1133_v14, %v40_v19  ;;  %v58_v32 = vmul.f32 %v54_v15, %v40_v19  ;;  %v61_v34 = vmul.f32 %v1133_v14, %v44_v21  ;;  %v64_v35 = vmul.f32 %v1134_v7, %v44_v21  ;;  %s1514_s22 = sld [smem:[#allocation2 + $0x83]] }
   0xe   :  { %v43_v29 = vsub.f32 %v41_v20, %v42_v11  ;;  %v47_v30 = vadd.f32 %v46_v13, %v45_v22  ;;  %v121_v44 = vmul.f32 %v1142_v33, %v111_v26  ;;  %v123_v45 = vmul.f32 %v1141_v23, %v112_v36  ;;  %v1145_v20 = vld [vmem:[%s2499_s1 + $0x40] sm:$0xff]  ;;  %v1148_v26 = vld [vmem:[%s2499_s1 + $0xc8] sm:$0xff]  ;;  %s1524_s23 = sld [smem:[#allocation2 + $0x4]] }
   0xf   :  { %v124_v46 = vmul.f32 %v1142_v33, %v113_v27  ;;  %v127_v47 = vmul.f32 %v1142_v33, %v112_v36  ;;  %v128_v55 = vmul.f32 %v1141_v23, %v113_v27  ;;  %s1534_s24 = sld [smem:[#allocation2 + $0x84]] }
  0x10   :  { %v56_v38 = vmul.f32 %v54_v15, %v43_v29  ;;  %v59_v39 = vmul.f32 %v1133_v14, %v43_v29  ;;  %v62_v40 = vmul.f32 %v1134_v7, %v47_v30  ;;  %v65_v41 = vmul.f32 %v1133_v14, %v47_v30  ;;  %s1544_s25 = sld [smem:[#allocation2 + $0x5]] }
  0x11   :  { %v122_v52 = vsub.f32 %v120_v37, %v121_v44  ;;  %v125_v53 = vsub.f32 %v123_v45, %v124_v46  ;;  %v126_v54 = vadd.f32 %v121_v44, %v120_v37  ;;  %v129_v4 = vadd.f32 %v128_v55, %v127_v47  ;;  %s1554_s26 = sld [smem:[#allocation2 + $0x85]] }
  0x12   :  { %v57_v48 = vsub.f32 %v55_v31, %v56_v38  ;;  %v60_v49 = vadd.f32 %v59_v39, %v58_v32  ;;  %v63_v50 = vsub.f32 %v61_v34, %v62_v40  ;;  %v66_v51 = vadd.f32 %v65_v41, %v64_v35  ;;  %v1149_v31 = vld [vmem:[%s2499_s1 + $0x50] sm:$0xff]  ;;  %v1151_v40 = vld [vmem:[%s2499_s1 + $0x58] sm:$0xff]  ;;  %s1563_s27 = sld [smem:[#allocation2 + $0x6]] }
  0x13   :  { %v137_v5 = vmul.f32 %v1143_v56, %v122_v52  ;;  %v138_v8 = vmul.f32 %v136_v28, %v125_v53  ;;  %v140_v9 = vmul.f32 %v136_v28, %v122_v52  ;;  %v141_v25 = vmul.f32 %v1143_v56, %v125_v53  ;;  %v1152_v41 = vld [vmem:[%s2499_s1 + $0xd8] sm:$0xff]  ;;  %s1570_s28 = sld [smem:[#allocation2 + $0x86]] }
  0x14   :  { %v73_v57 = vmul.f32 %v1135_v42, %v57_v48  ;;  %v74_v58 = vmul.f32 %v1136_v43, %v63_v50  ;;  %v76_v59 = vmul.f32 %v1135_v42, %v60_v49  ;;  %v77_v60 = vmul.f32 %v1136_v43, %v66_v51  ;;  %s1578_s29 = sld [smem:[#allocation2 + $0x7]] }
  0x15   :  { %v79_v61 = vmul.f32 %v1136_v43, %v57_v48  ;;  %v80_v62 = vmul.f32 %v1135_v42, %v63_v50  ;;  %v82_v63 = vmul.f32 %v1136_v43, %v60_v49  ;;  %v83_v0 = vmul.f32 %v1135_v42, %v66_v51  ;;  %v1147_v51 = vld [vmem:[%s2499_s1 + $0x48] sm:$0xff]  ;;  %s1584_s30 = sld [smem:[#allocation2 + $0x87]] }
  0x16   :  { %v75_v2 = vsub.f32 %v73_v57, %v74_v58  ;;  %v78_v3 = vsub.f32 %v76_v59, %v77_v60  ;;  %v139_v23 = vsub.f32 %v137_v5, %v138_v8  ;;  %v143_v29 = vmul.f32 %v1143_v56, %v126_v54  ;;  %s1592_s3 = sld [smem:[#allocation2 + $0x8]] }
  0x17   :  { %v81_v6 = vadd.f32 %v80_v62, %v79_v61  ;;  %v84_v7 = vadd.f32 %v83_v0, %v82_v63  ;;  %v144_v30 = vmul.f32 %v1272_v24, %v129_v4  ;;  %v142_v32 = vadd.f32 %v141_v25, %v140_v9  ;;  %v1154_v62 = vld [vmem:[%s2499_s1 + $0xe0] sm:$0xff]  ;;  %s1598_s4 = sld [smem:[#allocation2 + $0x88]] }
  0x18   :  { %v92_v10 = vmul.f32 %v1137_v1, %v75_v2  ;;  %v93_v11 = vmul.f32 %v91_v16, %v78_v3  ;;  %v95_v13 = vmul.f32 %v91_v16, %v75_v2  ;;  %v96_v14 = vmul.f32 %v1137_v1, %v78_v3  ;;  %v1146_v16 = vld [vmem:[%s2499_s1 + $0xc0] sm:$0xff]  ;;  %s1605_s5 = sld [smem:[#allocation2 + $0x9]] }
  0x19   :  { %v98_v15 = vmul.f32 %v1137_v1, %v81_v6  ;;  %v99_v17 = vmul.f32 %v1254_v12, %v84_v7  ;;  %v101_v18 = vmul.f32 %v1254_v12, %v81_v6  ;;  %v102_v19 = vmul.f32 %v1137_v1, %v84_v7  ;;  %v1150_v12 = vld [vmem:[%s2499_s1 + $0xd0] sm:$0xff]  ;;  %v1153_v7 = vld [vmem:[%s2499_s1 + $0x60] sm:$0xff]  ;;  %s1613_s6 = sld [smem:[#allocation2 + $0x89]] }
  0x1a   :  { %v1295_v21 = vsub.f32 %v92_v10, %v93_v11  ;;  %v1297_v22 = vadd.f32 %v96_v14, %v95_v13  ;;  %v146_v33 = vmul.f32 %v1272_v24, %v126_v54  ;;  %v147_v34 = vmul.f32 %v1143_v56, %v129_v4  ;;  %v1158_v13 = vld [vmem:[%s2499_s1 + $0xf0] sm:$0xff]  ;;  %s1620_s7 = sld [smem:[#allocation2 + $0xa]] }
  0x1b   :  { %v1308_v27 = vsub.f32 %v98_v15, %v99_v17  ;;  %v1310_v28 = vadd.f32 %v102_v19, %v101_v18  ;;  %v155_v35 = vmul.f32 %v1145_v20, %v139_v23  ;;  %v145_v36 = vsub.f32 %v143_v29, %v144_v30  ;;  %v1160_v19 = vld [vmem:[%s2499_s1 + $0xf8] sm:$0xff]  ;;  %s1626_s8 = sld [smem:[#allocation2 + $0x8a]] }
  0x1c   :  { %v161_v37 = vmul.f32 %v1146_v16, %v139_v23  ;;  %v173_v38 = vsub.f32 0.0, %v1148_v26  ;;  %v192_v39 = vsub.f32 0.0, %v1150_v12  ;;  %v148_v42 = vadd.f32 %v147_v34, %v146_v33  ;;  %s1634_s9 = sld [smem:[#allocation2 + $0xb]] }
  0x1d   :  { %v158_v43 = vmul.f32 %v1145_v20, %v142_v32  ;;  %v164_v44 = vmul.f32 %v1146_v16, %v142_v32  ;;  %v193_v45 = vmul.f32 0.70710677, %v1149_v31  ;;  %v156_v46 = vmul.f32 %v1146_v16, %v145_v36  ;;  %v1155_v31 = vld [vmem:[%s2499_s1 + $0x68] sm:$0xff]  ;;  %s1640_s10 = sld [smem:[#allocation2 + $0x8b]] }
  0x1e   :  { %v162_v24 = vmul.f32 %v1145_v20, %v145_v36  ;;  %v194_v47 = vmul.f32 0.70710677, %v192_v39  ;;  %v195_v48 = vmul.f32 0.70710677, %v1150_v12  ;;  %v159_v49 = vmul.f32 %v1146_v16, %v148_v42  ;;  %v1156_v32 = vld [vmem:[%s2499_s1 + $0xe8] sm:$0xff]  ;;  %s1647_s11 = sld [smem:[#allocation2 + $0xc]] }
  0x1f   :  { %v165_v50 = vmul.f32 %v1145_v20, %v148_v42  ;;  %v202_v52 = vmul.f32 %v1151_v40, %v193_v45  ;;  %v203_v53 = vmul.f32 %v1152_v41, %v193_v45  ;;  %v157_v54 = vsub.f32 %v155_v35, %v156_v46  ;;  %s1655_s12 = sld [smem:[#allocation2 + $0x8c]] }
  0x20   :  { %v163_v55 = vadd.f32 %v162_v24, %v161_v37  ;;  %v205_v56 = vmul.f32 %v1151_v40, %v194_v47  ;;  %v206_v57 = vmul.f32 %v1152_v41, %v195_v48  ;;  %v160_v58 = vsub.f32 %v158_v43, %v159_v49  ;;  %s1662_s13 = sld [smem:[#allocation2 + $0xd]] }
  0x21   :  { %v166_v59 = vadd.f32 %v165_v50, %v164_v44  ;;  %v204_v60 = vsub.f32 %v202_v52, %v203_v53  ;;  %v208_v61 = vadd.f32 %v203_v53, %v202_v52  ;;  %v174_v63 = vmul.f32 %v1147_v51, %v157_v54  ;;  %v1157_v53 = vld [vmem:[%s2499_s1 + $0x70] sm:$0xff]  ;;  %s1668_s14 = sld [smem:[#allocation2 + $0x8d]] }
  0x22   :  { %v177_v0 = vmul.f32 %v173_v38, %v157_v54  ;;  %v180_v1 = vmul.f32 %v1147_v51, %v163_v55  ;;  %v183_v2 = vmul.f32 %v1148_v26, %v163_v55  ;;  %v175_v3 = vmul.f32 %v173_v38, %v160_v58  ;;  %s1676_s15 = sld [smem:[#allocation2 + $0xe]] }
  0x23   :  { %v178_v4 = vmul.f32 %v1147_v51, %v160_v58  ;;  %v181_v5 = vmul.f32 %v1148_v26, %v166_v59  ;;  %v184_v6 = vmul.f32 %v1147_v51, %v166_v59  ;;  %v207_v8 = vsub.f32 %v205_v56, %v206_v57  ;;  %v1159_v26 = vld [vmem:[%s2499_s1 + $0x78] sm:$0xff]  ;;  %s1464_s1 = sld [smem:[#allocation2 + $0x1]] }
  0x24   :  { %v209_v9 = vmul.f32 %v1152_v41, %v194_v47  ;;  %v210_v10 = vmul.f32 %v1151_v40, %v195_v48  ;;  %v218_v11 = vsub.f32 0.0, %v1154_v62  ;;  %v1335_v14 = vsub.f32 %v174_v63, %v175_v3  ;;  %s1682_s16 = sld [smem:[#allocation2 + $0x8e]] }
  0x25   :  { %v1337_v15 = vadd.f32 %v178_v4, %v177_v0  ;;  %v1339_v17 = vsub.f32 %v180_v1, %v181_v5  ;;  %v1341_v18 = vadd.f32 %v184_v6, %v183_v2  ;;  %v219_v23 = vmul.f32 %v1153_v7, %v204_v60  ;;  %s1689_s17 = sld [smem:[#allocation2 + $0xf]] }
  0x26   :  { %v211_v20 = vadd.f32 %v210_v10, %v209_v9  ;;  %v220_v25 = vmul.f32 %v218_v11, %v207_v8  ;;  %v222_v16 = vmul.f32 %v218_v11, %v204_v60  ;;  %v223_v12 = vmul.f32 %v1153_v7, %v207_v8  ;;  %s1697_s18 = sld [smem:[#allocation2 + $0x8f]] }
  0x27   :  { %v225_v29 = vmul.f32 %v1153_v7, %v208_v61  ;;  %v228_v30 = vmul.f32 %v1154_v62, %v208_v61  ;;  %v255_v33 = vsub.f32 0.0, %v1158_v13  ;;  %v274_v37 = vsub.f32 0.0, %v1160_v19 }
  0x28   :  { %v221_v34 = vsub.f32 %v219_v23, %v220_v25  ;;  %v226_v35 = vmul.f32 %v1154_v62, %v211_v20  ;;  %v229_v36 = vmul.f32 %v1153_v7, %v211_v20  ;;  %v224_v38 = vadd.f32 %v223_v12, %v222_v16 }
  0x29   :  { %v1355_v39 = vmul.f32 0.70710677, %v1159_v26  ;;  %v1357_v40 = vmul.f32 0.70710677, %v1160_v19  ;;  %v278_v41 = vmul.f32 %v1335_v14, %v1295_v21  ;;  %v1361_v47 = vmul.f32 0.70710677, %v274_v37 }
  0x2a   :  { %v227_v42 = vsub.f32 %v225_v29, %v226_v35  ;;  %v230_v43 = vadd.f32 %v229_v36, %v228_v30  ;;  %v237_v44 = vmul.f32 %v1155_v31, %v221_v34  ;;  %v243_v45 = vmul.f32 %v1156_v32, %v221_v34 }
  0x2b   :  { %v240_v46 = vmul.f32 %v1155_v31, %v224_v38  ;;  %v246_v24 = vmul.f32 %v1156_v32, %v224_v38  ;;  %v279_v48 = vmul.f32 %v1337_v15, %v1297_v22  ;;  %v281_v55 = vmul.f32 %v1337_v15, %v1295_v21 }
  0x2c   :  { %v238_v49 = vmul.f32 %v1156_v32, %v227_v42  ;;  %v241_v50 = vmul.f32 %v1156_v32, %v230_v43  ;;  %v244_v51 = vmul.f32 %v1155_v31, %v227_v42  ;;  %v247_v52 = vmul.f32 %v1155_v31, %v230_v43 }
  0x2d   :  { %v280_v54 = vsub.f32 %v278_v41, %v279_v48  ;;  %v282_v56 = vmul.f32 %v1335_v14, %v1297_v22  ;;  %v284_v57 = vmul.f32 %v1339_v17, %v1295_v21  ;;  %v285_v63 = vmul.f32 %v1341_v18, %v1297_v22 }
  0x2e   :  { %v239_v58 = vsub.f32 %v237_v44, %v238_v49  ;;  %v242_v59 = vsub.f32 %v240_v46, %v241_v50  ;;  %v245_v60 = vadd.f32 %v244_v51, %v243_v45  ;;  %v248_v61 = vadd.f32 %v247_v52, %v246_v24 }
  0x2f   :  { %v283_v62 = vadd.f32 %v282_v56, %v281_v55  ;;  %v287_v0 = vmul.f32 %v1341_v18, %v1295_v21  ;;  %v288_v1 = vmul.f32 %v1339_v17, %v1297_v22  ;;  %v286_v19 = vsub.f32 %v284_v57, %v285_v63 }
  0x30   :  { %v256_v2 = vmul.f32 %v1157_v53, %v239_v58  ;;  %v257_v3 = vmul.f32 %v255_v33, %v242_v59  ;;  %v259_v4 = vmul.f32 %v255_v33, %v239_v58  ;;  %v260_v5 = vmul.f32 %v1157_v53, %v242_v59 }
  0x31   :  { %v262_v6 = vmul.f32 %v1157_v53, %v245_v60  ;;  %v263_v7 = vmul.f32 %v1158_v13, %v248_v61  ;;  %v265_v8 = vmul.f32 %v1158_v13, %v245_v60  ;;  %v266_v9 = vmul.f32 %v1157_v53, %v248_v61 }
  0x32   :  { %v258_v10 = vsub.f32 %v256_v2, %v257_v3  ;;  %v261_v11 = vadd.f32 %v260_v5, %v259_v4  ;;  %v289_v20 = vadd.f32 %v288_v1, %v287_v0  ;;  %v290_v21 = vmul.f32 %v1335_v14, %v1308_v27 }
  0x33   :  { %v264_v23 = vsub.f32 %v262_v6, %v263_v7  ;;  %v267_v25 = vadd.f32 %v266_v9, %v265_v8  ;;  %v291_v22 = vmul.f32 %v1337_v15, %v1310_v28  ;;  %v293_v16 = vmul.f32 %v1337_v15, %v1308_v27 }
  0x34   :  { %v294_v26 = vmul.f32 %v1335_v14, %v1310_v28  ;;  %v296_v13 = vmul.f32 %v1339_v17, %v1308_v27  ;;  %v297_v12 = vmul.f32 %v1341_v18, %v1310_v28  ;;  %v299_v30 = vmul.f32 %v1341_v18, %v1308_v27 }
  0x35   :  { %v292_v29 = vsub.f32 %v290_v21, %v291_v22  ;;  %v300_v31 = vmul.f32 %v1339_v17, %v1310_v28  ;;  %v302_v32 = vmul.f32 %v280_v54, %v258_v10  ;;  %v303_v15 = vmul.f32 %v283_v62, %v261_v11 }
  0x36   :  { %v295_v33 = vadd.f32 %v294_v26, %v293_v16  ;;  %v298_v34 = vsub.f32 %v296_v13, %v297_v12  ;;  %v305_v35 = vmul.f32 %v280_v54, %v261_v11  ;;  %v306_v14 = vmul.f32 %v283_v62, %v258_v10 }
  0x37   :  { %v301_v36 = vadd.f32 %v300_v31, %v299_v30  ;;  %v308_v37 = vmul.f32 %v280_v54, %v264_v23  ;;  %v309_v38 = vmul.f32 %v283_v62, %v267_v25  ;;  %v304_v41 = vsub.f32 %v302_v32, %v303_v15 }
  0x38   :  { %v311_v42 = vmul.f32 %v280_v54, %v267_v25  ;;  %v312_v43 = vmul.f32 %v283_v62, %v264_v23  ;;  %v314_v44 = vmul.f32 %v292_v29, %v258_v10  ;;  %v307_v45 = vadd.f32 %v306_v14, %v305_v35 }
  0x39   :  { %v1396_v46 = vsub.f32 %v308_v37, %v309_v38  ;;  %v315_v27 = vmul.f32 %v295_v33, %v261_v11  ;;  %v317_v18 = vmul.f32 %v292_v29, %v261_v11  ;;  %v318_v28 = vmul.f32 %v295_v33, %v258_v10 }
  0x3a   :  { %v1398_v24 = vadd.f32 %v312_v43, %v311_v42  ;;  %v320_v17 = vmul.f32 %v292_v29, %v264_v23  ;;  %v321_v48 = vmul.f32 %v295_v33, %v267_v25  ;;  %v323_v50 = vmul.f32 %v292_v29, %v267_v25 }
  0x3b   :  { %v316_v49 = vsub.f32 %v314_v44, %v315_v27  ;;  %v324_v51 = vmul.f32 %v295_v33, %v264_v23  ;;  %v326_v52 = vmul.f32 %v286_v19, %v258_v10  ;;  %v319_v53 = vadd.f32 %v318_v28, %v317_v18 }
  0x3c   :  { %v1400_v55 = vsub.f32 %v320_v17, %v321_v48  ;;  %v327_v54 = vmul.f32 %v289_v20, %v261_v11  ;;  %v329_v56 = vmul.f32 %v286_v19, %v261_v11  ;;  %v330_v58 = vmul.f32 %v289_v20, %v258_v10 }
  0x3d   :  { %v1402_v57 = vadd.f32 %v324_v51, %v323_v50  ;;  %v332_v59 = vmul.f32 %v286_v19, %v264_v23  ;;  %v333_v60 = vmul.f32 %v289_v20, %v267_v25  ;;  %v335_v62 = vmul.f32 %v286_v19, %v267_v25 }
  0x3e   :  { %v328_v61 = vsub.f32 %v326_v52, %v327_v54  ;;  %v336_v63 = vmul.f32 %v289_v20, %v264_v23  ;;  %v338_v0 = vmul.f32 %v298_v34, %v258_v10  ;;  %v331_v1 = vadd.f32 %v330_v58, %v329_v56 }
  0x3f   :  { %v1404_v2 = vsub.f32 %v332_v59, %v333_v60  ;;  %v339_v3 = vmul.f32 %v301_v36, %v261_v11  ;;  %v341_v4 = vmul.f32 %v298_v34, %v261_v11  ;;  %v342_v6 = vmul.f32 %v301_v36, %v258_v10 }
  0x40   :  { %v1406_v5 = vadd.f32 %v336_v63, %v335_v62  ;;  %v344_v7 = vmul.f32 %v298_v34, %v264_v23  ;;  %v345_v8 = vmul.f32 %v301_v36, %v267_v25  ;;  %v347_v21 = vmul.f32 %v298_v34, %v267_v25 }
  0x41   :  { %v340_v9 = vsub.f32 %v338_v0, %v339_v3  ;;  %v348_v22 = vmul.f32 %v301_v36, %v264_v23  ;;  %v350_v16 = vmul.f32 %v304_v41, %v1355_v39  ;;  %v343_v26 = vadd.f32 %v342_v6, %v341_v4 }
  0x42   :  { %v1409_v13 = vsub.f32 %v344_v7, %v345_v8  ;;  %v351_v19 = vmul.f32 %v307_v45, %v1361_v47  ;;  %v353_v20 = vmul.f32 %v304_v41, %v1361_v47  ;;  %v354_v11 = vmul.f32 %v307_v45, %v1355_v39 }
  0x43   :  { %v1413_v12 = vadd.f32 %v348_v22, %v347_v21  ;;  %v356_v10 = vmul.f32 %v307_v45, %v1357_v40  ;;  %v358_v29 = vmul.f32 %v304_v41, %v1357_v40  ;;  %v360_v23 = vmul.f32 %v316_v49, %v1355_v39 }
  0x44   :  { %v1418_v30 = vsub.f32 %v350_v16, %v351_v19  ;;  %v361_v25 = vmul.f32 %v319_v53, %v1361_v47  ;;  %v363_v31 = vmul.f32 %v316_v49, %v1361_v47  ;;  %v1423_v32 = vadd.f32 %v354_v11, %v353_v20 }
  0x45   :  { %v1425_v33 = vsub.f32 %v350_v16, %v356_v10  ;;  %v1427_v34 = vadd.f32 %v358_v29, %v354_v11  ;;  %v364_v15 = vmul.f32 %v319_v53, %v1355_v39  ;;  %v366_v36 = vmul.f32 %v319_v53, %v1357_v40 }
  0x46   :  { %v1430_v35 = vsub.f32 %v360_v23, %v361_v25  ;;  %v368_v14 = vmul.f32 %v316_v49, %v1357_v40  ;;  %v370_v37 = vmul.f32 %v328_v61, %v1355_v39  ;;  %v371_v41 = vmul.f32 %v331_v1, %v1361_v47 }
  0x47   :  { %v1435_v38 = vadd.f32 %v364_v15, %v363_v31  ;;  %v373_v42 = vmul.f32 %v328_v61, %v1361_v47  ;;  %v374_v43 = vmul.f32 %v331_v1, %v1355_v39  ;;  %v1440_v44 = vsub.f32 %v360_v23, %v366_v36 }
  0x48   :  { %v1442_v45 = vadd.f32 %v368_v14, %v364_v15  ;;  %v376_v27 = vmul.f32 %v331_v1, %v1357_v40  ;;  %v378_v18 = vmul.f32 %v328_v61, %v1357_v40  ;;  %v1446_v28 = vsub.f32 %v370_v37, %v371_v41 }
  0x49   :  { %v1448_v17 = vadd.f32 %v374_v43, %v373_v42  ;;  %v380_v48 = vmul.f32 %v340_v9, %v1355_v39  ;;  %v381_v49 = vmul.f32 %v343_v26, %v1361_v47  ;;  %v383_v52 = vmul.f32 %v340_v9, %v1361_v47 }
  0x4a   :  { %v1452_v50 = vsub.f32 %v370_v37, %v376_v27  ;;  %v1454_v51 = vadd.f32 %v378_v18, %v374_v43  ;;  %v384_v53 = vmul.f32 %v343_v26, %v1355_v39  ;;  %v386_v56 = vmul.f32 %v343_v26, %v1357_v40 }
  0x4b   :  { %v1458_v54 = vsub.f32 %v380_v48, %v381_v49  ;;  %v388_v58 = vmul.f32 %v340_v9, %v1357_v40  ;;  %v390_v59 = vmul.f32 %v1396_v46, %v1355_v39  ;;  %v391_v61 = vmul.f32 %v1398_v24, %v1361_v47 }
  0x4c   :  { %v1466_v60 = vadd.f32 %v384_v53, %v383_v52  ;;  %v393_v62 = vmul.f32 %v1396_v46, %v1361_v47  ;;  %v394_v63 = vmul.f32 %v1398_v24, %v1355_v39  ;;  %v1476_v0 = vsub.f32 %v380_v48, %v386_v56 }
  0x4d   :  { %v1478_v1 = vadd.f32 %v388_v58, %v384_v53  ;;  %v396_v3 = vmul.f32 %v1398_v24, %v1357_v40  ;;  %v398_v4 = vmul.f32 %v1396_v46, %v1357_v40  ;;  %v1486_v6 = vsub.f32 %v390_v59, %v391_v61 }
  0x4e   :  { %v1488_v7 = vadd.f32 %v394_v63, %v393_v62  ;;  %v400_v8 = vmul.f32 %v1400_v55, %v1355_v39  ;;  %v401_v9 = vmul.f32 %v1402_v57, %v1361_v47  ;;  %v403_v46 = vmul.f32 %v1400_v55, %v1361_v47 }
  0x4f   :  { %v1496_v21 = vsub.f32 %v390_v59, %v396_v3  ;;  %v1498_v24 = vadd.f32 %v398_v4, %v394_v63  ;;  %v404_v22 = vmul.f32 %v1402_v57, %v1355_v39  ;;  %v406_v26 = vmul.f32 %v1402_v57, %v1357_v40 }
  0x50   :  { %v1506_v16 = vsub.f32 %v400_v8, %v401_v9  ;;  %v408_v19 = vmul.f32 %v1400_v55, %v1357_v40  ;;  %v410_v20 = vmul.f32 %v1404_v2, %v1355_v39  ;;  %v411_v10 = vmul.f32 %v1406_v5, %v1361_v47 }
  0x51   :  { %v1516_v11 = vadd.f32 %v404_v22, %v403_v46  ;;  %v413_v29 = vmul.f32 %v1404_v2, %v1361_v47  ;;  %v414_v23 = vmul.f32 %v1406_v5, %v1355_v39  ;;  %v1526_v57 = vsub.f32 %v400_v8, %v406_v26 }
  0x52   :  { %v1528_v55 = vadd.f32 %v408_v19, %v404_v22  ;;  %v416_v25 = vmul.f32 %v1406_v5, %v1357_v40  ;;  %v418_v31 = vmul.f32 %v1404_v2, %v1357_v40  ;;  %v1536_v15 = vsub.f32 %v410_v20, %v411_v10 }
  0x53   :  { %v1538_v36 = vadd.f32 %v414_v23, %v413_v29  ;;  %v420_v14 = vmul.f32 %v1409_v13, %v1355_v39  ;;  %v421_v37 = vmul.f32 %v1413_v12, %v1361_v47  ;;  %v423_v2 = vmul.f32 %v1409_v13, %v1361_v47 }
  0x54   :  { %v1546_v5 = vsub.f32 %v410_v20, %v416_v25  ;;  %v1548_v41 = vadd.f32 %v418_v31, %v414_v23  ;;  %v424_v42 = vmul.f32 %v1413_v12, %v1355_v39  ;;  %v426_v27 = vmul.f32 %v1413_v12, %v1357_v40 }
  0x55   :  { %v1556_v43 = vsub.f32 %v420_v14, %v421_v37  ;;  %v428_v18 = vmul.f32 %v1409_v13, %v1357_v40  ;;  %v432_v48 = vstv %s1464_s1  ;;  %v434_v49 = vstv %s1474_s0  ;;  %s1714_s1 = sld [smem:[#allocation2 + $0x10]] }
  0x56   :  { %v1565_v47 = vadd.f32 %v424_v42, %v423_v2  ;;  %v433_v39 = vmul.f32 %v432_v48, %v1430_v35  ;;  %v437_v52 = vmul.f32 %v432_v48, %v1435_v38  ;;  %v1572_v53 = vsub.f32 %v420_v14, %v426_v27  ;;  %s1720_s0 = sld [smem:[#allocation2 + $0x90]] }
  0x57   :  { %v1574_v12 = vadd.f32 %v428_v18, %v424_v42  ;;  %v435_v56 = vmul.f32 %v434_v49, %v1435_v38  ;;  %v438_v40 = vmul.f32 %v434_v49, %v1430_v35  ;;  %v442_v13 = vstv %s1484_s19  ;;  %s1888_s19 = sld [smem:[#allocation2 + $0x11]] }
  0x58   :  { %v444_v58 = vstv %s1494_s20  ;;  %v452_v59 = vstv %s1504_s21  ;;  %v454_v61 = vstv %s1514_s22  ;;  %v443_v3 = vmul.f32 %v442_v13, %v1446_v28  ;;  %s1898_s20 = sld [smem:[#allocation2 + $0x91]] }
  0x59   :  { %v1586_v62 = vsub.f32 %v433_v39, %v435_v56  ;;  %v1588_v63 = vadd.f32 %v438_v40, %v437_v52  ;;  %v445_v38 = vmul.f32 %v444_v58, %v1448_v17  ;;  %v447_v35 = vmul.f32 %v442_v13, %v1448_v17  ;;  %s2094_s21 = sld [smem:[#allocation2 + $0x12]] }
  0x5a   :  { %v448_v4 = vmul.f32 %v444_v58, %v1446_v28  ;;  %v453_v8 = vmul.f32 %v452_v59, %v1458_v54  ;;  %v455_v9 = vmul.f32 %v454_v61, %v1466_v60  ;;  %v457_v22 = vmul.f32 %v452_v59, %v1466_v60  ;;  %s2104_s22 = sld [smem:[#allocation2 + $0x92]] }
  0x5b   :  { %v1600_v46 = vsub.f32 %v443_v3, %v445_v38  ;;  %v458_v26 = vmul.f32 %v454_v61, %v1458_v54  ;;  %v462_v19 = vstv %s1524_s23  ;;  %v464_v10 = vstv %s1534_s24  ;;  %s2288_s23 = sld [smem:[#allocation2 + $0x13]] }
  0x5c   :  { %v1607_v28 = vadd.f32 %v448_v4, %v447_v35  ;;  %v1609_v17 = vsub.f32 %v453_v8, %v455_v9  ;;  %v463_v20 = vmul.f32 %v462_v19, %v1486_v6  ;;  %v465_v60 = vmul.f32 %v464_v10, %v1488_v7  ;;  %s2298_s24 = sld [smem:[#allocation2 + $0x93]] }
  0x5d   :  { %v1615_v29 = vadd.f32 %v458_v26, %v457_v22  ;;  %v467_v23 = vmul.f32 %v462_v19, %v1488_v7  ;;  %v468_v54 = vmul.f32 %v464_v10, %v1486_v6  ;;  %v472_v25 = vstv %s1544_s25 }
  0x5e   :  { %v474_v31 = vstv %s1554_s26  ;;  %v482_v14 = vstv %s1563_s27  ;;  %v484_v37 = vstv %s1570_s28  ;;  %v1628_v2 = vsub.f32 %v463_v20, %v465_v60 }
  0x5f   :  { %v1630_v42 = vadd.f32 %v468_v54, %v467_v23  ;;  %v473_v27 = vmul.f32 %v472_v25, %v1506_v16  ;;  %v475_v7 = vmul.f32 %v474_v31, %v1516_v11  ;;  %v477_v6 = vmul.f32 %v472_v25, %v1516_v11 }
  0x60   :  { %v478_v18 = vmul.f32 %v474_v31, %v1506_v16  ;;  %v483_v48 = vmul.f32 %v482_v14, %v1536_v15  ;;  %v485_v39 = vmul.f32 %v484_v37, %v1538_v36  ;;  %v487_v52 = vmul.f32 %v482_v14, %v1538_v36 }
  0x61   :  { %v1642_v49 = vsub.f32 %v473_v27, %v475_v7  ;;  %v488_v56 = vmul.f32 %v484_v37, %v1536_v15  ;;  %v492_v40 = vstv %s1578_s29  ;;  %v494_v58 = vstv %s1584_s30 }
  0x62   :  { %v1649_v16 = vadd.f32 %v478_v18, %v477_v6  ;;  %v1651_v11 = vsub.f32 %v483_v48, %v485_v39  ;;  %v493_v13 = vmul.f32 %v492_v40, %v1556_v43  ;;  %v495_v36 = vmul.f32 %v494_v58, %v1565_v47 }
  0x63   :  { %v1657_v59 = vadd.f32 %v488_v56, %v487_v52  ;;  %v497_v61 = vmul.f32 %v492_v40, %v1565_v47  ;;  %v498_v15 = vmul.f32 %v494_v58, %v1556_v43  ;;  %v502_v3 = vstv %s1592_s3 }
  0x64   :  { %v504_v38 = vstv %s1598_s4  ;;  %v512_v35 = vstv %s1605_s5  ;;  %v514_v4 = vstv %s1613_s6  ;;  %v1670_v8 = vsub.f32 %v493_v13, %v495_v36 }
  0x65   :  { %v1672_v9 = vadd.f32 %v498_v15, %v497_v61  ;;  %v503_v22 = vmul.f32 %v502_v3, %v1425_v33  ;;  %v505_v47 = vmul.f32 %v504_v38, %v1427_v34  ;;  %v507_v43 = vmul.f32 %v502_v3, %v1427_v34 }
  0x66   :  { %v508_v26 = vmul.f32 %v504_v38, %v1425_v33  ;;  %v513_v19 = vmul.f32 %v512_v35, %v1440_v44  ;;  %v515_v20 = vmul.f32 %v514_v4, %v1442_v45  ;;  %v517_v60 = vmul.f32 %v512_v35, %v1442_v45 }
  0x67   :  { %v1684_v10 = vsub.f32 %v503_v22, %v505_v47  ;;  %v518_v23 = vmul.f32 %v514_v4, %v1440_v44  ;;  %v522_v54 = vstv %s1620_s7  ;;  %v524_v31 = vstv %s1626_s8 }
  0x68   :  { %v1691_v33 = vadd.f32 %v508_v26, %v507_v43  ;;  %v1693_v34 = vsub.f32 %v513_v19, %v515_v20  ;;  %v523_v25 = vmul.f32 %v522_v54, %v1452_v50  ;;  %v525_v37 = vmul.f32 %v524_v31, %v1454_v51 }
  0x69   :  { %v1699_v14 = vadd.f32 %v518_v23, %v517_v60  ;;  %v527_v45 = vmul.f32 %v522_v54, %v1454_v51  ;;  %v528_v44 = vmul.f32 %v524_v31, %v1452_v50  ;;  %v532_v27 = vstv %s1634_s9 }
  0x6a   :  { %v534_v7 = vstv %s1640_s10  ;;  %v542_v6 = vstv %s1647_s11  ;;  %v544_v18 = vstv %s1655_s12  ;;  %v1708_v48 = vsub.f32 %v523_v25, %v525_v37 }
  0x6b   :  { %v1710_v39 = vadd.f32 %v528_v44, %v527_v45  ;;  %v533_v52 = vmul.f32 %v532_v27, %v1476_v0  ;;  %v535_v56 = vmul.f32 %v534_v7, %v1478_v1  ;;  %v537_v51 = vmul.f32 %v532_v27, %v1478_v1 }
  0x6c   :  { %v538_v50 = vmul.f32 %v534_v7, %v1476_v0  ;;  %v543_v40 = vmul.f32 %v542_v6, %v1496_v21  ;;  %v545_v13 = vmul.f32 %v544_v18, %v1498_v24  ;;  %v547_v36 = vmul.f32 %v542_v6, %v1498_v24 }
  0x6d   :  { %v1722_v58 = vsub.f32 %v533_v52, %v535_v56  ;;  %v548_v61 = vmul.f32 %v544_v18, %v1496_v21  ;;  %v552_v15 = vstv %s1662_s13  ;;  %v554_v38 = vstv %s1668_s14 }
  0x6e   :  { %v1727_v1 = vadd.f32 %v538_v50, %v537_v51  ;;  %v1729_v0 = vsub.f32 %v543_v40, %v545_v13  ;;  %v553_v3 = vmul.f32 %v552_v15, %v1526_v57  ;;  %v555_v4 = vmul.f32 %v554_v38, %v1528_v55 }
  0x6f   :  { %v1733_v35 = vadd.f32 %v548_v61, %v547_v36  ;;  %v557_v22 = vmul.f32 %v552_v15, %v1528_v55  ;;  %v558_v47 = vmul.f32 %v554_v38, %v1526_v57  ;;  %v562_v24 = vstv %s1676_s15 }
  0x70   :  { %v564_v43 = vstv %s1682_s16  ;;  %v572_v21 = vstv %s1689_s17  ;;  %v574_v26 = vstv %s1697_s18  ;;  %v1742_v19 = vsub.f32 %v553_v3, %v555_v4 }
  0x71   :  { %v1744_v20 = vadd.f32 %v558_v47, %v557_v22  ;;  %v563_v60 = vmul.f32 %v562_v24, %v1546_v5  ;;  %v565_v23 = vmul.f32 %v564_v43, %v1548_v41  ;;  %v567_v54 = vmul.f32 %v562_v24, %v1548_v41 }
  0x72   :  { %v568_v55 = vmul.f32 %v564_v43, %v1546_v5  ;;  %v573_v57 = vmul.f32 %v572_v21, %v1572_v53  ;;  %v575_v25 = vmul.f32 %v574_v26, %v1574_v12  ;;  %v577_v37 = vmul.f32 %v572_v21, %v1574_v12 }
  0x73   :  { %v1752_v31 = vsub.f32 %v563_v60, %v565_v23  ;;  %v578_v45 = vmul.f32 %v574_v26, %v1572_v53  ;;  %v1757_v44 = vstv %s1714_s1  ;;  %v1766_v5 = vstv %s1720_s0 }
  0x74   :  { %v1759_v27 = vadd.f32 %v568_v55, %v567_v54  ;;  %v1761_v7 = vsub.f32 %v573_v57, %v575_v25  ;;  %v583_v41 = vmul.f32 %v1757_v44, %v1418_v30  ;;  %v585_v18 = vmul.f32 %v1766_v5, %v1586_v62 }
  0x75   :  { %v1768_v6 = vadd.f32 %v578_v45, %v577_v37  ;;  %v587_v12 = vmul.f32 %v1757_v44, %v1423_v32  ;;  %v588_v53 = vmul.f32 %v1766_v5, %v1588_v63  ;;  %v590_v52 = vmul.f32 %v1766_v5, %v1418_v30 }
  0x76   :  { %v591_v56 = vmul.f32 %v1757_v44, %v1586_v62  ;;  %v593_v51 = vmul.f32 %v1766_v5, %v1423_v32  ;;  %v594_v50 = vmul.f32 %v1757_v44, %v1588_v63  ;;  %v1784_v40 = vsub.f32 %v583_v41, %v585_v18 }
  0x77   :  { %v1786_v13 = vsub.f32 %v587_v12, %v588_v53  ;;  %v596_v36 = vmul.f32 %v1757_v44, %v1600_v46  ;;  %v597_v61 = vmul.f32 %v1766_v5, %v1609_v17  ;;  %v599_v32 = vmul.f32 %v1757_v44, %v1607_v28 }
  0x78   :  { %v1792_v30 = vadd.f32 %v591_v56, %v590_v52  ;;  %v1794_v15 = vadd.f32 %v594_v50, %v593_v51  ;;  %v600_v62 = vmul.f32 %v1766_v5, %v1615_v29  ;;  %v602_v3 = vmul.f32 %v1766_v5, %v1600_v46 }
  0x79   :  { %v1800_v63 = vsub.f32 %v596_v36, %v597_v61  ;;  %v603_v38 = vmul.f32 %v1757_v44, %v1609_v17  ;;  %v605_v4 = vmul.f32 %v1766_v5, %v1607_v28  ;;  %v606_v47 = vmul.f32 %v1757_v44, %v1615_v29 }
  0x7a   :  { %v1808_v22 = vsub.f32 %v599_v32, %v600_v62  ;;  %v608_v24 = vmul.f32 %v1757_v44, %v1628_v2  ;;  %v609_v43 = vmul.f32 %v1766_v5, %v1642_v49  ;;  %v611_v46 = vmul.f32 %v1757_v44, %v1630_v42 }
  0x7b   :  { %v1816_v21 = vadd.f32 %v603_v38, %v602_v3  ;;  %v612_v17 = vmul.f32 %v1766_v5, %v1649_v16  ;;  %v614_v28 = vmul.f32 %v1766_v5, %v1628_v2  ;;  %v1824_v26 = vadd.f32 %v606_v47, %v605_v4 }
  0x7c   :  { %v1826_v29 = vsub.f32 %v608_v24, %v609_v43  ;;  %v615_v60 = vmul.f32 %v1757_v44, %v1642_v49  ;;  %v617_v23 = vmul.f32 %v1766_v5, %v1630_v42  ;;  %v618_v55 = vmul.f32 %v1757_v44, %v1649_v16 }
  0x7d   :  { %v1832_v54 = vsub.f32 %v611_v46, %v612_v17  ;;  %v620_v57 = vmul.f32 %v1757_v44, %v1651_v11  ;;  %v621_v2 = vmul.f32 %v1766_v5, %v1670_v8  ;;  %v623_v37 = vmul.f32 %v1757_v44, %v1657_v59 }
  0x7e   :  { %v1840_v25 = vadd.f32 %v615_v60, %v614_v28  ;;  %v624_v49 = vmul.f32 %v1766_v5, %v1672_v9  ;;  %v626_v42 = vmul.f32 %v1766_v5, %v1651_v11  ;;  %v1848_v45 = vadd.f32 %v618_v55, %v617_v23 }
  0x7f   :  { %v1850_v16 = vsub.f32 %v620_v57, %v621_v2  ;;  %v627_v41 = vmul.f32 %v1757_v44, %v1670_v8  ;;  %v629_v18 = vmul.f32 %v1766_v5, %v1657_v59  ;;  %v630_v53 = vmul.f32 %v1757_v44, %v1672_v9 }
  0x80   :  { %v1856_v12 = vsub.f32 %v623_v37, %v624_v49  ;;  %v632_v52 = vmul.f32 %v1757_v44, %v1684_v10  ;;  %v633_v11 = vmul.f32 %v1766_v5, %v1693_v34  ;;  %v635_v51 = vmul.f32 %v1757_v44, %v1691_v33 }
  0x81   :  { %v1864_v56 = vadd.f32 %v627_v41, %v626_v42  ;;  %v636_v8 = vmul.f32 %v1766_v5, %v1699_v14  ;;  %v638_v59 = vmul.f32 %v1766_v5, %v1684_v10  ;;  %v1872_v50 = vadd.f32 %v630_v53, %v629_v18 }
  0x82   :  { %v1874_v9 = vsub.f32 %v632_v52, %v633_v11  ;;  %v639_v36 = vmul.f32 %v1757_v44, %v1693_v34  ;;  %v641_v61 = vmul.f32 %v1766_v5, %v1691_v33  ;;  %v642_v62 = vmul.f32 %v1757_v44, %v1699_v14 }
  0x83   :  { %v1880_v32 = vsub.f32 %v635_v51, %v636_v8  ;;  %v644_v3 = vmul.f32 %v1757_v44, %v1708_v48  ;;  %v645_v10 = vmul.f32 %v1766_v5, %v1722_v58  ;;  %v647_v34 = vmul.f32 %v1757_v44, %v1710_v39 }
  0x84   :  { %v1890_v38 = vadd.f32 %v639_v36, %v638_v59  ;;  %v648_v33 = vmul.f32 %v1766_v5, %v1727_v1  ;;  %v650_v4 = vmul.f32 %v1766_v5, %v1708_v48  ;;  %v1900_v14 = vadd.f32 %v642_v62, %v641_v61 }
  0x85   :  { %v1902_v47 = vsub.f32 %v644_v3, %v645_v10  ;;  %v651_v24 = vmul.f32 %v1757_v44, %v1722_v58  ;;  %v653_v43 = vmul.f32 %v1766_v5, %v1710_v39  ;;  %v654_v17 = vmul.f32 %v1757_v44, %v1727_v1 }
  0x86   :  { %v1908_v46 = vsub.f32 %v647_v34, %v648_v33  ;;  %v656_v48 = vmul.f32 %v1757_v44, %v1729_v0  ;;  %v657_v28 = vmul.f32 %v1766_v5, %v1742_v19  ;;  %v659_v23 = vmul.f32 %v1757_v44, %v1733_v35 }
  0x87   :  { %v1916_v60 = vadd.f32 %v651_v24, %v650_v4  ;;  %v660_v58 = vmul.f32 %v1766_v5, %v1744_v20  ;;  %v662_v39 = vmul.f32 %v1766_v5, %v1729_v0  ;;  %v1924_v55 = vadd.f32 %v654_v17, %v653_v43 }
  0x88   :  { %v1926_v1 = vsub.f32 %v656_v48, %v657_v28  ;;  %v663_v57 = vmul.f32 %v1757_v44, %v1742_v19  ;;  %v665_v2 = vmul.f32 %v1766_v5, %v1733_v35  ;;  %v666_v49 = vmul.f32 %v1757_v44, %v1744_v20 }
  0x89   :  { %v1932_v37 = vsub.f32 %v659_v23, %v660_v58  ;;  %v668_v0 = vmul.f32 %v1757_v44, %v1752_v31  ;;  %v669_v42 = vmul.f32 %v1766_v5, %v1761_v7  ;;  %v671_v19 = vmul.f32 %v1757_v44, %v1759_v27 }
  0x8a   :  { %v1940_v41 = vadd.f32 %v663_v57, %v662_v39  ;;  %v672_v35 = vmul.f32 %v1766_v5, %v1768_v6  ;;  %v674_v18 = vmul.f32 %v1766_v5, %v1752_v31  ;;  %v1948_v53 = vadd.f32 %v666_v49, %v665_v2 }
  0x8b   :  { %v1950_v20 = vsub.f32 %v668_v0, %v669_v42  ;;  %v675_v52 = vmul.f32 %v1757_v44, %v1761_v7  ;;  %v677_v11 = vmul.f32 %v1766_v5, %v1759_v27  ;;  %v678_v8 = vmul.f32 %v1757_v44, %v1768_v6 }
  0x8c   :  { %v1956_v51 = vsub.f32 %v671_v19, %v672_v35  ;;  %v1961_v59 = vstv %s1888_s19  ;;  %v1964_v36 = vstv %s1898_s20 }
  0x8d   :  { %v1966_v31 = vadd.f32 %v675_v52, %v674_v18  ;;  %v683_v61 = vmul.f32 %v1961_v59, %v1784_v40  ;;  %v685_v7 = vmul.f32 %v1964_v36, %v1800_v63  ;;  %v687_v27 = vmul.f32 %v1961_v59, %v1786_v13 }
  0x8e   :  { %v1974_v5 = vadd.f32 %v678_v8, %v677_v11  ;;  %v688_v44 = vmul.f32 %v1964_v36, %v1808_v22  ;;  %v690_v6 = vmul.f32 %v1964_v36, %v1784_v40  ;;  %v691_v62 = vmul.f32 %v1961_v59, %v1800_v63 }
  0x8f   :  { %v1982_v3 = vsub.f32 %v683_v61, %v685_v7  ;;  %v693_v10 = vmul.f32 %v1964_v36, %v1786_v13  ;;  %v694_v34 = vmul.f32 %v1961_v59, %v1808_v22  ;;  %v696_v33 = vmul.f32 %v1961_v59, %v1792_v30 }
  0x90   :  { %v1990_v4 = vsub.f32 %v687_v27, %v688_v44  ;;  %v1992_v24 = vadd.f32 %v691_v62, %v690_v6  ;;  %v697_v40 = vmul.f32 %v1964_v36, %v1816_v21  ;;  %v699_v63 = vmul.f32 %v1961_v59, %v1794_v15 }
  0x91   :  { %v1998_v43 = vadd.f32 %v694_v34, %v693_v10  ;;  %v700_v13 = vmul.f32 %v1964_v36, %v1824_v26  ;;  %v702_v22 = vmul.f32 %v1964_v36, %v1792_v30  ;;  %v703_v17 = vmul.f32 %v1961_v59, %v1816_v21 }
  0x92   :  { %v2006_v48 = vsub.f32 %v696_v33, %v697_v40  ;;  %v705_v28 = vmul.f32 %v1964_v36, %v1794_v15  ;;  %v706_v23 = vmul.f32 %v1961_v59, %v1824_v26  ;;  %v708_v58 = vmul.f32 %v1961_v59, %v1826_v29 }
  0x93   :  { %v2014_v39 = vsub.f32 %v699_v63, %v700_v13  ;;  %v2016_v57 = vadd.f32 %v703_v17, %v702_v22  ;;  %v709_v30 = vmul.f32 %v1964_v36, %v1850_v16  ;;  %v711_v21 = vmul.f32 %v1961_v59, %v1832_v54 }
  0x94   :  { %v2022_v2 = vadd.f32 %v706_v23, %v705_v28  ;;  %v712_v15 = vmul.f32 %v1964_v36, %v1856_v12  ;;  %v714_v26 = vmul.f32 %v1964_v36, %v1826_v29  ;;  %v715_v49 = vmul.f32 %v1961_v59, %v1850_v16 }
  0x95   :  { %v2030_v0 = vsub.f32 %v708_v58, %v709_v30  ;;  %v717_v42 = vmul.f32 %v1964_v36, %v1832_v54  ;;  %v718_v19 = vmul.f32 %v1961_v59, %v1856_v12  ;;  %v720_v35 = vmul.f32 %v1961_v59, %v1840_v25 }
  0x96   :  { %v2038_v18 = vsub.f32 %v711_v21, %v712_v15  ;;  %v2040_v52 = vadd.f32 %v715_v49, %v714_v26  ;;  %v721_v29 = vmul.f32 %v1964_v36, %v1864_v56  ;;  %v723_v16 = vmul.f32 %v1961_v59, %v1848_v45 }
  0x97   :  { %v2046_v11 = vadd.f32 %v718_v19, %v717_v42  ;;  %v724_v54 = vmul.f32 %v1964_v36, %v1872_v50  ;;  %v726_v12 = vmul.f32 %v1964_v36, %v1840_v25  ;;  %v727_v8 = vmul.f32 %v1961_v59, %v1864_v56 }
  0x98   :  { %v2054_v61 = vsub.f32 %v720_v35, %v721_v29  ;;  %v729_v7 = vmul.f32 %v1964_v36, %v1848_v45  ;;  %v730_v27 = vmul.f32 %v1961_v59, %v1872_v50  ;;  %v732_v44 = vmul.f32 %v1961_v59, %v1874_v9 }
  0x99   :  { %v2062_v6 = vsub.f32 %v723_v16, %v724_v54  ;;  %v2064_v62 = vadd.f32 %v727_v8, %v726_v12  ;;  %v733_v25 = vmul.f32 %v1964_v36, %v1902_v47  ;;  %v735_v56 = vmul.f32 %v1961_v59, %v1880_v32 }
  0x9a   :  { %v2070_v10 = vadd.f32 %v730_v27, %v729_v7  ;;  %v736_v45 = vmul.f32 %v1964_v36, %v1908_v46  ;;  %v738_v50 = vmul.f32 %v1964_v36, %v1874_v9  ;;  %v739_v34 = vmul.f32 %v1961_v59, %v1902_v47 }
  0x9b   :  { %v2078_v33 = vsub.f32 %v732_v44, %v733_v25  ;;  %v741_v40 = vmul.f32 %v1964_v36, %v1880_v32  ;;  %v742_v63 = vmul.f32 %v1961_v59, %v1908_v46  ;;  %v744_v13 = vmul.f32 %v1961_v59, %v1890_v38 }
  0x9c   :  { %v2086_v22 = vsub.f32 %v735_v56, %v736_v45  ;;  %v2088_v17 = vadd.f32 %v739_v34, %v738_v50  ;;  %v745_v9 = vmul.f32 %v1964_v36, %v1916_v60  ;;  %v747_v47 = vmul.f32 %v1961_v59, %v1900_v14 }
  0x9d   :  { %v2096_v28 = vadd.f32 %v742_v63, %v741_v40  ;;  %v748_v32 = vmul.f32 %v1964_v36, %v1924_v55  ;;  %v750_v46 = vmul.f32 %v1964_v36, %v1890_v38  ;;  %v751_v23 = vmul.f32 %v1961_v59, %v1916_v60 }
  0x9e   :  { %v2106_v58 = vsub.f32 %v744_v13, %v745_v9  ;;  %v753_v30 = vmul.f32 %v1964_v36, %v1900_v14  ;;  %v754_v21 = vmul.f32 %v1961_v59, %v1924_v55  ;;  %v756_v15 = vmul.f32 %v1961_v59, %v1926_v1 }
  0x9f   :  { %v2114_v26 = vsub.f32 %v747_v47, %v748_v32  ;;  %v2116_v49 = vadd.f32 %v751_v23, %v750_v46  ;;  %v757_v38 = vmul.f32 %v1964_v36, %v1950_v20  ;;  %v759_v60 = vmul.f32 %v1961_v59, %v1932_v37 }
  0xa0   :  { %v2122_v42 = vadd.f32 %v754_v21, %v753_v30  ;;  %v760_v14 = vmul.f32 %v1964_v36, %v1956_v51  ;;  %v762_v55 = vmul.f32 %v1964_v36, %v1926_v1  ;;  %v763_v19 = vmul.f32 %v1961_v59, %v1950_v20 }
  0xa1   :  { %v2130_v35 = vsub.f32 %v756_v15, %v757_v38  ;;  %v765_v29 = vmul.f32 %v1964_v36, %v1932_v37  ;;  %v766_v16 = vmul.f32 %v1961_v59, %v1956_v51  ;;  %v768_v54 = vmul.f32 %v1961_v59, %v1940_v41 }
  0xa2   :  { %v2138_v12 = vsub.f32 %v759_v60, %v760_v14  ;;  %v2140_v8 = vadd.f32 %v763_v19, %v762_v55  ;;  %v769_v1 = vmul.f32 %v1964_v36, %v1966_v31  ;;  %v771_v20 = vmul.f32 %v1961_v59, %v1948_v53 }
  0xa3   :  { %v2146_v7 = vadd.f32 %v766_v16, %v765_v29  ;;  %v772_v37 = vmul.f32 %v1964_v36, %v1974_v5  ;;  %v774_v51 = vmul.f32 %v1964_v36, %v1940_v41  ;;  %v775_v27 = vmul.f32 %v1961_v59, %v1966_v31 }
  0xa4   :  { %v2154_v44 = vsub.f32 %v768_v54, %v769_v1  ;;  %v777_v25 = vmul.f32 %v1964_v36, %v1948_v53  ;;  %v778_v56 = vmul.f32 %v1961_v59, %v1974_v5  ;;  %v2161_v45 = vstv %s2094_s21 }
  0xa5   :  { %v2163_v50 = vsub.f32 %v771_v20, %v772_v37  ;;  %v2165_v34 = vadd.f32 %v775_v27, %v774_v51  ;;  %v783_v41 = vmul.f32 %v2161_v45, %v1982_v3  ;;  %v2170_v40 = vstv %s2104_s22 }
  0xa6   :  { %v2172_v31 = vadd.f32 %v778_v56, %v777_v25  ;;  %v785_v63 = vmul.f32 %v2170_v40, %v2030_v0  ;;  %v787_v53 = vmul.f32 %v2161_v45, %v1990_v4  ;;  %v788_v59 = vmul.f32 %v2170_v40, %v2038_v18 }
  0xa7   :  { %v790_v36 = vmul.f32 %v2170_v40, %v1982_v3  ;;  %v791_v5 = vmul.f32 %v2161_v45, %v2030_v0  ;;  %v793_v13 = vmul.f32 %v2170_v40, %v1990_v4  ;;  %v794_v9 = vmul.f32 %v2161_v45, %v2038_v18 }
  0xa8   :  { %v2188_v47 = vsub.f32 %v783_v41, %v785_v63  ;;  %v2190_v32 = vsub.f32 %v787_v53, %v788_v59  ;;  %v796_v46 = vmul.f32 %v2161_v45, %v2006_v48  ;;  %v797_v23 = vmul.f32 %v2170_v40, %v2054_v61 }
  0xa9   :  { %v2196_v3 = vadd.f32 %v791_v5, %v790_v36  ;;  %v2198_v30 = vadd.f32 %v794_v9, %v793_v13  ;;  %v799_v4 = vmul.f32 %v2161_v45, %v2014_v39  ;;  %v800_v0 = vmul.f32 %v2170_v40, %v2062_v6 }
  0xaa   :  { %v2204_v18 = vsub.f32 %v796_v46, %v797_v23  ;;  %v802_v21 = vmul.f32 %v2170_v40, %v2006_v48  ;;  %v803_v15 = vmul.f32 %v2161_v45, %v2054_v61  ;;  %v805_v38 = vmul.f32 %v2170_v40, %v2014_v39 }
  0xab   :  { %v2212_v60 = vsub.f32 %v799_v4, %v800_v0  ;;  %v806_v14 = vmul.f32 %v2161_v45, %v2062_v6  ;;  %v808_v55 = vmul.f32 %v2161_v45, %v1992_v24  ;;  %v809_v19 = vmul.f32 %v2170_v40, %v2040_v52 }
  0xac   :  { %v2220_v29 = vadd.f32 %v803_v15, %v802_v21  ;;  %v811_v48 = vmul.f32 %v2161_v45, %v1998_v43  ;;  %v812_v61 = vmul.f32 %v2170_v40, %v2046_v11  ;;  %v814_v39 = vmul.f32 %v2170_v40, %v1992_v24 }
  0xad   :  { %v2228_v16 = vadd.f32 %v806_v14, %v805_v38  ;;  %v2230_v6 = vsub.f32 %v808_v55, %v809_v19  ;;  %v815_v54 = vmul.f32 %v2161_v45, %v2040_v52  ;;  %v817_v1 = vmul.f32 %v2170_v40, %v1998_v43 }
  0xae   :  { %v2236_v20 = vsub.f32 %v811_v48, %v812_v61  ;;  %v818_v37 = vmul.f32 %v2161_v45, %v2046_v11  ;;  %v820_v51 = vmul.f32 %v2161_v45, %v2016_v57  ;;  %v821_v24 = vmul.f32 %v2170_v40, %v2064_v62 }
  0xaf   :  { %v2244_v27 = vadd.f32 %v815_v54, %v814_v39  ;;  %v823_v25 = vmul.f32 %v2161_v45, %v2022_v2  ;;  %v824_v52 = vmul.f32 %v2170_v40, %v2070_v10  ;;  %v826_v43 = vmul.f32 %v2170_v40, %v2016_v57 }
  0xb0   :  { %v2252_v56 = vadd.f32 %v818_v37, %v817_v1  ;;  %v2254_v11 = vsub.f32 %v820_v51, %v821_v24  ;;  %v827_v41 = vmul.f32 %v2161_v45, %v2064_v62  ;;  %v829_v63 = vmul.f32 %v2170_v40, %v2022_v2 }
  0xb1   :  { %v2260_v53 = vsub.f32 %v823_v25, %v824_v52  ;;  %v830_v59 = vmul.f32 %v2161_v45, %v2070_v10  ;;  %v832_v36 = vmul.f32 %v2161_v45, %v2078_v33  ;;  %v833_v57 = vmul.f32 %v2170_v40, %v2130_v35 }
  0xb2   :  { %v2268_v5 = vadd.f32 %v827_v41, %v826_v43  ;;  %v835_v13 = vmul.f32 %v2161_v45, %v2086_v22  ;;  %v836_v62 = vmul.f32 %v2170_v40, %v2138_v12  ;;  %v838_v2 = vmul.f32 %v2170_v40, %v2078_v33 }
  0xb3   :  { %v2276_v9 = vadd.f32 %v830_v59, %v829_v63  ;;  %v834_v10 = vsub.f32 %v832_v36, %v833_v57  ;;  %v839_v46 = vmul.f32 %v2161_v45, %v2130_v35  ;;  %v841_v23 = vmul.f32 %v2170_v40, %v2086_v22 }
  0xb4   :  { %v837_v4 = vsub.f32 %v835_v13, %v836_v62  ;;  %v842_v0 = vmul.f32 %v2161_v45, %v2138_v12  ;;  %v844_v21 = vmul.f32 %v2161_v45, %v2106_v58  ;;  %v845_v15 = vmul.f32 %v2170_v40, %v2154_v44 }
  0xb5   :  { %v2290_v33 = vadd.f32 %v839_v46, %v838_v2  ;;  %v847_v35 = vmul.f32 %v2161_v45, %v2114_v26  ;;  %v848_v22 = vmul.f32 %v2170_v40, %v2163_v50  ;;  %v850_v38 = vmul.f32 %v2170_v40, %v2106_v58 }
  0xb6   :  { %v2300_v12 = vadd.f32 %v842_v0, %v841_v23  ;;  %v846_v14 = vsub.f32 %v844_v21, %v845_v15  ;;  %v851_v55 = vmul.f32 %v2161_v45, %v2154_v44  ;;  %v853_v19 = vmul.f32 %v2170_v40, %v2114_v26 }
  0xb7   :  { %v849_v48 = vsub.f32 %v847_v35, %v848_v22  ;;  %v854_v61 = vmul.f32 %v2161_v45, %v2163_v50  ;;  %v856_v39 = vmul.f32 %v2161_v45, %v2088_v17  ;;  %v857_v58 = vmul.f32 %v2170_v40, %v2140_v8 }
  0xb8   :  { %v2312_v54 = vadd.f32 %v851_v55, %v850_v38  ;;  %v859_v1 = vmul.f32 %v2161_v45, %v2096_v28  ;;  %v860_v44 = vmul.f32 %v2170_v40, %v2146_v7  ;;  %v862_v26 = vmul.f32 %v2170_v40, %v2088_v17 }
  0xb9   :  { %v2320_v37 = vadd.f32 %v854_v61, %v853_v19  ;;  %v2322_v50 = vsub.f32 %v856_v39, %v857_v58  ;;  %v863_v51 = vmul.f32 %v2161_v45, %v2140_v8  ;;  %v865_v24 = vmul.f32 %v2170_v40, %v2096_v28 }
  0xba   :  { %v2328_v25 = vsub.f32 %v859_v1, %v860_v44  ;;  %v866_v52 = vmul.f32 %v2161_v45, %v2146_v7  ;;  %v868_v17 = vmul.f32 %v2161_v45, %v2116_v49  ;;  %v869_v43 = vmul.f32 %v2170_v40, %v2165_v34 }
  0xbb   :  { %v2336_v41 = vadd.f32 %v863_v51, %v862_v26  ;;  %v871_v8 = vmul.f32 %v2161_v45, %v2122_v42  ;;  %v872_v28 = vmul.f32 %v2170_v40, %v2172_v31  ;;  %v874_v63 = vmul.f32 %v2170_v40, %v2116_v49 }
  0xbc   :  { %v2344_v59 = vadd.f32 %v866_v52, %v865_v24  ;;  %v2346_v7 = vsub.f32 %v868_v17, %v869_v43  ;;  %v875_v36 = vmul.f32 %v2161_v45, %v2165_v34  ;;  %v877_v57 = vmul.f32 %v2170_v40, %v2122_v42 }
  0xbd   :  { %v2352_v13 = vsub.f32 %v871_v8, %v872_v28  ;;  %v878_v62 = vmul.f32 %v2161_v45, %v2172_v31  ;;  %v2357_v2 = vstv %s2288_s23  ;;  %v2360_v46 = vstv %s2298_s24 }
  0xbe   :  { %v2362_v49 = vadd.f32 %v875_v36, %v874_v63  ;;  %v883_v23 = vmul.f32 %v2357_v2, %v2188_v47  ;;  %v885_v0 = vmul.f32 %v2360_v46, %v834_v10  ;;  %v887_v34 = vmul.f32 %v2357_v2, %v2190_v32 }
  0xbf   :  { %v2369_v42 = vadd.f32 %v878_v62, %v877_v57  ;;  %v888_v40 = vmul.f32 %v2360_v46, %v837_v4  ;;  %v890_v45 = vmul.f32 %v2360_v46, %v2188_v47  ;;  %v891_v31 = vmul.f32 %v2357_v2, %v834_v10 }
  0xc0   :  { %v886_v21 = vsub.f32 %v883_v23, %v885_v0  ;;  %v893_v15 = vmul.f32 %v2360_v46, %v2190_v32  ;;  %v894_v35 = vmul.f32 %v2357_v2, %v837_v4  ;;  %v904_v22 = vmul.f32 %v2357_v2, %v2204_v18 }
  0xc1   :  { %v889_v38 = vsub.f32 %v887_v34, %v888_v40  ;;  %v892_v55 = vadd.f32 %v891_v31, %v890_v45  ;;  %v905_v19 = vmul.f32 %v2360_v46, %v846_v14  ;;  %v907_v61 = vmul.f32 %v2357_v2, %v2212_v60 }
  0xc2   :  { %v895_v39 = vadd.f32 %v894_v35, %v893_v15  ;;  %v896_v47 = vmul.f32 %v886_v21, %v886_v21  ;;  %v908_v10 = vmul.f32 %v2360_v46, %v849_v48  ;;  %v910_v58 = vmul.f32 %v2360_v46, %v2204_v18 }
  0xc3   :  { %v897_v32 = vmul.f32 %v889_v38, %v889_v38  ;;  %v899_v1 = vmul.f32 %v892_v55, %v892_v55  ;;  %v906_v4 = vsub.f32 %v904_v22, %v905_v19  ;;  %v911_v44 = vmul.f32 %v2357_v2, %v846_v14 }
  0xc4   :  { %v900_v26 = vmul.f32 %v895_v39, %v895_v39  ;;  %v909_v51 = vsub.f32 %v907_v61, %v908_v10  ;;  %v913_v24 = vmul.f32 %v2360_v46, %v2212_v60  ;;  %v914_v52 = vmul.f32 %v2357_v2, %v849_v48 }
  0xc5   :  { %v898_v17 = vadd.f32 %v897_v32, %v896_v47  ;;  %v912_v43 = vadd.f32 %v911_v44, %v910_v58  ;;  %v916_v8 = vmul.f32 %v906_v4, %v906_v4  ;;  %v928_v28 = vmul.f32 %v2357_v2, %v2230_v6 }
  0xc6   :  { %v901_v63 = vadd.f32 %v900_v26, %v899_v1  ;;  %v915_v18 = vadd.f32 %v914_v52, %v913_v24  ;;  %v917_v36 = vmul.f32 %v909_v51, %v909_v51  ;;  %v929_v57 = vmul.f32 %v2360_v46, %v2322_v50 }
  0xc7   :  { %v919_v14 = vmul.f32 %v912_v43, %v912_v43  ;;  %v931_v62 = vmul.f32 %v2357_v2, %v2236_v20  ;;  %v932_v60 = vmul.f32 %v2360_v46, %v2328_v25  ;;  %v934_v48 = vmul.f32 %v2360_v46, %v2230_v6 }
  0xc8   :  { %v902_v23 = vadd.f32 %v901_v63, %v898_v17  ;;  %v903_v0 = vsub.f32 %v898_v17, %v901_v63  ;;  %v918_v34 = vadd.f32 %v917_v36, %v916_v8  ;;  %v920_v40 = vmul.f32 %v915_v18, %v915_v18 }
  0xc9   :  { %v930_v45 = vsub.f32 %v928_v28, %v929_v57  ;;  %v933_v31 = vsub.f32 %v931_v62, %v932_v60  ;;  %v935_v21 = vmul.f32 %v2357_v2, %v2322_v50  ;;  %v937_v15 = vmul.f32 %v2360_v46, %v2236_v20 }
  0xca   :  { %v921_v35 = vadd.f32 %v920_v40, %v919_v14  ;;  %v922_v22 = vsub.f32 %v902_v23, %v918_v34  ;;  %v924_v38 = vadd.f32 %v918_v34, %v902_v23  ;;  %v926_v55 = vadd.f32 %v918_v34, %v903_v0 }
  0xcb   :  { %v936_v19 = vadd.f32 %v935_v21, %v934_v48  ;;  %v938_v6 = vmul.f32 %v2357_v2, %v2328_v25  ;;  %v940_v61 = vmul.f32 %v930_v45, %v930_v45  ;;  %v941_v39 = vmul.f32 %v933_v31, %v933_v31 }
  0xcc   :  { %v923_v47 = vsub.f32 %v922_v22, %v921_v35  ;;  %v925_v10 = vadd.f32 %v924_v38, %v921_v35  ;;  %v927_v58 = vsub.f32 %v926_v55, %v921_v35  ;;  %v954_v32 = vmul.f32 %v2357_v2, %v2254_v11 }
  0xcd   :  { %v939_v50 = vadd.f32 %v938_v6, %v937_v15  ;;  %v942_v1 = vadd.f32 %v941_v39, %v940_v61  ;;  %v943_v4 = vmul.f32 %v936_v19, %v936_v19  ;;  %v955_v20 = vmul.f32 %v2360_v46, %v2346_v7 }
  0xce   :  { %v957_v44 = vmul.f32 %v2357_v2, %v2260_v53  ;;  %v958_v25 = vmul.f32 %v2360_v46, %v2352_v13  ;;  %v960_v26 = vmul.f32 %v2360_v46, %v2254_v11  ;;  %v961_v51 = vmul.f32 %v2357_v2, %v2346_v7 }
  0xcf   :  { %v944_v24 = vmul.f32 %v939_v50, %v939_v50  ;;  %v946_v52 = vadd.f32 %v942_v1, %v923_v47  ;;  %v948_v17 = vsub.f32 %v925_v10, %v942_v1  ;;  %v950_v43 = vadd.f32 %v942_v1, %v925_v10 }
  0xd0   :  { %v952_v8 = vadd.f32 %v942_v1, %v927_v58  ;;  %v956_v28 = vsub.f32 %v954_v32, %v955_v20  ;;  %v959_v63 = vsub.f32 %v957_v44, %v958_v25  ;;  %v962_v18 = vadd.f32 %v961_v51, %v960_v26 }
  0xd1   :  { %v945_v36 = vadd.f32 %v944_v24, %v943_v4  ;;  %v963_v57 = vmul.f32 %v2360_v46, %v2260_v53  ;;  %v964_v14 = vmul.f32 %v2357_v2, %v2352_v13  ;;  %v980_v11 = vmul.f32 %v2357_v2, %v2196_v3 }
  0xd2   :  { %v966_v62 = vmul.f32 %v956_v28, %v956_v28  ;;  %v967_v7 = vmul.f32 %v959_v63, %v959_v63  ;;  %v969_v60 = vmul.f32 %v962_v18, %v962_v18  ;;  %v981_v48 = vmul.f32 %v2360_v46, %v2290_v33 }
  0xd3   :  { %v947_v23 = vadd.f32 %v946_v52, %v945_v36  ;;  %v949_v0 = vsub.f32 %v948_v17, %v945_v36  ;;  %v951_v34 = vadd.f32 %v950_v43, %v945_v36  ;;  %v953_v40 = vsub.f32 %v952_v8, %v945_v36 }
  0xd4   :  { %v965_v45 = vadd.f32 %v964_v14, %v963_v57  ;;  %v968_v31 = vadd.f32 %v967_v7, %v966_v62  ;;  %v982_v21 = vsub.f32 %v980_v11, %v981_v48  ;;  %v983_v53 = vmul.f32 %v2357_v2, %v2198_v30 }
  0xd5   :  { %v984_v13 = vmul.f32 %v2360_v46, %v2300_v12  ;;  %v986_v15 = vmul.f32 %v2360_v46, %v2196_v3  ;;  %v987_v35 = vmul.f32 %v2357_v2, %v2290_v33  ;;  %v989_v22 = vmul.f32 %v2360_v46, %v2198_v30 }
  0xd6   :  { %v970_v38 = vmul.f32 %v965_v45, %v965_v45  ;;  %v972_v55 = vsub.f32 %v947_v23, %v968_v31  ;;  %v974_v19 = vsub.f32 %v949_v0, %v968_v31  ;;  %v976_v6 = vadd.f32 %v968_v31, %v951_v34 }
  0xd7   :  { %v978_v61 = vadd.f32 %v968_v31, %v953_v40  ;;  %v985_v39 = vsub.f32 %v983_v53, %v984_v13  ;;  %v988_v47 = vadd.f32 %v987_v35, %v986_v15  ;;  %v990_v10 = vmul.f32 %v2357_v2, %v2300_v12 }
  0xd8   :  { %v971_v58 = vadd.f32 %v970_v38, %v969_v60  ;;  %v992_v32 = vmul.f32 %v982_v21, %v982_v21  ;;  %v1006_v3 = vmul.f32 %v2357_v2, %v2220_v29  ;;  %v1007_v33 = vmul.f32 %v2360_v46, %v2312_v54 }
  0xd9   :  { %v991_v50 = vadd.f32 %v990_v10, %v989_v22  ;;  %v993_v30 = vmul.f32 %v985_v39, %v985_v39  ;;  %v995_v1 = vmul.f32 %v988_v47, %v988_v47  ;;  %v1009_v4 = vmul.f32 %v2357_v2, %v2228_v16 }
  0xda   :  { %v973_v20 = vsub.f32 %v972_v55, %v971_v58  ;;  %v975_v44 = vsub.f32 %v974_v19, %v971_v58  ;;  %v977_v25 = vadd.f32 %v976_v6, %v971_v58  ;;  %v979_v26 = vsub.f32 %v978_v61, %v971_v58 }
  0xdb   :  { %v994_v51 = vadd.f32 %v993_v30, %v992_v32  ;;  %v996_v12 = vmul.f32 %v991_v50, %v991_v50  ;;  %v1008_v24 = vsub.f32 %v1006_v3, %v1007_v33  ;;  %v1010_v52 = vmul.f32 %v2360_v46, %v2320_v37 }
  0xdc   :  { %v1012_v17 = vmul.f32 %v2360_v46, %v2220_v29  ;;  %v1013_v43 = vmul.f32 %v2357_v2, %v2312_v54  ;;  %v1015_v8 = vmul.f32 %v2360_v46, %v2228_v16  ;;  %v1016_v28 = vmul.f32 %v2357_v2, %v2320_v37 }
  0xdd   :  { %v997_v63 = vadd.f32 %v996_v12, %v995_v1  ;;  %v998_v18 = vadd.f32 %v994_v51, %v973_v20  ;;  %v1000_v36 = vadd.f32 %v994_v51, %v975_v44  ;;  %v1002_v57 = vsub.f32 %v977_v25, %v994_v51 }
  0xde   :  { %v1004_v14 = vadd.f32 %v994_v51, %v979_v26  ;;  %v1011_v11 = vsub.f32 %v1009_v4, %v1010_v52  ;;  %v1014_v62 = vadd.f32 %v1013_v43, %v1012_v17  ;;  %v1017_v7 = vadd.f32 %v1016_v28, %v1015_v8 }
  0xdf   :  { %v999_v60 = vadd.f32 %v998_v18, %v997_v63  ;;  %v1001_v48 = vadd.f32 %v1000_v36, %v997_v63  ;;  %v1003_v29 = vsub.f32 %v1002_v57, %v997_v63  ;;  %v1018_v23 = vmul.f32 %v1008_v24, %v1008_v24 }
  0xe0   :  { %v1005_v0 = vsub.f32 %v1004_v14, %v997_v63  ;;  %v1019_v54 = vmul.f32 %v1011_v11, %v1011_v11  ;;  %v1021_v34 = vmul.f32 %v1014_v62, %v1014_v62  ;;  %v1022_v40 = vmul.f32 %v1017_v7, %v1017_v7 }
  0xe1   :  { %v1032_v16 = vmul.f32 %v2357_v2, %v2244_v27  ;;  %v1033_v37 = vmul.f32 %v2360_v46, %v2336_v41  ;;  %v1035_v45 = vmul.f32 %v2357_v2, %v2252_v56  ;;  %v1036_v31 = vmul.f32 %v2360_v46, %v2344_v59 }
  0xe2   :  { %v1020_v21 = vadd.f32 %v1019_v54, %v1018_v23  ;;  %v1023_v53 = vadd.f32 %v1022_v40, %v1021_v34  ;;  %v1038_v13 = vmul.f32 %v2360_v46, %v2244_v27  ;;  %v1039_v15 = vmul.f32 %v2357_v2, %v2336_v41 }
  0xe3   :  { %v1034_v35 = vsub.f32 %v1032_v16, %v1033_v37  ;;  %v1037_v22 = vsub.f32 %v1035_v45, %v1036_v31  ;;  %v1041_v38 = vmul.f32 %v2360_v46, %v2252_v56  ;;  %v1042_v55 = vmul.f32 %v2357_v2, %v2344_v59 }
  0xe4   :  { %v1024_v19 = vsub.f32 %v999_v60, %v1020_v21  ;;  %v1026_v6 = vadd.f32 %v1020_v21, %v1001_v48  ;;  %v1028_v61 = vsub.f32 %v1003_v29, %v1020_v21  ;;  %v1030_v39 = vadd.f32 %v1020_v21, %v1005_v0 }
  0xe5   :  { %v1040_v47 = vadd.f32 %v1039_v15, %v1038_v13  ;;  %v1043_v10 = vadd.f32 %v1042_v55, %v1041_v38  ;;  %v1044_v58 = vmul.f32 %v1034_v35, %v1034_v35  ;;  %v1045_v32 = vmul.f32 %v1037_v22, %v1037_v22 }
  0xe6   :  { %v1025_v27 = vsub.f32 %v1024_v19, %v1023_v53  ;;  %v1027_v3 = vadd.f32 %v1026_v6, %v1023_v53  ;;  %v1029_v33 = vsub.f32 %v1028_v61, %v1023_v53  ;;  %v1031_v41 = vsub.f32 %v1030_v39, %v1023_v53 }
  0xe7   :  { %v1046_v50 = vadd.f32 %v1045_v32, %v1044_v58  ;;  %v1047_v30 = vmul.f32 %v1040_v47, %v1040_v47  ;;  %v1048_v1 = vmul.f32 %v1043_v10, %v1043_v10  ;;  %v1058_v56 = vmul.f32 %v2357_v2, %v2268_v5 }
  0xe8   :  { %v1059_v59 = vmul.f32 %v2360_v46, %v2362_v49  ;;  %v1061_v4 = vmul.f32 %v2357_v2, %v2276_v9  ;;  %v1062_v20 = vmul.f32 %v2360_v46, %v2369_v42  ;;  %v1064_v44 = vmul.f32 %v2360_v46, %v2268_v5 }
  0xe9   :  { %v1049_v25 = vadd.f32 %v1048_v1, %v1047_v30  ;;  %v1050_v26 = vadd.f32 %v1046_v50, %v1025_v27  ;;  %v1052_v51 = vsub.f32 %v1027_v3, %v1046_v50  ;;  %v1054_v12 = vsub.f32 %v1029_v33, %v1046_v50 }
  0xea   :  { %v1056_v24 = vadd.f32 %v1046_v50, %v1031_v41  ;;  %v1060_v52 = vsub.f32 %v1058_v56, %v1059_v59  ;;  %v1063_v17 = vsub.f32 %v1061_v4, %v1062_v20  ;;  %v1065_v43 = vmul.f32 %v2357_v2, %v2362_v49 }
  0xeb   :  { %v1067_v8 = vmul.f32 %v2360_v46, %v2276_v9  ;;  %v1051_v28 = vadd.f32 %v1050_v26, %v1049_v25  ;;  %v1068_v18 = vmul.f32 %v2357_v2, %v2369_v42  ;;  %v1053_v5 = vsub.f32 %v1052_v51, %v1049_v25 }
  0xec   :  { %v1066_v63 = vadd.f32 %v1065_v43, %v1064_v44  ;;  %v1070_v36 = vmul.f32 %v1060_v52, %v1060_v52  ;;  %v1055_v57 = vsub.f32 %v1054_v12, %v1049_v25  ;;  %v1057_v14 = vsub.f32 %v1056_v24, %v1049_v25 }
  0xed   :  { %v1071_v11 = vmul.f32 %v1063_v17, %v1063_v17  ;;  %v1069_v62 = vadd.f32 %v1068_v18, %v1067_v8 }
  0xee   :  { %v1073_v7 = vmul.f32 %v1066_v63, %v1066_v63 }
  0xef   :  { %v1072_v60 = vadd.f32 %v1071_v11, %v1070_v36  ;;  %v1074_v48 = vmul.f32 %v1069_v62, %v1069_v62 }
  0xf1   :  { %v1076_v29 = vsub.f32 %v1051_v28, %v1072_v60  ;;  %v1078_v23 = vsub.f32 %v1053_v5, %v1072_v60  ;;  %v1080_v49 = vsub.f32 %v1055_v57, %v1072_v60  ;;  %v1082_v0 = vadd.f32 %v1072_v60, %v1057_v14 }
  0xf2   :  { %v1075_v54 = vadd.f32 %v1074_v48, %v1073_v7 }
  0xf4   :  { %v1077_v9 = vsub.f32 %v1076_v29, %v1075_v54  ;;  %v1079_v46 = vsub.f32 %v1078_v23, %v1075_v54  ;;  %v1081_v34 = vsub.f32 %v1080_v49, %v1075_v54  ;;  %v1083_v40 = vsub.f32 %v1082_v0, %v1075_v54 }
  0xf6   :  { %1084 = vst [vmem:[%s2500_s2] sm:$0xff] %v1077_v9 }
  0xf7   :  { %1199 = vst [vmem:[%s2500_s2 + $0x8] sm:$0xff] %v1079_v46 }
  0xf8   :  { %1200 = vst [vmem:[%s2500_s2 + $0x10] sm:$0xff] %v1081_v34 }
  0xf9   :  { %1201 = vst [vmem:[%s2500_s2 + $0x18] sm:$0xff] %v1083_v40 }
  0xfa   :  { %1095 = vsyncpa [#allocation3], 1 }

// kernel: net_forward.3
= control target key start
LH: loop header
LB: loop body
LE: loop exit
PB: predicated region body
PF: predicated region fallthrough
CT: control target
= control target key end

     0   :  { %vm52_vm0 = vcmask 1043456   ;;  %v1278_v3 = vmov 0   ;;  %vm45_vm1 = vcmask 293888   ;;  %vm126_vm4 = vcmask 130048   ;;  %s1767_s0 = inlined_call_operand.vmem [shape: f32[16,36,128], index: 0, kind: input, shape index: {}]   ;;  %s1768_s2 = inlined_call_operand.vmem [shape: f32[16,1], index: 2, kind: input, shape index: {}]   ;;  %s1769_s1 = inlined_call_operand.vmem [shape: f32[16,36], index: 1, kind: input, shape index: {}]   ;;  %s1770_s3 = inlined_call_operand.vmem [shape: f32[16,6,16], index: 3, kind: input, shape index: {}]   ;;  %s1771_s4 = inlined_call_operand.vmem [shape: f32[6,1], index: 4, kind: input, shape index: {}]   ;;  %s1772_s6 = inlined_call_operand.vmem [shape: f32[3,1], index: 6, kind: input, shape index: {}]   ;;  %s1773_s5 = inlined_call_operand.vmem [shape: f32[3,6], index: 5, kind: input, shape index: {}]   ;;  %s1774_s7 = inlined_call_operand.vmem [shape: f32[3,128], index: 7, kind: output, shape index: {}]  }
   0x1   :  { %v34_v0 = vld [vmem:[%s1767_s0 + $0x20] sm:$0xf]  ;;  %v1126_v1 = vld [vmem:[%s1767_s0 + $0x48] sm:$0xf]  ;;  %v1137_v2 = vld [vmem:[%s1767_s0 + $0x70] sm:$0xf]  ;;  %1276 = vset.pattern.permute.xlu0 %v1278_v3  ;;  %1277 = vset.pattern.permute.xlu1 %v1278_v3 }
   0x2   :  { %1119 = vmatpush.msk.msra.mxu0 %vm52_vm0, %v34_v0  ;;  %1127 = vmatpush.msk.msra.mxu1 %vm52_vm0, %v1126_v1  ;;  %v33_v4 = vld [vmem:[%s1767_s0 + $0x18] sm:$0xff]  ;;  %v1125_v5 = vld [vmem:[%s1767_s0 + $0x40] sm:$0xff]  ;;  %v1136_v6 = vld [vmem:[%s1767_s0 + $0x68] sm:$0xff] }
   0x3   :  { %1138 = vmatpush.msk.msra.mxu2 %vm52_vm0, %v1137_v2  ;;  %v32_v7 = vld [vmem:[%s1767_s0 + $0x10] sm:$0xff]  ;;  %v1124_v8 = vld [vmem:[%s1767_s0 + $0x38] sm:$0xff]  ;;  %v1135_v9 = vld [vmem:[%s1767_s0 + $0x60] sm:$0xff] }
   0x4   :  { %68 = vmatpush.msra.mxu0 %v33_v4  ;;  %107 = vmatpush.msra.mxu1 %v1125_v5  ;;  %v31_v10 = vld [vmem:[%s1767_s0 + $0x8] sm:$0xff]  ;;  %v1123_v11 = vld [vmem:[%s1767_s0 + $0x30] sm:$0xff]  ;;  %v1134_v12 = vld [vmem:[%s1767_s0 + $0x58] sm:$0xff] }
   0x5   :  { %194 = vmatpush.msra.mxu2 %v1136_v6  ;;  %v29_v13 = vld [vmem:[%s1768_s2 + $0x8] sm:$0xff]  ;;  %v30_v14 = vld [vmem:[%s1767_s0] sm:$0xff]  ;;  %v1133_v16 = vld [vmem:[%s1767_s0 + $0x50] sm:$0xff] }
   0x6   :  { %69 = vmatpush.msra.mxu0 %v32_v7  ;;  %108 = vmatpush.msra.mxu1 %v1124_v8  ;;  %v1122_v15 = vld [vmem:[%s1767_s0 + $0x28] sm:$0xff]  ;;  %v1373_v17 = vld [vmem:[%s1769_s1] sm:$0xff]  ;;  %v1156_v19 = vld [vmem:[%s1767_s0 + $0xb8] sm:$0xff] }
   0x7   :  { %195 = vmatpush.msra.mxu2 %v1135_v9  ;;  %42 = vperm.xlu0 %1276, %v29_v13   ;;  %v1157_v18 = vld [vmem:[%s1767_s0 + $0xc0] sm:$0xf]  ;;  %v1155_v21 = vld [vmem:[%s1767_s0 + $0xb0] sm:$0xff]  ;;  %v1397_v22 = vld [vmem:[%s1769_s1 + $0x8] sm:$0xff] }
   0x8   :  { %70 = vmatpush.msra.mxu0 %v31_v10  ;;  %109 = vmatpush.msra.mxu1 %v1123_v11  ;;  %v28_v20 = vld [vmem:[%s1768_s2] sm:$0xff]  ;;  %v1154_v23 = vld [vmem:[%s1767_s0 + $0xa8] sm:$0xff]  ;;  %v1147_v55 = vld [vmem:[%s1767_s0 + $0x98] sm:$0xf] }
   0x9   :  { %196 = vmatpush.msra.mxu2 %v1134_v12  ;;  %v1153_v24 = vld [vmem:[%s1767_s0 + $0xa0] sm:$0xff]  ;;  %v1130_v42 = vld [vmem:[%s1770_s3 + $0x8] sm:$0x3f]  ;;  %v1146_v58 = vld [vmem:[%s1767_s0 + $0x90] sm:$0xff] }
   0xa   :  { %71 = vmatpush.msra.mxu0 %v30_v14  ;;  %110 = vmatpush.msra.mxu1 %v1122_v15  ;;  %v85_v53 = vld [vmem:[%s1770_s3] sm:$0x3f]  ;;  %v1145_v61 = vld [vmem:[%s1767_s0 + $0x88] sm:$0xff]  ;;  %v1141_v0 = vld [vmem:[%s1770_s3 + $0x10] sm:$0x3f] }
   0xb   :  { %197 = vmatpush.msra.mxu2 %v1133_v16  ;;  %1120 = vmatmul.msk.f32.vlgmr.msra.gmra.mxu0 %vm45_vm1, %v1373_v17  ;;  %v1144_v63 = vld [vmem:[%s1767_s0 + $0x80] sm:$0xff]  ;;  %v1143_v2 = vld [vmem:[%s1767_s0 + $0x78] sm:$0xff]  ;;  %v1177_v3 = vld [vmem:[%s1767_s0 + $0x110] sm:$0xf] }
   0xc   :  { %1128 = vmatmul.msk.f32.vlgmr.msra.gmra.mxu1 %vm45_vm1, %v1373_v17  ;;  %1139 = vmatmul.msk.f32.vlgmr.msra.gmra.mxu2 %vm45_vm1, %v1373_v17  ;;  %v1176_v4 = vld [vmem:[%s1767_s0 + $0x108] sm:$0xff]  ;;  %v1175_v5 = vld [vmem:[%s1767_s0 + $0x100] sm:$0xff]  ;;  %v1174_v6 = vld [vmem:[%s1767_s0 + $0xf8] sm:$0xff] }
   0xd   :  { %1158 = vmatpush.msk.msrb.mxu1 %vm52_vm0, %v1157_v18  ;;  %v1173_v7 = vld [vmem:[%s1767_s0 + $0xf0] sm:$0xff]  ;;  %v1161_v9 = vld [vmem:[%s1770_s3 + $0x20] sm:$0x3f] }
   0xf   :  { %322 = vmatpush.msrb.mxu1 %v1156_v19  ;;  %37 = vperm.xlu0 %1276, %v28_v20  }
  0x11   :  { %323 = vmatpush.msrb.mxu1 %v1155_v21 }
  0x13   :  { %1121 = vmatmul.msk.f32.gmra.mxu0 %vm45_vm1, %v1397_v22  ;;  %324 = vmatpush.msrb.mxu1 %v1154_v23  ;;  %v1151_v23 = vld [vmem:[%s1770_s3 + $0x18] sm:$0x3f] }
  0x14   :  { %1129 = vmatmul.msk.f32.gmra.mxu1 %vm45_vm1, %v1397_v22  ;;  %1140 = vmatmul.msk.f32.gmra.mxu2 %vm45_vm1, %v1397_v22 }
  0x15   :  { %325 = vmatpush.msrb.mxu1 %v1153_v24 }
  0x1c   :  { %1159 = vmatmul.msk.f32.vlgmr.msrb.gmra.mxu1 %vm45_vm1, %v1373_v17 }
  0x24   :  { %1160 = vmatmul.msk.f32.gmra.mxu1 %vm45_vm1, %v1397_v22 }
  0x79   :  { %v1415_v25 = vpop.permute.xlu0 %42 }
  0x81   :  { %v1417_v28 = vpop.permute.xlu0 %37 }
  0x88   :  { %v73_v26 = vpop.f32.mrf.mxu0 }
  0x89   :  { %v112_v27 = vpop.f32.mrf.mxu1  ;;  %v74_v35 = vadd.f32 %v73_v26, %v1417_v28  ;;  %v1167_v26 = vld [vmem:[%s1767_s0 + $0xe8] sm:$0xf] }
  0x8a   :  { %v113_v30 = vadd.f32 %v112_v27, %v1417_v28 }
  0x8b   :  { %v81_v45 = vmul.f32 0.1, %v74_v35  ;;  %vm79_vm6 = vcmp.ge.f32.partialorder %v74_v35, 0.0 }
  0x8c   :  { %v120_v37 = vmul.f32 0.1, %v113_v30  ;;  %vm118_vm3 = vcmp.ge.f32.partialorder %v113_v30, 0.0 }
  0x8d   :  { %v83_v50 = vsel %vm79_vm6, %v74_v35, %v81_v45 }
  0x8e   :  { %v122_v44 = vsel %vm118_vm3, %v113_v30, %v120_v37  ;;  %v1165_v30 = vld [vmem:[%s1767_s0 + $0xd8] sm:$0xff] }
  0x8f   :  { %v199_v29 = vpop.f32.mrf.mxu2 }
  0x90   :  { %v76_v31 = vpop.f32.mrf.mxu0  ;;  %v200_v40 = vadd.f32 %v199_v29, %v1417_v28  ;;  %v1166_v29 = vld [vmem:[%s1767_s0 + $0xe0] sm:$0xff] }
  0x91   :  { %v115_v32 = vpop.f32.mrf.mxu1  ;;  %v77_v33 = vadd.f32 %v76_v31, %v1415_v25  ;;  %v1164_v31 = vld [vmem:[%s1767_s0 + $0xd0] sm:$0xff] }
  0x92   :  { %v116_v34 = vadd.f32 %v115_v32, %v1415_v25  ;;  %v207_v49 = vmul.f32 0.1, %v200_v40  ;;  %vm205_vm8 = vcmp.ge.f32.partialorder %v200_v40, 0.0 }
  0x93   :  { %v82_v39 = vmul.f32 0.1, %v77_v33  ;;  %vm80_vm5 = vcmp.ge.f32.partialorder %v77_v33, 0.0 }
  0x94   :  { %vm119_vm2 = vcmp.ge.f32.partialorder %v116_v34, 0.0  ;;  %v121_v36 = vmul.f32 0.1, %v116_v34  ;;  %v209_v52 = vsel %vm205_vm8, %v200_v40, %v207_v49 }
  0x95   :  { %v84_v48 = vsel %vm80_vm5, %v77_v33, %v82_v39  ;;  %v1163_v33 = vld [vmem:[%s1767_s0 + $0xc8] sm:$0xff]  ;;  %v1196_v39 = vld [vmem:[%s1767_s0 + $0x158] sm:$0xff] }
  0x96   :  { %v123_v38 = vsel %vm119_vm2, %v116_v34, %v121_v36  ;;  %v1197_v36 = vld [vmem:[%s1767_s0 + $0x160] sm:$0xf] }
  0x97   :  { %144 = vmatpush.msra.mxu3 %v123_v38  ;;  %v202_v41 = vpop.f32.mrf.mxu2 }
  0x98   :  { %v203_v43 = vadd.f32 %v202_v41, %v1415_v25  ;;  %v1195_v41 = vld [vmem:[%s1767_s0 + $0x150] sm:$0xff] }
  0x99   :  { %145 = vmatpush.msra.mxu3 %v122_v44  ;;  %v327_v46 = vpop.f32.mrf.mxu1  ;;  %v1193_v44 = vld [vmem:[%s1767_s0 + $0x140] sm:$0xff] }
  0x9a   :  { %vm206_vm7 = vcmp.ge.f32.partialorder %v203_v43, 0.0  ;;  %v208_v47 = vmul.f32 0.1, %v203_v43  ;;  %1131 = vmatmul.msk.f32.vlgmr.msra.gmra.mxu3 %vm126_vm4, %v1130_v42  ;;  %v328_v54 = vadd.f32 %v327_v46, %v1417_v28 }
  0x9b   :  { %167 = vmatpush.msrb.mxu3 %v84_v48 }
  0x9c   :  { %v210_v51 = vsel %vm206_vm7, %v203_v43, %v208_v47  ;;  %v335_v60 = vmul.f32 0.1, %v328_v54  ;;  %vm333_vm10 = vcmp.ge.f32.partialorder %v328_v54, 0.0  ;;  %v1194_v43 = vld [vmem:[%s1767_s0 + $0x148] sm:$0xff]  ;;  %v1181_v47 = vld [vmem:[%s1770_s3 + $0x30] sm:$0x3f] }
  0x9d   :  { %168 = vmatpush.msrb.mxu3 %v83_v50 }
  0x9e   :  { %v337_v1 = vsel %vm333_vm10, %v328_v54, %v335_v60  ;;  %v1185_v60 = vld [vmem:[%s1767_s0 + $0x128] sm:$0xff] }
  0x9f   :  { %230 = vmatpush.msra.mxu3 %v210_v51 }
  0xa1   :  { %231 = vmatpush.msra.mxu3 %v209_v52  ;;  %v330_v56 = vpop.f32.mrf.mxu1 }
  0xa2   :  { %v331_v57 = vadd.f32 %v330_v56, %v1415_v25  ;;  %1132 = vmatmul.msk.f32.vlgmr.msrb.gmra.mxu3 %vm126_vm4, %v85_v53 }
  0xa3   :  { %1148 = vmatpush.msk.msrb.mxu3 %vm52_vm0, %v1147_v55  ;;  %v1171_v55 = vld [vmem:[%s1770_s3 + $0x28] sm:$0x3f] }
  0xa4   :  { %vm334_vm9 = vcmp.ge.f32.partialorder %v331_v57, 0.0  ;;  %v336_v59 = vmul.f32 0.1, %v331_v57 }
  0xa5   :  { %258 = vmatpush.msrb.mxu3 %v1146_v58 }
  0xa6   :  { %v338_v62 = vsel %vm334_vm9, %v331_v57, %v336_v59  ;;  %v1187_v57 = vld [vmem:[%s1767_s0 + $0x138] sm:$0xf]  ;;  %v1186_v59 = vld [vmem:[%s1767_s0 + $0x130] sm:$0xff] }
  0xa7   :  { %358 = vmatpush.msrb.mxu2 %v338_v62  ;;  %259 = vmatpush.msrb.mxu3 %v1145_v61  ;;  %v1184_v61 = vld [vmem:[%s1767_s0 + $0x120] sm:$0xff] }
  0xa9   :  { %359 = vmatpush.msrb.mxu2 %v337_v1  ;;  %260 = vmatpush.msrb.mxu3 %v1144_v63  ;;  %v1183_v63 = vld [vmem:[%s1767_s0 + $0x118] sm:$0xff] }
  0xaa   :  { %1142 = vmatmul.msk.f32.vlgmr.msra.gmra.mxu3 %vm126_vm4, %v1141_v0  ;;  %1162 = vmatmul.msk.f32.vlgmr.msrb.gmra.mxu2 %vm126_vm4, %v1161_v9  ;;  %v1214_v9 = vld [vmem:[%s1767_s0 + $0x198] sm:$0xff] }
  0xab   :  { %261 = vmatpush.msrb.mxu3 %v1143_v2  ;;  %v1217_v2 = vld [vmem:[%s1767_s0 + $0x1b0] sm:$0xf] }
  0xad   :  { %1178 = vmatpush.msk.msra.mxu3 %vm52_vm0, %v1177_v3 }
  0xaf   :  { %450 = vmatpush.msra.mxu3 %v1176_v4 }
  0xb1   :  { %451 = vmatpush.msra.mxu3 %v1175_v5  ;;  %v1216_v5 = vld [vmem:[%s1767_s0 + $0x1a8] sm:$0xff] }
  0xb2   :  { %1149 = vmatmul.msk.f32.vlgmr.msrb.gmra.mxu3 %vm45_vm1, %v1373_v17 }
  0xb3   :  { %452 = vmatpush.msra.mxu3 %v1174_v6 }
  0xb5   :  { %453 = vmatpush.msra.mxu3 %v1173_v7  ;;  %v1215_v7 = vld [vmem:[%s1767_s0 + $0x1a0] sm:$0xff] }
  0xba   :  { %1150 = vmatmul.msk.f32.gmra.mxu3 %vm45_vm1, %v1397_v22 }
  0xc2   :  { %1179 = vmatmul.msk.f32.vlgmr.msra.gmra.mxu3 %vm45_vm1, %v1373_v17 }
  0xca   :  { %1180 = vmatmul.msk.f32.gmra.mxu3 %vm45_vm1, %v1397_v22 }
 0x11d   :  { %v147_v8 = vpop.f32.mrf.mxu3 }
 0x125   :  { %v170_v10 = vpop.f32.mrf.mxu3 }
 0x126   :  { %v171_v11 = vadd.f32 %v170_v10, %v147_v8  ;;  %v1213_v10 = vld [vmem:[%s1767_s0 + $0x190] sm:$0xff] }
 0x12d   :  { %v233_v12 = vpop.f32.mrf.mxu3 }
 0x12e   :  { %v236_v13 = vadd.f32 %v233_v12, %v171_v11  ;;  %v1201_v11 = vld [vmem:[%s1770_s3 + $0x40] sm:$0x3f]  ;;  %v361_v12 = vpop.f32.mrf.mxu2 }
 0x135   :  { %v263_v14 = vpop.f32.mrf.mxu3 }
 0x136   :  { %v264_v15 = vadd.f32 %v263_v14, %v1417_v28 }
 0x138   :  { %v271_v20 = vmul.f32 0.1, %v264_v15  ;;  %vm269_vm12 = vcmp.ge.f32.partialorder %v264_v15, 0.0 }
 0x13a   :  { %v273_v24 = vsel %vm269_vm12, %v264_v15, %v271_v20 }
 0x13d   :  { %v266_v16 = vpop.f32.mrf.mxu3 }
 0x13e   :  { %v267_v18 = vadd.f32 %v266_v16, %v1415_v25 }
 0x140   :  { %vm270_vm11 = vcmp.ge.f32.partialorder %v267_v18, 0.0  ;;  %v272_v19 = vmul.f32 0.1, %v267_v18 }
 0x142   :  { %v274_v21 = vsel %vm270_vm11, %v267_v18, %v272_v19 }
 0x143   :  { %294 = vmatpush.msrb.mxu0 %v274_v21 }
 0x145   :  { %295 = vmatpush.msrb.mxu0 %v273_v24  ;;  %v455_v27 = vpop.f32.mrf.mxu3 }
 0x146   :  { %1152 = vmatmul.msk.f32.vlgmr.msrb.gmra.mxu0 %vm126_vm4, %v1151_v23  ;;  %v456_v32 = vadd.f32 %v455_v27, %v1417_v28 }
 0x147   :  { %1168 = vmatpush.msk.msra.mxu0 %vm52_vm0, %v1167_v26  ;;  %v1191_v26 = vld [vmem:[%s1770_s3 + $0x38] sm:$0x3f] }
 0x148   :  { %v463_v37 = vmul.f32 0.1, %v456_v32  ;;  %vm461_vm14 = vcmp.ge.f32.partialorder %v456_v32, 0.0 }
 0x149   :  { %386 = vmatpush.msra.mxu0 %v1166_v29  ;;  %v1207_v29 = vld [vmem:[%s1767_s0 + $0x188] sm:$0xf] }
 0x14a   :  { %v465_v42 = vsel %vm461_vm14, %v456_v32, %v463_v37  ;;  %v1205_v32 = vld [vmem:[%s1767_s0 + $0x178] sm:$0xff] }
 0x14b   :  { %387 = vmatpush.msra.mxu0 %v1165_v30 }
 0x14d   :  { %388 = vmatpush.msra.mxu0 %v1164_v31  ;;  %v458_v34 = vpop.f32.mrf.mxu3  ;;  %v1206_v31 = vld [vmem:[%s1767_s0 + $0x180] sm:$0xff] }
 0x14e   :  { %v459_v35 = vadd.f32 %v458_v34, %v1415_v25 }
 0x14f   :  { %389 = vmatpush.msra.mxu0 %v1163_v33  ;;  %v1204_v33 = vld [vmem:[%s1767_s0 + $0x170] sm:$0xff] }
 0x150   :  { %vm462_vm13 = vcmp.ge.f32.partialorder %v459_v35, 0.0  ;;  %v464_v38 = vmul.f32 0.1, %v459_v35  ;;  %1169 = vmatmul.msk.f32.vlgmr.msra.gmra.mxu0 %vm45_vm1, %v1373_v17 }
 0x151   :  { %1198 = vmatpush.msk.msrb.mxu0 %vm52_vm0, %v1197_v36 }
 0x152   :  { %v466_v40 = vsel %vm462_vm13, %v459_v35, %v464_v38  ;;  %v1203_v35 = vld [vmem:[%s1767_s0 + $0x168] sm:$0xff]  ;;  %v1237_v38 = vld [vmem:[%s1767_s0 + $0x200] sm:$0xf] }
 0x153   :  { %486 = vmatpush.msra.mxu1 %v466_v40  ;;  %578 = vmatpush.msrb.mxu0 %v1196_v39 }
 0x155   :  { %487 = vmatpush.msra.mxu1 %v465_v42  ;;  %579 = vmatpush.msrb.mxu0 %v1195_v41  ;;  %v1236_v41 = vld [vmem:[%s1767_s0 + $0x1f8] sm:$0xff] }
 0x156   :  { %1182 = vmatmul.msk.f32.vlgmr.msra.gmra.mxu1 %vm126_vm4, %v1181_v47 }
 0x157   :  { %580 = vmatpush.msrb.mxu0 %v1194_v43  ;;  %v1235_v43 = vld [vmem:[%s1767_s0 + $0x1f0] sm:$0xff] }
 0x158   :  { %1170 = vmatmul.msk.f32.gmra.mxu0 %vm45_vm1, %v1397_v22 }
 0x159   :  { %581 = vmatpush.msrb.mxu0 %v1193_v44 }
 0x160   :  { %1199 = vmatmul.msk.f32.vlgmr.msrb.gmra.mxu0 %vm45_vm1, %v1373_v17 }
 0x168   :  { %1200 = vmatmul.msk.f32.gmra.mxu0 %vm45_vm1, %v1397_v22 }
 0x1c3   :  { %v297_v45 = vpop.f32.mrf.mxu0 }
 0x1c4   :  { %v300_v46 = vadd.f32 %v297_v45, %v236_v13  ;;  %v1234_v45 = vld [vmem:[%s1767_s0 + $0x1e8] sm:$0xff] }
 0x1c6   :  { %v364_v13 = vadd.f32 %v361_v12, %v300_v46  ;;  %v1233_v46 = vld [vmem:[%s1767_s0 + $0x1e0] sm:$0xff] }
 0x1cd   :  { %v391_v48 = vpop.f32.mrf.mxu0 }
 0x1ce   :  { %v392_v49 = vadd.f32 %v391_v48, %v1417_v28 }
 0x1d0   :  { %v399_v52 = vmul.f32 0.1, %v392_v49  ;;  %vm397_vm2 = vcmp.ge.f32.partialorder %v392_v49, 0.0 }
 0x1d2   :  { %v401_v56 = vsel %vm397_vm2, %v392_v49, %v399_v52 }
 0x1d3   :  { %v489_v47 = vpop.f32.mrf.mxu1 }
 0x1d5   :  { %v394_v50 = vpop.f32.mrf.mxu0 }
 0x1d6   :  { %v395_v51 = vadd.f32 %v394_v50, %v1415_v25 }
 0x1d8   :  { %vm398_vm15 = vcmp.ge.f32.partialorder %v395_v51, 0.0  ;;  %v400_v53 = vmul.f32 0.1, %v395_v51 }
 0x1da   :  { %v402_v54 = vsel %vm398_vm15, %v395_v51, %v400_v53  ;;  %v1221_v51 = vld [vmem:[%s1770_s3 + $0x50] sm:$0x3f] }
 0x1db   :  { %422 = vmatpush.msra.mxu2 %v402_v54 }
 0x1dd   :  { %423 = vmatpush.msra.mxu2 %v401_v56  ;;  %v583_v58 = vpop.f32.mrf.mxu0 }
 0x1de   :  { %1172 = vmatmul.msk.f32.vlgmr.msra.gmra.mxu2 %vm126_vm4, %v1171_v55  ;;  %v584_v62 = vadd.f32 %v583_v58, %v1417_v28 }
 0x1df   :  { %1188 = vmatpush.msk.msrb.mxu2 %vm52_vm0, %v1187_v57 }
 0x1e0   :  { %v591_v3 = vmul.f32 0.1, %v584_v62  ;;  %vm589_vm5 = vcmp.ge.f32.partialorder %v584_v62, 0.0 }
 0x1e1   :  { %514 = vmatpush.msrb.mxu2 %v1186_v59  ;;  %v1211_v59 = vld [vmem:[%s1770_s3 + $0x48] sm:$0x3f] }
 0x1e2   :  { %v593_v8 = vsel %vm589_vm5, %v584_v62, %v591_v3  ;;  %v1223_v3 = vld [vmem:[%s1767_s0 + $0x1b8] sm:$0xff] }
 0x1e3   :  { %515 = vmatpush.msrb.mxu2 %v1185_v60 }
 0x1e5   :  { %516 = vmatpush.msrb.mxu2 %v1184_v61  ;;  %v586_v0 = vpop.f32.mrf.mxu0  ;;  %v1227_v61 = vld [vmem:[%s1767_s0 + $0x1d8] sm:$0xf] }
 0x1e6   :  { %v587_v1 = vadd.f32 %v586_v0, %v1415_v25  ;;  %v1225_v0 = vld [vmem:[%s1767_s0 + $0x1c8] sm:$0xff] }
 0x1e7   :  { %517 = vmatpush.msrb.mxu2 %v1183_v63  ;;  %v1226_v63 = vld [vmem:[%s1767_s0 + $0x1d0] sm:$0xff] }
 0x1e8   :  { %vm590_vm3 = vcmp.ge.f32.partialorder %v587_v1, 0.0  ;;  %v592_v4 = vmul.f32 0.1, %v587_v1  ;;  %1189 = vmatmul.msk.f32.vlgmr.msrb.gmra.mxu2 %vm45_vm1, %v1373_v17 }
 0x1e9   :  { %1218 = vmatpush.msk.msra.mxu2 %vm52_vm0, %v1217_v2 }
 0x1ea   :  { %v594_v6 = vsel %vm590_vm3, %v587_v1, %v592_v4  ;;  %v1224_v1 = vld [vmem:[%s1767_s0 + $0x1c0] sm:$0xff] }
 0x1eb   :  { %614 = vmatpush.msrb.mxu3 %v594_v6  ;;  %706 = vmatpush.msra.mxu2 %v1216_v5  ;;  %v1257_v6 = vld [vmem:[%s1767_s0 + $0x250] sm:$0xf] }
 0x1ed   :  { %615 = vmatpush.msrb.mxu3 %v593_v8  ;;  %707 = vmatpush.msra.mxu2 %v1215_v7 }
 0x1ee   :  { %1202 = vmatmul.msk.f32.vlgmr.msrb.gmra.mxu3 %vm126_vm4, %v1201_v11  ;;  %v1255_v11 = vld [vmem:[%s1767_s0 + $0x240] sm:$0xff] }
 0x1ef   :  { %708 = vmatpush.msra.mxu2 %v1214_v9  ;;  %v1256_v9 = vld [vmem:[%s1767_s0 + $0x248] sm:$0xff] }
 0x1f0   :  { %1190 = vmatmul.msk.f32.gmra.mxu2 %vm45_vm1, %v1397_v22 }
 0x1f1   :  { %709 = vmatpush.msra.mxu2 %v1213_v10 }
 0x1f8   :  { %1219 = vmatmul.msk.f32.vlgmr.msra.gmra.mxu2 %vm45_vm1, %v1373_v17 }
 0x200   :  { %1220 = vmatmul.msk.f32.gmra.mxu2 %vm45_vm1, %v1397_v22 }
 0x261   :  { %v425_v14 = vpop.f32.mrf.mxu2 }
 0x262   :  { %v428_v15 = vadd.f32 %v425_v14, %v364_v13  ;;  %v1254_v13 = vld [vmem:[%s1767_s0 + $0x238] sm:$0xff]  ;;  %v1253_v14 = vld [vmem:[%s1767_s0 + $0x230] sm:$0xff] }
 0x264   :  { %v492_v48 = vadd.f32 %v489_v47, %v428_v15  ;;  %v1241_v15 = vld [vmem:[%s1770_s3 + $0x60] sm:$0x3f] }
 0x26b   :  { %v519_v16 = vpop.f32.mrf.mxu2 }
 0x26c   :  { %v520_v18 = vadd.f32 %v519_v16, %v1417_v28 }
 0x26e   :  { %v527_v21 = vmul.f32 0.1, %v520_v18  ;;  %vm525_vm7 = vcmp.ge.f32.partialorder %v520_v18, 0.0 }
 0x270   :  { %v529_v27 = vsel %vm525_vm7, %v520_v18, %v527_v21 }
 0x271   :  { %v617_v16 = vpop.f32.mrf.mxu3 }
 0x273   :  { %v522_v19 = vpop.f32.mrf.mxu2 }
 0x274   :  { %v523_v20 = vadd.f32 %v522_v19, %v1415_v25 }
 0x276   :  { %vm526_vm6 = vcmp.ge.f32.partialorder %v523_v20, 0.0  ;;  %v528_v23 = vmul.f32 0.1, %v523_v20 }
 0x278   :  { %v530_v24 = vsel %vm526_vm6, %v523_v20, %v528_v23 }
 0x279   :  { %550 = vmatpush.msrb.mxu1 %v530_v24 }
 0x27b   :  { %551 = vmatpush.msrb.mxu1 %v529_v27  ;;  %v711_v30 = vpop.f32.mrf.mxu2 }
 0x27c   :  { %1192 = vmatmul.msk.f32.vlgmr.msrb.gmra.mxu1 %vm126_vm4, %v1191_v26  ;;  %v712_v34 = vadd.f32 %v711_v30, %v1417_v28 }
 0x27d   :  { %1208 = vmatpush.msk.msra.mxu1 %vm52_vm0, %v1207_v29 }
 0x27e   :  { %v719_v39 = vmul.f32 0.1, %v712_v34  ;;  %vm717_vm9 = vcmp.ge.f32.partialorder %v712_v34, 0.0 }
 0x27f   :  { %642 = vmatpush.msra.mxu1 %v1206_v31  ;;  %v1231_v31 = vld [vmem:[%s1770_s3 + $0x58] sm:$0x3f] }
 0x280   :  { %v721_v44 = vsel %vm717_vm9, %v712_v34, %v719_v39  ;;  %v1243_v39 = vld [vmem:[%s1767_s0 + $0x208] sm:$0xff]  ;;  %vm1086_vm9 = vcmask 48128  }
 0x281   :  { %643 = vmatpush.msra.mxu1 %v1205_v32 }
 0x283   :  { %644 = vmatpush.msra.mxu1 %v1204_v33  ;;  %v714_v36 = vpop.f32.mrf.mxu2  ;;  %v1247_v33 = vld [vmem:[%s1767_s0 + $0x228] sm:$0xf] }
 0x284   :  { %v715_v37 = vadd.f32 %v714_v36, %v1415_v25  ;;  %v1245_v36 = vld [vmem:[%s1767_s0 + $0x218] sm:$0xff] }
 0x285   :  { %645 = vmatpush.msra.mxu1 %v1203_v35  ;;  %v1246_v35 = vld [vmem:[%s1767_s0 + $0x220] sm:$0xff] }
 0x286   :  { %vm718_vm8 = vcmp.ge.f32.partialorder %v715_v37, 0.0  ;;  %v720_v40 = vmul.f32 0.1, %v715_v37  ;;  %1209 = vmatmul.msk.f32.vlgmr.msra.gmra.mxu1 %vm45_vm1, %v1373_v17 }
 0x287   :  { %1238 = vmatpush.msk.msrb.mxu1 %vm52_vm0, %v1237_v38 }
 0x288   :  { %v722_v42 = vsel %vm718_vm8, %v715_v37, %v720_v40  ;;  %v1244_v37 = vld [vmem:[%s1767_s0 + $0x210] sm:$0xff]  ;;  %vm1090_vm8 = vcmask 1045504  }
 0x289   :  { %742 = vmatpush.msra.mxu0 %v722_v42  ;;  %834 = vmatpush.msrb.mxu1 %v1236_v41 }
 0x28b   :  { %743 = vmatpush.msra.mxu0 %v721_v44  ;;  %835 = vmatpush.msrb.mxu1 %v1235_v43 }
 0x28c   :  { %1222 = vmatmul.msk.f32.vlgmr.msra.gmra.mxu0 %vm126_vm4, %v1221_v51 }
 0x28d   :  { %836 = vmatpush.msrb.mxu1 %v1234_v45 }
 0x28e   :  { %1210 = vmatmul.msk.f32.gmra.mxu1 %vm45_vm1, %v1397_v22 }
 0x28f   :  { %837 = vmatpush.msrb.mxu1 %v1233_v46 }
 0x296   :  { %1239 = vmatmul.msk.f32.vlgmr.msrb.gmra.mxu1 %vm45_vm1, %v1373_v17 }
 0x29e   :  { %1240 = vmatmul.msk.f32.gmra.mxu1 %vm45_vm1, %v1397_v22 }
 0x2f9   :  { %v553_v49 = vpop.f32.mrf.mxu1 }
 0x2fa   :  { %v556_v50 = vadd.f32 %v553_v49, %v492_v48 }
 0x2fc   :  { %v620_v18 = vadd.f32 %v617_v16, %v556_v50  ;;  %v1261_v50 = vld [vmem:[%s1770_s3 + $0x70] sm:$0x3f] }
 0x303   :  { %v647_v52 = vpop.f32.mrf.mxu1 }
 0x304   :  { %v648_v53 = vadd.f32 %v647_v52, %v1417_v28 }
 0x306   :  { %v655_v56 = vmul.f32 0.1, %v648_v53  ;;  %vm653_vm11 = vcmp.ge.f32.partialorder %v648_v53, 0.0 }
 0x308   :  { %v657_v60 = vsel %vm653_vm11, %v648_v53, %v655_v56 }
 0x309   :  { %v745_v46 = vpop.f32.mrf.mxu0 }
 0x30b   :  { %v650_v54 = vpop.f32.mrf.mxu1 }
 0x30c   :  { %v651_v55 = vadd.f32 %v650_v54, %v1415_v25 }
 0x30e   :  { %vm654_vm10 = vcmp.ge.f32.partialorder %v651_v55, 0.0  ;;  %v656_v57 = vmul.f32 0.1, %v651_v55 }
 0x310   :  { %v658_v58 = vsel %vm654_vm10, %v651_v55, %v656_v57 }
 0x311   :  { %678 = vmatpush.msra.mxu3 %v658_v58  ;;  %v1251_v58 = vld [vmem:[%s1770_s3 + $0x68] sm:$0x3f] }
 0x313   :  { %679 = vmatpush.msra.mxu3 %v657_v60  ;;  %v839_v62 = vpop.f32.mrf.mxu1  ;;  %v1267_v60 = vld [vmem:[%s1767_s0 + $0x278] sm:$0xf] }
 0x314   :  { %1212 = vmatmul.msk.f32.vlgmr.msra.gmra.mxu3 %vm126_vm4, %v1211_v59  ;;  %v840_v2 = vadd.f32 %v839_v62, %v1417_v28  ;;  %v1265_v62 = vld [vmem:[%s1767_s0 + $0x268] sm:$0xff] }
 0x315   :  { %1228 = vmatpush.msk.msrb.mxu3 %vm52_vm0, %v1227_v61  ;;  %v1266_v61 = vld [vmem:[%s1767_s0 + $0x270] sm:$0xff] }
 0x316   :  { %v847_v7 = vmul.f32 0.1, %v840_v2  ;;  %vm845_vm13 = vcmp.ge.f32.partialorder %v840_v2, 0.0 }
 0x317   :  { %770 = vmatpush.msrb.mxu3 %v1226_v63  ;;  %v1264_v63 = vld [vmem:[%s1767_s0 + $0x260] sm:$0xff] }
 0x318   :  { %v849_v12 = vsel %vm845_vm13, %v840_v2, %v847_v7  ;;  %v1069_v2 = vld [vmem:[%s1771_s4] sm:$0x3f] }
 0x319   :  { %771 = vmatpush.msrb.mxu3 %v1225_v0  ;;  %v1263_v0 = vld [vmem:[%s1767_s0 + $0x258] sm:$0xff]  ;;  %1072 = vperm.xlu1 %1277, %v1069_v2  }
 0x31b   :  { %772 = vmatpush.msrb.mxu3 %v1224_v1  ;;  %v842_v4 = vpop.f32.mrf.mxu1 }
 0x31c   :  { %v843_v5 = vadd.f32 %v842_v4, %v1415_v25 }
 0x31d   :  { %773 = vmatpush.msrb.mxu3 %v1223_v3 }
 0x31e   :  { %vm846_vm12 = vcmp.ge.f32.partialorder %v843_v5, 0.0  ;;  %v848_v8 = vmul.f32 0.1, %v843_v5  ;;  %1229 = vmatmul.msk.f32.vlgmr.msrb.gmra.mxu3 %vm45_vm1, %v1373_v17 }
 0x31f   :  { %1258 = vmatpush.msk.msra.mxu3 %vm52_vm0, %v1257_v6  ;;  %v1080_v6 = vld [vmem:[%s1772_s6] sm:$0x7] }
 0x320   :  { %v850_v10 = vsel %vm846_vm12, %v843_v5, %v848_v8 }
 0x321   :  { %870 = vmatpush.msrb.mxu2 %v850_v10  ;;  %962 = vmatpush.msra.mxu3 %v1256_v9 }
 0x322   :  { %1083 = vperm.xlu1 %1277, %v1080_v6  }
 0x323   :  { %871 = vmatpush.msrb.mxu2 %v849_v12  ;;  %963 = vmatpush.msra.mxu3 %v1255_v11  ;;  %v1271_v12 = vld [vmem:[%s1770_s3 + $0x78] sm:$0x3f] }
 0x324   :  { %1242 = vmatmul.msk.f32.vlgmr.msrb.gmra.mxu2 %vm126_vm4, %v1241_v15 }
 0x325   :  { %964 = vmatpush.msra.mxu3 %v1254_v13 }
 0x326   :  { %1230 = vmatmul.msk.f32.gmra.mxu3 %vm45_vm1, %v1397_v22 }
 0x327   :  { %965 = vmatpush.msra.mxu3 %v1253_v14 }
 0x32e   :  { %1259 = vmatmul.msk.f32.vlgmr.msra.gmra.mxu3 %vm45_vm1, %v1373_v17 }
 0x336   :  { %1260 = vmatmul.msk.f32.gmra.mxu3 %vm45_vm1, %v1397_v22 }
 0x397   :  { %v681_v19 = vpop.f32.mrf.mxu3 }
 0x398   :  { %v684_v20 = vadd.f32 %v681_v19, %v620_v18  ;;  %v1073_v18 = vpop.permute.xlu1 %1072 }
 0x39a   :  { %v748_v47 = vadd.f32 %v745_v46, %v684_v20  ;;  %v1079_v20 = vld [vmem:[%s1773_s5] sm:$0x7] }
 0x3a1   :  { %v775_v21 = vpop.f32.mrf.mxu3 }
 0x3a2   :  { %v776_v23 = vadd.f32 %v775_v21, %v1417_v28 }
 0x3a4   :  { %v783_v27 = vmul.f32 0.1, %v776_v23  ;;  %vm781_vm15 = vcmp.ge.f32.partialorder %v776_v23, 0.0 }
 0x3a6   :  { %v785_v32 = vsel %vm781_vm15, %v776_v23, %v783_v27  ;;  %v1084_v23 = vpop.permute.xlu1 %1083 }
 0x3a7   :  { %v873_v1 = vpop.f32.mrf.mxu2 }
 0x3a9   :  { %v778_v24 = vpop.f32.mrf.mxu3 }
 0x3aa   :  { %v779_v26 = vadd.f32 %v778_v24, %v1415_v25 }
 0x3ac   :  { %vm782_vm14 = vcmp.ge.f32.partialorder %v779_v26, 0.0  ;;  %v784_v29 = vmul.f32 0.1, %v779_v26 }
 0x3ae   :  { %v786_v30 = vsel %vm782_vm14, %v779_v26, %v784_v29 }
 0x3af   :  { %806 = vmatpush.msrb.mxu0 %v786_v30 }
 0x3b1   :  { %807 = vmatpush.msrb.mxu0 %v785_v32  ;;  %v967_v34 = vpop.f32.mrf.mxu3 }
 0x3b2   :  { %1232 = vmatmul.msk.f32.vlgmr.msrb.gmra.mxu0 %vm126_vm4, %v1231_v31  ;;  %v968_v38 = vadd.f32 %v967_v34, %v1417_v28 }
 0x3b3   :  { %1248 = vmatpush.msk.msra.mxu0 %vm52_vm0, %v1247_v33 }
 0x3b4   :  { %v975_v42 = vmul.f32 0.1, %v968_v38  ;;  %vm973_vm3 = vcmp.ge.f32.partialorder %v968_v38, 0.0 }
 0x3b5   :  { %898 = vmatpush.msra.mxu0 %v1246_v35 }
 0x3b6   :  { %v977_v45 = vsel %vm973_vm3, %v968_v38, %v975_v42 }
 0x3b7   :  { %899 = vmatpush.msra.mxu0 %v1245_v36 }
 0x3b9   :  { %900 = vmatpush.msra.mxu0 %v1244_v37  ;;  %v970_v40 = vpop.f32.mrf.mxu3 }
 0x3ba   :  { %v971_v41 = vadd.f32 %v970_v40, %v1415_v25 }
 0x3bb   :  { %901 = vmatpush.msra.mxu0 %v1243_v39 }
 0x3bc   :  { %vm974_vm2 = vcmp.ge.f32.partialorder %v971_v41, 0.0  ;;  %v976_v43 = vmul.f32 0.1, %v971_v41  ;;  %1249 = vmatmul.msk.f32.vlgmr.msra.gmra.mxu0 %vm45_vm1, %v1373_v17 }
 0x3be   :  { %v978_v44 = vsel %vm974_vm2, %v971_v41, %v976_v43 }
 0x3bf   :  { %998 = vmatpush.msra.mxu1 %v978_v44 }
 0x3c1   :  { %999 = vmatpush.msra.mxu1 %v977_v45 }
 0x3c2   :  { %1262 = vmatmul.msk.f32.vlgmr.msra.gmra.mxu1 %vm126_vm4, %v1261_v50 }
 0x3c4   :  { %1250 = vmatmul.msk.f32.gmra.mxu0 %vm45_vm1, %v1397_v22 }
 0x42f   :  { %v809_v48 = vpop.f32.mrf.mxu0 }
 0x430   :  { %v812_v49 = vadd.f32 %v809_v48, %v748_v47 }
 0x432   :  { %v876_v3 = vadd.f32 %v873_v1, %v812_v49 }
 0x439   :  { %v903_v51 = vpop.f32.mrf.mxu0 }
 0x43a   :  { %v904_v52 = vadd.f32 %v903_v51, %v1417_v28 }
 0x43c   :  { %v911_v55 = vmul.f32 0.1, %v904_v52  ;;  %vm909_vm6 = vcmp.ge.f32.partialorder %v904_v52, 0.0 }
 0x43e   :  { %v913_v59 = vsel %vm909_vm6, %v904_v52, %v911_v55 }
 0x43f   :  { %v1001_v14 = vpop.f32.mrf.mxu1 }
 0x441   :  { %v906_v53 = vpop.f32.mrf.mxu0 }
 0x442   :  { %v907_v54 = vadd.f32 %v906_v53, %v1415_v25 }
 0x444   :  { %vm910_vm5 = vcmp.ge.f32.partialorder %v907_v54, 0.0  ;;  %v912_v56 = vmul.f32 0.1, %v907_v54 }
 0x446   :  { %v914_v57 = vsel %vm910_vm5, %v907_v54, %v912_v56 }
 0x447   :  { %934 = vmatpush.msra.mxu2 %v914_v57 }
 0x449   :  { %935 = vmatpush.msra.mxu2 %v913_v59 }
 0x44a   :  { %1252 = vmatmul.msk.f32.vlgmr.msra.gmra.mxu2 %vm126_vm4, %v1251_v58 }
 0x44b   :  { %1268 = vmatpush.msk.msrb.mxu2 %vm52_vm0, %v1267_v60 }
 0x44d   :  { %1026 = vmatpush.msrb.mxu2 %v1266_v61 }
 0x44f   :  { %1027 = vmatpush.msrb.mxu2 %v1265_v62 }
 0x451   :  { %1028 = vmatpush.msrb.mxu2 %v1264_v63 }
 0x453   :  { %1029 = vmatpush.msrb.mxu2 %v1263_v0 }
 0x454   :  { %1269 = vmatmul.msk.f32.vlgmr.msrb.gmra.mxu2 %vm45_vm1, %v1373_v17 }
 0x45c   :  { %1270 = vmatmul.msk.f32.gmra.mxu2 %vm45_vm1, %v1397_v22 }
 0x4cd   :  { %v937_v4 = vpop.f32.mrf.mxu2 }
 0x4ce   :  { %v940_v5 = vadd.f32 %v937_v4, %v876_v3 }
 0x4d0   :  { %v1004_v15 = vadd.f32 %v1001_v14, %v940_v5 }
 0x4d7   :  { %v1031_v7 = vpop.f32.mrf.mxu2 }
 0x4d8   :  { %v1032_v17 = vadd.f32 %v1031_v7, %v1417_v28 }
 0x4da   :  { %v1039_v9 = vmul.f32 0.1, %v1032_v17  ;;  %vm1037_vm1 = vcmp.ge.f32.partialorder %v1032_v17, 0.0 }
 0x4dc   :  { %v1041_v13 = vsel %vm1037_vm1, %v1032_v17, %v1039_v9 }
 0x4df   :  { %v1034_v8 = vpop.f32.mrf.mxu2 }
 0x4e0   :  { %v1035_v22 = vadd.f32 %v1034_v8, %v1415_v25 }
 0x4e2   :  { %vm1038_vm0 = vcmp.ge.f32.partialorder %v1035_v22, 0.0  ;;  %v1040_v10 = vmul.f32 0.1, %v1035_v22 }
 0x4e4   :  { %v1042_v11 = vsel %vm1038_vm0, %v1035_v22, %v1040_v10 }
 0x4e5   :  { %1062 = vmatpush.msrb.mxu1 %v1042_v11 }
 0x4e7   :  { %1063 = vmatpush.msrb.mxu1 %v1041_v13 }
 0x4e8   :  { %1272 = vmatmul.msk.f32.vlgmr.msrb.gmra.mxu1 %vm126_vm4, %v1271_v12 }
 0x565   :  { %v1065_v28 = vpop.f32.mrf.mxu1 }
 0x566   :  { %v1068_v16 = vadd.f32 %v1065_v28, %v1004_v15 }
 0x568   :  { %v1075_v25 = vadd.f32 %v1073_v18, %v1068_v16 }
 0x56a   :  { %vm1076_vm7 = vcmp.ge.f32.partialorder %v1075_v25, 0.0  ;;  %v1077_v19 = vmul.f32 0.1, %v1075_v25 }
 0x56c   :  { %v1078_v21 = vsel %vm1076_vm7, %v1075_v25, %v1077_v19 }
 0x56d   :  { %1273 = vmatpush.msk.msrb.mxu0 %vm1090_vm8, %v1078_v21 }
 0x56e   :  { %1274 = vmatmul.msk.f32.vlgmr.msrb.gmra.mxu0 %vm1086_vm9, %v1079_v20 }
 0x5eb   :  { %v1111_v24 = vpop.f32.mrf.mxu0 }
 0x5ec   :  { %v1112_v26 = vadd.f32 %v1111_v24, %v1084_v23 }
 0x5ee   :  { %1114 = vst [vmem:[%s1774_s7] sm:$0x7] %v1112_v26 }

</bundles_post_ra>
